<compile_context>
chip_gen: v6e
topology: v6e:2x2x1
jax: 0.10.0
libtpu: 0.0.40
codegen_flags: <defaults>
</compile_context>

<pallas_src>
import math
import functools

import jax
import jax.numpy as jnp
from jax.experimental import pallas as pl
from jax.experimental.pallas import tpu as pltpu


def _round_up(x: int, m: int) -> int:
    return ((x + m - 1) // m) * m


def _gather_kernel(ids_ref, table_ref, out_ref, rows_ref, copy_sem, *, scale, chunk):
    # ids_ref   : (N_pad,) int32 token ids in SMEM (scalar prefetch)
    # table_ref : (V, E) embedding table, left in HBM (memory_space=pl.ANY)
    # out_ref   : (block_n, E) output block in VMEM
    # rows_ref  : (2, chunk, E) VMEM scratch (double-buffered row chunks)
    # copy_sem  : (2,) DMA semaphores (one shared semaphore per buffer slot)
    block_n = out_ref.shape[0]
    n_chunks = block_n // chunk
    base = pl.program_id(0) * block_n

    def issue_chunk(c, slot):
        # `chunk` is a small static constant -> statically unrolled issue loop,
        # every row DMA of the chunk is in flight at once, all on one semaphore.
        for r in range(chunk):
            token_id = ids_ref[base + c * chunk + r]
            pltpu.make_async_copy(
                table_ref.at[token_id],    # one (E,) row in HBM
                rows_ref.at[slot, r],      # one (E,) row in VMEM
                copy_sem.at[slot],
            ).start()

    def wait_chunk(slot):
        # All row DMAs of this slot signalled the same semaphore; wait per-row
        # byte count (paged-attention pattern). The first wait absorbs the
        # latency, the remaining ones are already satisfied.
        for r in range(chunk):
            pltpu.make_async_copy(
                table_ref.at[0],           # src is irrelevant for the wait
                rows_ref.at[slot, r],
                copy_sem.at[slot],
            ).wait()

    # Prime the pipeline: fetch chunk 0 into buffer slot 0.
    issue_chunk(0, 0)

    @pl.loop(0, n_chunks)
    def _(c):
        slot = c % 2

        # Prefetch the next chunk into the other buffer while this one lands.
        @pl.when(c + 1 < n_chunks)
        def _():
            issue_chunk(c + 1, 1 - slot)

        wait_chunk(slot)

        start = pl.multiple_of(c * chunk, chunk)
        rows = rows_ref[slot].astype(jnp.float32) * scale
        out_ref[pl.ds(start, chunk), :] = rows.astype(out_ref.dtype)


def token_embedding(tokens: jax.Array, emb_table: jax.Array,
                    *, block_n: int = 512, chunk: int = 32):
    """tokens: (B, S) integer ids; emb_table: (V, E) -> (B, S, E) = table[tokens] * sqrt(E)."""
    B, S = tokens.shape
    V, E = emb_table.shape
    N = B * S
    scale = float(math.sqrt(E))
    itemsize = jnp.dtype(emb_table.dtype).itemsize

    # Flatten ids (the `.long()` equivalent). torch raises on out-of-range ids;
    # here we clamp to keep the DMA gather in bounds.
    ids = jnp.clip(tokens.reshape(N).astype(jnp.int32), 0, V - 1)

    # Token-block size: multiple of `chunk`, no larger than needed, and capped so
    # the double-buffered output block stays comfortably inside VMEM (<= ~4 MiB
    # per buffer) even for large E / on v7x's 64 MiB VMEM.
    max_block_bytes = 4 * 1024 * 1024
    max_block_n = max(chunk, ((max_block_bytes // (E * itemsize)) // chunk) * chunk)
    block_n = min(block_n, max_block_n)
    block_n = max(chunk, min(block_n, _round_up(N, chunk)))
    block_n = _round_up(block_n, chunk)

    n_pad = _round_up(N, block_n)
    if n_pad != N:
        # Padding ids gather (valid) row 0; padded rows are sliced off below.
        ids = jnp.pad(ids, (0, n_pad - N))

    kernel = functools.partial(_gather_kernel, scale=scale, chunk=chunk)

    out_flat = pl.pallas_call(
        kernel,
        out_shape=jax.ShapeDtypeStruct((n_pad, E), emb_table.dtype),
        grid_spec=pltpu.PrefetchScalarGridSpec(
            num_scalar_prefetch=1,                          # token ids -> SMEM
            grid=(n_pad // block_n,),
            in_specs=[pl.BlockSpec(memory_space=pl.ANY)],   # table stays in HBM
            out_specs=pl.BlockSpec((block_n, E), lambda g, ids_ref: (g, 0)),
            scratch_shapes=[
                pltpu.VMEM((2, chunk, E), emb_table.dtype),  # double-buffered row chunks
                pltpu.SemaphoreType.DMA((2,)),               # one sem per buffer slot
            ],
        ),
        compiler_params=pltpu.CompilerParams(
            dimension_semantics=("parallel",),               # megacore-shard token blocks
        ),
    )(ids, emb_table)

    # TODO(synk): if E is not a multiple of 128, pad the E axis so the output
    # stores are fully lane-dense (currently correct, just masked stores).
    return out_flat[:N].reshape(B, S, E)


if __name__ == "__main__":
    # Small deterministic setup consistent with TokenEmbedding(vocab_size, emb_size).
    vocab_size = 32
    emb_size = 128
    batch, seq = 2, 8

    key = jax.random.PRNGKey(0)
    k_emb, k_tok, k_emb2, k_tok2 = jax.random.split(key, 4)

    # nn.Embedding default init: weight ~ N(0, 1)
    emb_table = jax.random.normal(k_emb, (vocab_size, emb_size), dtype=jnp.float32)
    tokens = jax.random.randint(k_tok, (batch, seq), 0, vocab_size, dtype=jnp.int32)

    out = jax.block_until_ready(token_embedding(tokens, emb_table))
    ref = emb_table[tokens] * math.sqrt(emb_size)
    assert out.shape == (batch, seq, emb_size)
    assert jnp.allclose(out, ref, atol=1e-6, rtol=1e-6)

    # Second check exercising multi-chunk double-buffering, multi-block grid and padding.
    V2, E2, B2, S2 = 512, 256, 4, 160
    emb_table2 = jax.random.normal(k_emb2, (V2, E2), dtype=jnp.float32)
    tokens2 = jax.random.randint(k_tok2, (B2, S2), 0, V2, dtype=jnp.int32)
    out2 = jax.block_until_ready(token_embedding(tokens2, emb_table2))
    ref2 = emb_table2[tokens2] * math.sqrt(E2)
    assert out2.shape == (B2, S2, E2)
    assert jnp.allclose(out2, ref2, atol=1e-6, rtol=1e-6)

    print("KERNEL_OK")
</pallas_src>

<mosaic_0001>
module attributes {stable_mosaic.version = 11 : i64} {
  func.func @_gather_kernel(%arg0: i32, %arg1: memref<32xi32, #tpu.memory_space<smem>>, %arg2: memref<32x128xf32, #tpu.memory_space<any>>, %arg3: memref<32x128xf32, #tpu.memory_space<vmem>>, %arg4: memref<2x32x128xf32, #tpu.memory_space<vmem>>, %arg5: memref<2x!tpu.dma_semaphore, #tpu.memory_space<semaphore_mem>>) attributes {dimension_semantics = [#tpu.dimension_semantics<parallel>], iteration_bounds = array<i64: 1>, scalar_prefetch = 1 : i64, scratch_operands = 2 : i64, tpu.core_type = #tpu.core_type<tc>, window_params = [{}, {transform_indices = @transform_1, window_bounds = array<i64: 32, 128>}]} {
    %c32_i32 = arith.constant 32 : i32
    %0 = arith.muli %arg0, %c32_i32 : i32
    %c0_i32 = arith.constant 0 : i32
    %1 = arith.addi %0, %c0_i32 : i32
    %c0_i32_0 = arith.constant 0 : i32
    %2 = arith.addi %1, %c0_i32_0 : i32
    %3 = arith.index_cast %2 : i32 to index
    %4 = memref.load %arg1[%3] : memref<32xi32, #tpu.memory_space<smem>>
    %c0_i32_1 = arith.constant 0 : i32
    %c0_i32_2 = arith.constant 0 : i32
    %c0_i32_3 = arith.constant 0 : i32
    %c0_i32_4 = arith.constant 0 : i32
    %5 = tpu.memref_slice %arg2[%4, %c0_i32_4] : memref<32x128xf32, #tpu.memory_space<any>> -> memref<1x128xf32, #tpu.memory_space<any>>
    %6 = tpu.memref_squeeze %5 : memref<1x128xf32, #tpu.memory_space<any>> -> memref<128xf32, #tpu.memory_space<any>>
    %c0_i32_5 = arith.constant 0 : i32
    %7 = tpu.memref_slice %arg4[%c0_i32_1, %c0_i32_2, %c0_i32_5] : memref<2x32x128xf32, #tpu.memory_space<vmem>> -> memref<1x1x128xf32, #tpu.memory_space<vmem>>
    %8 = tpu.memref_squeeze %7 : memref<1x1x128xf32, #tpu.memory_space<vmem>> -> memref<128xf32, #tpu.memory_space<vmem>>
    %9 = tpu.memref_slice %arg5[%c0_i32_3] : memref<2x!tpu.dma_semaphore, #tpu.memory_space<semaphore_mem>> -> memref<1x!tpu.dma_semaphore, #tpu.memory_space<semaphore_mem>>
    %10 = tpu.memref_squeeze %9 : memref<1x!tpu.dma_semaphore, #tpu.memory_space<semaphore_mem>> -> memref<!tpu.dma_semaphore, #tpu.memory_space<semaphore_mem>>
    tpu.enqueue_dma source(%6 : memref<128xf32, #tpu.memory_space<any>>) target(%8 : memref<128xf32, #tpu.memory_space<vmem>>) target_semaphore(%10 : memref<!tpu.dma_semaphore, #tpu.memory_space<semaphore_mem>>)
    %c0_i32_6 = arith.constant 0 : i32
    %11 = arith.addi %0, %c0_i32_6 : i32
    %c1_i32 = arith.constant 1 : i32
    %12 = arith.addi %11, %c1_i32 : i32
    %13 = arith.index_cast %12 : i32 to index
    %14 = memref.load %arg1[%13] : memref<32xi32, #tpu.memory_space<smem>>
    %c0_i32_7 = arith.constant 0 : i32
    %c1_i32_8 = arith.constant 1 : i32
    %c0_i32_9 = arith.constant 0 : i32
    %c0_i32_10 = arith.constant 0 : i32
    %15 = tpu.memref_slice %arg2[%14, %c0_i32_10] : memref<32x128xf32, #tpu.memory_space<any>> -> memref<1x128xf32, #tpu.memory_space<any>>
    %16 = tpu.memref_squeeze %15 : memref<1x128xf32, #tpu.memory_space<any>> -> memref<128xf32, #tpu.memory_space<any>>
    %c0_i32_11 = arith.constant 0 : i32
    %17 = tpu.memref_slice %arg4[%c0_i32_7, %c1_i32_8, %c0_i32_11] : memref<2x32x128xf32, #tpu.memory_space<vmem>> -> memref<1x1x128xf32, #tpu.memory_space<vmem>>
    %18 = tpu.memref_squeeze %17 : memref<1x1x128xf32, #tpu.memory_space<vmem>> -> memref<128xf32, #tpu.memory_space<vmem>>
    %19 = tpu.memref_slice %arg5[%c0_i32_9] : memref<2x!tpu.dma_semaphore, #tpu.memory_space<semaphore_mem>> -> memref<1x!tpu.dma_semaphore, #tpu.memory_space<semaphore_mem>>
    %20 = tpu.memref_squeeze %19 : memref<1x!tpu.dma_semaphore, #tpu.memory_space<semaphore_mem>> -> memref<!tpu.dma_semaphore, #tpu.memory_space<semaphore_mem>>
    tpu.enqueue_dma source(%16 : memref<128xf32, #tpu.memory_space<any>>) target(%18 : memref<128xf32, #tpu.memory_space<vmem>>) target_semaphore(%20 : memref<!tpu.dma_semaphore, #tpu.memory_space<semaphore_mem>>)
    %c0_i32_12 = arith.constant 0 : i32
    %21 = arith.addi %0, %c0_i32_12 : i32
    %c2_i32 = arith.constant 2 : i32
    %22 = arith.addi %21, %c2_i32 : i32
    %23 = arith.index_cast %22 : i32 to index
    %24 = memref.load %arg1[%23] : memref<32xi32, #tpu.memory_space<smem>>
    %c0_i32_13 = arith.constant 0 : i32
    %c2_i32_14 = arith.constant 2 : i32
    %c0_i32_15 = arith.constant 0 : i32
    %c0_i32_16 = arith.constant 0 : i32
    %25 = tpu.memref_slice %arg2[%24, %c0_i32_16] : memref<32x128xf32, #tpu.memory_space<any>> -> memref<1x128xf32, #tpu.memory_space<any>>
    %26 = tpu.memref_squeeze %25 : memref<1x128xf32, #tpu.memory_space<any>> -> memref<128xf32, #tpu.memory_space<any>>
    %c0_i32_17 = arith.constant 0 : i32
    %27 = tpu.memref_slice %arg4[%c0_i32_13, %c2_i32_14, %c0_i32_17] : memref<2x32x128xf32, #tpu.memory_space<vmem>> -> memref<1x1x128xf32, #tpu.memory_space<vmem>>
    %28 = tpu.memref_squeeze %27 : memref<1x1x128xf32, #tpu.memory_space<vmem>> -> memref<128xf32, #tpu.memory_space<vmem>>
    %29 = tpu.memref_slice %arg5[%c0_i32_15] : memref<2x!tpu.dma_semaphore, #tpu.memory_space<semaphore_mem>> -> memref<1x!tpu.dma_semaphore, #tpu.memory_space<semaphore_mem>>
    %30 = tpu.memref_squeeze %29 : memref<1x!tpu.dma_semaphore, #tpu.memory_space<semaphore_mem>> -> memref<!tpu.dma_semaphore, #tpu.memory_space<semaphore_mem>>
    tpu.enqueue_dma source(%26 : memref<128xf32, #tpu.memory_space<any>>) target(%28 : memref<128xf32, #tpu.memory_space<vmem>>) target_semaphore(%30 : memref<!tpu.dma_semaphore, #tpu.memory_space<semaphore_mem>>)
    %c0_i32_18 = arith.constant 0 : i32
    %31 = arith.addi %0, %c0_i32_18 : i32
    %c3_i32 = arith.constant 3 : i32
    %32 = arith.addi %31, %c3_i32 : i32
    %33 = arith.index_cast %32 : i32 to index
    %34 = memref.load %arg1[%33] : memref<32xi32, #tpu.memory_space<smem>>
    %c0_i32_19 = arith.constant 0 : i32
    %c3_i32_20 = arith.constant 3 : i32
    %c0_i32_21 = arith.constant 0 : i32
    %c0_i32_22 = arith.constant 0 : i32
    %35 = tpu.memref_slice %arg2[%34, %c0_i32_22] : memref<32x128xf32, #tpu.memory_space<any>> -> memref<1x128xf32, #tpu.memory_space<any>>
    %36 = tpu.memref_squeeze %35 : memref<1x128xf32, #tpu.memory_space<any>> -> memref<128xf32, #tpu.memory_space<any>>
    %c0_i32_23 = arith.constant 0 : i32
    %37 = tpu.memref_slice %arg4[%c0_i32_19, %c3_i32_20, %c0_i32_23] : memref<2x32x128xf32, #tpu.memory_space<vmem>> -> memref<1x1x128xf32, #tpu.memory_space<vmem>>
    %38 = tpu.memref_squeeze %37 : memref<1x1x128xf32, #tpu.memory_space<vmem>> -> memref<128xf32, #tpu.memory_space<vmem>>
    %39 = tpu.memref_slice %arg5[%c0_i32_21] : memref<2x!tpu.dma_semaphore, #tpu.memory_space<semaphore_mem>> -> memref<1x!tpu.dma_semaphore, #tpu.memory_space<semaphore_mem>>
    %40 = tpu.memref_squeeze %39 : memref<1x!tpu.dma_semaphore, #tpu.memory_space<semaphore_mem>> -> memref<!tpu.dma_semaphore, #tpu.memory_space<semaphore_mem>>
    tpu.enqueue_dma source(%36 : memref<128xf32, #tpu.memory_space<any>>) target(%38 : memref<128xf32, #tpu.memory_space<vmem>>) target_semaphore(%40 : memref<!tpu.dma_semaphore, #tpu.memory_space<semaphore_mem>>)
    %c0_i32_24 = arith.constant 0 : i32
    %41 = arith.addi %0, %c0_i32_24 : i32
    %c4_i32 = arith.constant 4 : i32
    %42 = arith.addi %41, %c4_i32 : i32
    %43 = arith.index_cast %42 : i32 to index
    %44 = memref.load %arg1[%43] : memref<32xi32, #tpu.memory_space<smem>>
    %c0_i32_25 = arith.constant 0 : i32
    %c4_i32_26 = arith.constant 4 : i32
    %c0_i32_27 = arith.constant 0 : i32
    %c0_i32_28 = arith.constant 0 : i32
    %45 = tpu.memref_slice %arg2[%44, %c0_i32_28] : memref<32x128xf32, #tpu.memory_space<any>> -> memref<1x128xf32, #tpu.memory_space<any>>
    %46 = tpu.memref_squeeze %45 : memref<1x128xf32, #tpu.memory_space<any>> -> memref<128xf32, #tpu.memory_space<any>>
    %c0_i32_29 = arith.constant 0 : i32
    %47 = tpu.memref_slice %arg4[%c0_i32_25, %c4_i32_26, %c0_i32_29] : memref<2x32x128xf32, #tpu.memory_space<vmem>> -> memref<1x1x128xf32, #tpu.memory_space<vmem>>
    %48 = tpu.memref_squeeze %47 : memref<1x1x128xf32, #tpu.memory_space<vmem>> -> memref<128xf32, #tpu.memory_space<vmem>>
    %49 = tpu.memref_slice %arg5[%c0_i32_27] : memref<2x!tpu.dma_semaphore, #tpu.memory_space<semaphore_mem>> -> memref<1x!tpu.dma_semaphore, #tpu.memory_space<semaphore_mem>>
    %50 = tpu.memref_squeeze %49 : memref<1x!tpu.dma_semaphore, #tpu.memory_space<semaphore_mem>> -> memref<!tpu.dma_semaphore, #tpu.memory_space<semaphore_mem>>
    tpu.enqueue_dma source(%46 : memref<128xf32, #tpu.memory_space<any>>) target(%48 : memref<128xf32, #tpu.memory_space<vmem>>) target_semaphore(%50 : memref<!tpu.dma_semaphore, #tpu.memory_space<semaphore_mem>>)
    %c0_i32_30 = arith.constant 0 : i32
    %51 = arith.addi %0, %c0_i32_30 : i32
    %c5_i32 = arith.constant 5 : i32
    %52 = arith.addi %51, %c5_i32 : i32
    %53 = arith.index_cast %52 : i32 to index
    %54 = memref.load %arg1[%53] : memref<32xi32, #tpu.memory_space<smem>>
    %c0_i32_31 = arith.constant 0 : i32
    %c5_i32_32 = arith.constant 5 : i32
    %c0_i32_33 = arith.constant 0 : i32
    %c0_i32_34 = arith.constant 0 : i32
    %55 = tpu.memref_slice %arg2[%54, %c0_i32_34] : memref<32x128xf32, #tpu.memory_space<any>> -> memref<1x128xf32, #tpu.memory_space<any>>
    %56 = tpu.memref_squeeze %55 : memref<1x128xf32, #tpu.memory_space<any>> -> memref<128xf32, #tpu.memory_space<any>>
    %c0_i32_35 = arith.constant 0 : i32
    %57 = tpu.memref_slice %arg4[%c0_i32_31, %c5_i32_32, %c0_i32_35] : memref<2x32x128xf32, #tpu.memory_space<vmem>> -> memref<1x1x128xf32, #tpu.memory_space<vmem>>
    %58 = tpu.memref_squeeze %57 : memref<1x1x128xf32, #tpu.memory_space<vmem>> -> memref<128xf32, #tpu.memory_space<vmem>>
    %59 = tpu.memref_slice %arg5[%c0_i32_33] : memref<2x!tpu.dma_semaphore, #tpu.memory_space<semaphore_mem>> -> memref<1x!tpu.dma_semaphore, #tpu.memory_space<semaphore_mem>>
    %60 = tpu.memref_squeeze %59 : memref<1x!tpu.dma_semaphore, #tpu.memory_space<semaphore_mem>> -> memref<!tpu.dma_semaphore, #tpu.memory_space<semaphore_mem>>
    tpu.enqueue_dma source(%56 : memref<128xf32, #tpu.memory_space<any>>) target(%58 : memref<128xf32, #tpu.memory_space<vmem>>) target_semaphore(%60 : memref<!tpu.dma_semaphore, #tpu.memory_space<semaphore_mem>>)
    %c0_i32_36 = arith.constant 0 : i32
    %61 = arith.addi %0, %c0_i32_36 : i32
    %c6_i32 = arith.constant 6 : i32
    %62 = arith.addi %61, %c6_i32 : i32
    %63 = arith.index_cast %62 : i32 to index
    %64 = memref.load %arg1[%63] : memref<32xi32, #tpu.memory_space<smem>>
    %c0_i32_37 = arith.constant 0 : i32
    %c6_i32_38 = arith.constant 6 : i32
    %c0_i32_39 = arith.constant 0 : i32
    %c0_i32_40 = arith.constant 0 : i32
    %65 = tpu.memref_slice %arg2[%64, %c0_i32_40] : memref<32x128xf32, #tpu.memory_space<any>> -> memref<1x128xf32, #tpu.memory_space<any>>
    %66 = tpu.memref_squeeze %65 : memref<1x128xf32, #tpu.memory_space<any>> -> memref<128xf32, #tpu.memory_space<any>>
    %c0_i32_41 = arith.constant 0 : i32
    %67 = tpu.memref_slice %arg4[%c0_i32_37, %c6_i32_38, %c0_i32_41] : memref<2x32x128xf32, #tpu.memory_space<vmem>> -> memref<1x1x128xf32, #tpu.memory_space<vmem>>
    %68 = tpu.memref_squeeze %67 : memref<1x1x128xf32, #tpu.memory_space<vmem>> -> memref<128xf32, #tpu.memory_space<vmem>>
    %69 = tpu.memref_slice %arg5[%c0_i32_39] : memref<2x!tpu.dma_semaphore, #tpu.memory_space<semaphore_mem>> -> memref<1x!tpu.dma_semaphore, #tpu.memory_space<semaphore_mem>>
    %70 = tpu.memref_squeeze %69 : memref<1x!tpu.dma_semaphore, #tpu.memory_space<semaphore_mem>> -> memref<!tpu.dma_semaphore, #tpu.memory_space<semaphore_mem>>
    tpu.enqueue_dma source(%66 : memref<128xf32, #tpu.memory_space<any>>) target(%68 : memref<128xf32, #tpu.memory_space<vmem>>) target_semaphore(%70 : memref<!tpu.dma_semaphore, #tpu.memory_space<semaphore_mem>>)
    %c0_i32_42 = arith.constant 0 : i32
    %71 = arith.addi %0, %c0_i32_42 : i32
    %c7_i32 = arith.constant 7 : i32
    %72 = arith.addi %71, %c7_i32 : i32
    %73 = arith.index_cast %72 : i32 to index
    %74 = memref.load %arg1[%73] : memref<32xi32, #tpu.memory_space<smem>>
    %c0_i32_43 = arith.constant 0 : i32
    %c7_i32_44 = arith.constant 7 : i32
    %c0_i32_45 = arith.constant 0 : i32
    %c0_i32_46 = arith.constant 0 : i32
    %75 = tpu.memref_slice %arg2[%74, %c0_i32_46] : memref<32x128xf32, #tpu.memory_space<any>> -> memref<1x128xf32, #tpu.memory_space<any>>
    %76 = tpu.memref_squeeze %75 : memref<1x128xf32, #tpu.memory_space<any>> -> memref<128xf32, #tpu.memory_space<any>>
    %c0_i32_47 = arith.constant 0 : i32
    %77 = tpu.memref_slice %arg4[%c0_i32_43, %c7_i32_44, %c0_i32_47] : memref<2x32x128xf32, #tpu.memory_space<vmem>> -> memref<1x1x128xf32, #tpu.memory_space<vmem>>
    %78 = tpu.memref_squeeze %77 : memref<1x1x128xf32, #tpu.memory_space<vmem>> -> memref<128xf32, #tpu.memory_space<vmem>>
    %79 = tpu.memref_slice %arg5[%c0_i32_45] : memref<2x!tpu.dma_semaphore, #tpu.memory_space<semaphore_mem>> -> memref<1x!tpu.dma_semaphore, #tpu.memory_space<semaphore_mem>>
    %80 = tpu.memref_squeeze %79 : memref<1x!tpu.dma_semaphore, #tpu.memory_space<semaphore_mem>> -> memref<!tpu.dma_semaphore, #tpu.memory_space<semaphore_mem>>
    tpu.enqueue_dma source(%76 : memref<128xf32, #tpu.memory_space<any>>) target(%78 : memref<128xf32, #tpu.memory_space<vmem>>) target_semaphore(%80 : memref<!tpu.dma_semaphore, #tpu.memory_space<semaphore_mem>>)
    %c0_i32_48 = arith.constant 0 : i32
    %81 = arith.addi %0, %c0_i32_48 : i32
    %c8_i32 = arith.constant 8 : i32
    %82 = arith.addi %81, %c8_i32 : i32
    %83 = arith.index_cast %82 : i32 to index
    %84 = memref.load %arg1[%83] : memref<32xi32, #tpu.memory_space<smem>>
    %c0_i32_49 = arith.constant 0 : i32
    %c8_i32_50 = arith.constant 8 : i32
    %c0_i32_51 = arith.constant 0 : i32
    %c0_i32_52 = arith.constant 0 : i32
    %85 = tpu.memref_slice %arg2[%84, %c0_i32_52] : memref<32x128xf32, #tpu.memory_space<any>> -> memref<1x128xf32, #tpu.memory_space<any>>
    %86 = tpu.memref_squeeze %85 : memref<1x128xf32, #tpu.memory_space<any>> -> memref<128xf32, #tpu.memory_space<any>>
    %c0_i32_53 = arith.constant 0 : i32
    %87 = tpu.memref_slice %arg4[%c0_i32_49, %c8_i32_50, %c0_i32_53] : memref<2x32x128xf32, #tpu.memory_space<vmem>> -> memref<1x1x128xf32, #tpu.memory_space<vmem>>
    %88 = tpu.memref_squeeze %87 : memref<1x1x128xf32, #tpu.memory_space<vmem>> -> memref<128xf32, #tpu.memory_space<vmem>>
    %89 = tpu.memref_slice %arg5[%c0_i32_51] : memref<2x!tpu.dma_semaphore, #tpu.memory_space<semaphore_mem>> -> memref<1x!tpu.dma_semaphore, #tpu.memory_space<semaphore_mem>>
    %90 = tpu.memref_squeeze %89 : memref<1x!tpu.dma_semaphore, #tpu.memory_space<semaphore_mem>> -> memref<!tpu.dma_semaphore, #tpu.memory_space<semaphore_mem>>
    tpu.enqueue_dma source(%86 : memref<128xf32, #tpu.memory_space<any>>) target(%88 : memref<128xf32, #tpu.memory_space<vmem>>) target_semaphore(%90 : memref<!tpu.dma_semaphore, #tpu.memory_space<semaphore_mem>>)
    %c0_i32_54 = arith.constant 0 : i32
    %91 = arith.addi %0, %c0_i32_54 : i32
    %c9_i32 = arith.constant 9 : i32
    %92 = arith.addi %91, %c9_i32 : i32
    %93 = arith.index_cast %92 : i32 to index
    %94 = memref.load %arg1[%93] : memref<32xi32, #tpu.memory_space<smem>>
    %c0_i32_55 = arith.constant 0 : i32
    %c9_i32_56 = arith.constant 9 : i32
    %c0_i32_57 = arith.constant 0 : i32
    %c0_i32_58 = arith.constant 0 : i32
    %95 = tpu.memref_slice %arg2[%94, %c0_i32_58] : memref<32x128xf32, #tpu.memory_space<any>> -> memref<1x128xf32, #tpu.memory_space<any>>
    %96 = tpu.memref_squeeze %95 : memref<1x128xf32, #tpu.memory_space<any>> -> memref<128xf32, #tpu.memory_space<any>>
    %c0_i32_59 = arith.constant 0 : i32
    %97 = tpu.memref_slice %arg4[%c0_i32_55, %c9_i32_56, %c0_i32_59] : memref<2x32x128xf32, #tpu.memory_space<vmem>> -> memref<1x1x128xf32, #tpu.memory_space<vmem>>
    %98 = tpu.memref_squeeze %97 : memref<1x1x128xf32, #tpu.memory_space<vmem>> -> memref<128xf32, #tpu.memory_space<vmem>>
    %99 = tpu.memref_slice %arg5[%c0_i32_57] : memref<2x!tpu.dma_semaphore, #tpu.memory_space<semaphore_mem>> -> memref<1x!tpu.dma_semaphore, #tpu.memory_space<semaphore_mem>>
    %100 = tpu.memref_squeeze %99 : memref<1x!tpu.dma_semaphore, #tpu.memory_space<semaphore_mem>> -> memref<!tpu.dma_semaphore, #tpu.memory_space<semaphore_mem>>
    tpu.enqueue_dma source(%96 : memref<128xf32, #tpu.memory_space<any>>) target(%98 : memref<128xf32, #tpu.memory_space<vmem>>) target_semaphore(%100 : memref<!tpu.dma_semaphore, #tpu.memory_space<semaphore_mem>>)
    %c0_i32_60 = arith.constant 0 : i32
    %101 = arith.addi %0, %c0_i32_60 : i32
    %c10_i32 = arith.constant 10 : i32
    %102 = arith.addi %101, %c10_i32 : i32
    %103 = arith.index_cast %102 : i32 to index
    %104 = memref.load %arg1[%103] : memref<32xi32, #tpu.memory_space<smem>>
    %c0_i32_61 = arith.constant 0 : i32
    %c10_i32_62 = arith.constant 10 : i32
    %c0_i32_63 = arith.constant 0 : i32
    %c0_i32_64 = arith.constant 0 : i32
    %105 = tpu.memref_slice %arg2[%104, %c0_i32_64] : memref<32x128xf32, #tpu.memory_space<any>> -> memref<1x128xf32, #tpu.memory_space<any>>
    %106 = tpu.memref_squeeze %105 : memref<1x128xf32, #tpu.memory_space<any>> -> memref<128xf32, #tpu.memory_space<any>>
    %c0_i32_65 = arith.constant 0 : i32
    %107 = tpu.memref_slice %arg4[%c0_i32_61, %c10_i32_62, %c0_i32_65] : memref<2x32x128xf32, #tpu.memory_space<vmem>> -> memref<1x1x128xf32, #tpu.memory_space<vmem>>
    %108 = tpu.memref_squeeze %107 : memref<1x1x128xf32, #tpu.memory_space<vmem>> -> memref<128xf32, #tpu.memory_space<vmem>>
    %109 = tpu.memref_slice %arg5[%c0_i32_63] : memref<2x!tpu.dma_semaphore, #tpu.memory_space<semaphore_mem>> -> memref<1x!tpu.dma_semaphore, #tpu.memory_space<semaphore_mem>>
    %110 = tpu.memref_squeeze %109 : memref<1x!tpu.dma_semaphore, #tpu.memory_space<semaphore_mem>> -> memref<!tpu.dma_semaphore, #tpu.memory_space<semaphore_mem>>
    tpu.enqueue_dma source(%106 : memref<128xf32, #tpu.memory_space<any>>) target(%108 : memref<128xf32, #tpu.memory_space<vmem>>) target_semaphore(%110 : memref<!tpu.dma_semaphore, #tpu.memory_space<semaphore_mem>>)
    %c0_i32_66 = arith.constant 0 : i32
    %111 = arith.addi %0, %c0_i32_66 : i32
    %c11_i32 = arith.constant 11 : i32
    %112 = arith.addi %111, %c11_i32 : i32
    %113 = arith.index_cast %112 : i32 to index
    %114 = memref.load %arg1[%113] : memref<32xi32, #tpu.memory_space<smem>>
    %c0_i32_67 = arith.constant 0 : i32
    %c11_i32_68 = arith.constant 11 : i32
    %c0_i32_69 = arith.constant 0 : i32
    %c0_i32_70 = arith.constant 0 : i32
    %115 = tpu.memref_slice %arg2[%114, %c0_i32_70] : memref<32x128xf32, #tpu.memory_space<any>> -> memref<1x128xf32, #tpu.memory_space<any>>
    %116 = tpu.memref_squeeze %115 : memref<1x128xf32, #tpu.memory_space<any>> -> memref<128xf32, #tpu.memory_space<any>>
    %c0_i32_71 = arith.constant 0 : i32
    %117 = tpu.memref_slice %arg4[%c0_i32_67, %c11_i32_68, %c0_i32_71] : memref<2x32x128xf32, #tpu.memory_space<vmem>> -> memref<1x1x128xf32, #tpu.memory_space<vmem>>
    %118 = tpu.memref_squeeze %117 : memref<1x1x128xf32, #tpu.memory_space<vmem>> -> memref<128xf32, #tpu.memory_space<vmem>>
    %119 = tpu.memref_slice %arg5[%c0_i32_69] : memref<2x!tpu.dma_semaphore, #tpu.memory_space<semaphore_mem>> -> memref<1x!tpu.dma_semaphore, #tpu.memory_space<semaphore_mem>>
    %120 = tpu.memref_squeeze %119 : memref<1x!tpu.dma_semaphore, #tpu.memory_space<semaphore_mem>> -> memref<!tpu.dma_semaphore, #tpu.memory_space<semaphore_mem>>
    tpu.enqueue_dma source(%116 : memref<128xf32, #tpu.memory_space<any>>) target(%118 : memref<128xf32, #tpu.memory_space<vmem>>) target_semaphore(%120 : memref<!tpu.dma_semaphore, #tpu.memory_space<semaphore_mem>>)
    %c0_i32_72 = arith.constant 0 : i32
    %121 = arith.addi %0, %c0_i32_72 : i32
    %c12_i32 = arith.constant 12 : i32
    %122 = arith.addi %121, %c12_i32 : i32
    %123 = arith.index_cast %122 : i32 to index
    %124 = memref.load %arg1[%123] : memref<32xi32, #tpu.memory_space<smem>>
    %c0_i32_73 = arith.constant 0 : i32
    %c12_i32_74 = arith.constant 12 : i32
    %c0_i32_75 = arith.constant 0 : i32
    %c0_i32_76 = arith.constant 0 : i32
    %125 = tpu.memref_slice %arg2[%124, %c0_i32_76] : memref<32x128xf32, #tpu.memory_space<any>> -> memref<1x128xf32, #tpu.memory_space<any>>
    %126 = tpu.memref_squeeze %125 : memref<1x128xf32, #tpu.memory_space<any>> -> memref<128xf32, #tpu.memory_space<any>>
    %c0_i32_77 = arith.constant 0 : i32
    %127 = tpu.memref_slice %arg4[%c0_i32_73, %c12_i32_74, %c0_i32_77] : memref<2x32x128xf32, #tpu.memory_space<vmem>> -> memref<1x1x128xf32, #tpu.memory_space<vmem>>
    %128 = tpu.memref_squeeze %127 : memref<1x1x128xf32, #tpu.memory_space<vmem>> -> memref<128xf32, #tpu.memory_space<vmem>>
    %129 = tpu.memref_slice %arg5[%c0_i32_75] : memref<2x!tpu.dma_semaphore, #tpu.memory_space<semaphore_mem>> -> memref<1x!tpu.dma_semaphore, #tpu.memory_space<semaphore_mem>>
    %130 = tpu.memref_squeeze %129 : memref<1x!tpu.dma_semaphore, #tpu.memory_space<semaphore_mem>> -> memref<!tpu.dma_semaphore, #tpu.memory_space<semaphore_mem>>
    tpu.enqueue_dma source(%126 : memref<128xf32, #tpu.memory_space<any>>) target(%128 : memref<128xf32, #tpu.memory_space<vmem>>) target_semaphore(%130 : memref<!tpu.dma_semaphore, #tpu.memory_space<semaphore_mem>>)
    %c0_i32_78 = arith.constant 0 : i32
    %131 = arith.addi %0, %c0_i32_78 : i32
    %c13_i32 = arith.constant 13 : i32
    %132 = arith.addi %131, %c13_i32 : i32
    %133 = arith.index_cast %132 : i32 to index
    %134 = memref.load %arg1[%133] : memref<32xi32, #tpu.memory_space<smem>>
    %c0_i32_79 = arith.constant 0 : i32
    %c13_i32_80 = arith.constant 13 : i32
    %c0_i32_81 = arith.constant 0 : i32
    %c0_i32_82 = arith.constant 0 : i32
    %135 = tpu.memref_slice %arg2[%134, %c0_i32_82] : memref<32x128xf32, #tpu.memory_space<any>> -> memref<1x128xf32, #tpu.memory_space<any>>
    %136 = tpu.memref_squeeze %135 : memref<1x128xf32, #tpu.memory_space<any>> -> memref<128xf32, #tpu.memory_space<any>>
    %c0_i32_83 = arith.constant 0 : i32
    %137 = tpu.memref_slice %arg4[%c0_i32_79, %c13_i32_80, %c0_i32_83] : memref<2x32x128xf32, #tpu.memory_space<vmem>> -> memref<1x1x128xf32, #tpu.memory_space<vmem>>
    %138 = tpu.memref_squeeze %137 : memref<1x1x128xf32, #tpu.memory_space<vmem>> -> memref<128xf32, #tpu.memory_space<vmem>>
    %139 = tpu.memref_slice %arg5[%c0_i32_81] : memref<2x!tpu.dma_semaphore, #tpu.memory_space<semaphore_mem>> -> memref<1x!tpu.dma_semaphore, #tpu.memory_space<semaphore_mem>>
    %140 = tpu.memref_squeeze %139 : memref<1x!tpu.dma_semaphore, #tpu.memory_space<semaphore_mem>> -> memref<!tpu.dma_semaphore, #tpu.memory_space<semaphore_mem>>
    tpu.enqueue_dma source(%136 : memref<128xf32, #tpu.memory_space<any>>) target(%138 : memref<128xf32, #tpu.memory_space<vmem>>) target_semaphore(%140 : memref<!tpu.dma_semaphore, #tpu.memory_space<semaphore_mem>>)
    %c0_i32_84 = arith.constant 0 : i32
    %141 = arith.addi %0, %c0_i32_84 : i32
    %c14_i32 = arith.constant 14 : i32
    %142 = arith.addi %141, %c14_i32 : i32
    %143 = arith.index_cast %142 : i32 to index
    %144 = memref.load %arg1[%143] : memref<32xi32, #tpu.memory_space<smem>>
    %c0_i32_85 = arith.constant 0 : i32
    %c14_i32_86 = arith.constant 14 : i32
    %c0_i32_87 = arith.constant 0 : i32
    %c0_i32_88 = arith.constant 0 : i32
    %145 = tpu.memref_slice %arg2[%144, %c0_i32_88] : memref<32x128xf32, #tpu.memory_space<any>> -> memref<1x128xf32, #tpu.memory_space<any>>
    %146 = tpu.memref_squeeze %145 : memref<1x128xf32, #tpu.memory_space<any>> -> memref<128xf32, #tpu.memory_space<any>>
    %c0_i32_89 = arith.constant 0 : i32
    %147 = tpu.memref_slice %arg4[%c0_i32_85, %c14_i32_86, %c0_i32_89] : memref<2x32x128xf32, #tpu.memory_space<vmem>> -> memref<1x1x128xf32, #tpu.memory_space<vmem>>
    %148 = tpu.memref_squeeze %147 : memref<1x1x128xf32, #tpu.memory_space<vmem>> -> memref<128xf32, #tpu.memory_space<vmem>>
    %149 = tpu.memref_slice %arg5[%c0_i32_87] : memref<2x!tpu.dma_semaphore, #tpu.memory_space<semaphore_mem>> -> memref<1x!tpu.dma_semaphore, #tpu.memory_space<semaphore_mem>>
    %150 = tpu.memref_squeeze %149 : memref<1x!tpu.dma_semaphore, #tpu.memory_space<semaphore_mem>> -> memref<!tpu.dma_semaphore, #tpu.memory_space<semaphore_mem>>
    tpu.enqueue_dma source(%146 : memref<128xf32, #tpu.memory_space<any>>) target(%148 : memref<128xf32, #tpu.memory_space<vmem>>) target_semaphore(%150 : memref<!tpu.dma_semaphore, #tpu.memory_space<semaphore_mem>>)
    %c0_i32_90 = arith.constant 0 : i32
    %151 = arith.addi %0, %c0_i32_90 : i32
    %c15_i32 = arith.constant 15 : i32
    %152 = arith.addi %151, %c15_i32 : i32
    %153 = arith.index_cast %152 : i32 to index
    %154 = memref.load %arg1[%153] : memref<32xi32, #tpu.memory_space<smem>>
    %c0_i32_91 = arith.constant 0 : i32
    %c15_i32_92 = arith.constant 15 : i32
    %c0_i32_93 = arith.constant 0 : i32
    %c0_i32_94 = arith.constant 0 : i32
    %155 = tpu.memref_slice %arg2[%154, %c0_i32_94] : memref<32x128xf32, #tpu.memory_space<any>> -> memref<1x128xf32, #tpu.memory_space<any>>
    %156 = tpu.memref_squeeze %155 : memref<1x128xf32, #tpu.memory_space<any>> -> memref<128xf32, #tpu.memory_space<any>>
    %c0_i32_95 = arith.constant 0 : i32
    %157 = tpu.memref_slice %arg4[%c0_i32_91, %c15_i32_92, %c0_i32_95] : memref<2x32x128xf32, #tpu.memory_space<vmem>> -> memref<1x1x128xf32, #tpu.memory_space<vmem>>
    %158 = tpu.memref_squeeze %157 : memref<1x1x128xf32, #tpu.memory_space<vmem>> -> memref<128xf32, #tpu.memory_space<vmem>>
    %159 = tpu.memref_slice %arg5[%c0_i32_93] : memref<2x!tpu.dma_semaphore, #tpu.memory_space<semaphore_mem>> -> memref<1x!tpu.dma_semaphore, #tpu.memory_space<semaphore_mem>>
    %160 = tpu.memref_squeeze %159 : memref<1x!tpu.dma_semaphore, #tpu.memory_space<semaphore_mem>> -> memref<!tpu.dma_semaphore, #tpu.memory_space<semaphore_mem>>
    tpu.enqueue_dma source(%156 : memref<128xf32, #tpu.memory_space<any>>) target(%158 : memref<128xf32, #tpu.memory_space<vmem>>) target_semaphore(%160 : memref<!tpu.dma_semaphore, #tpu.memory_space<semaphore_mem>>)
    %c0_i32_96 = arith.constant 0 : i32
    %161 = arith.addi %0, %c0_i32_96 : i32
    %c16_i32 = arith.constant 16 : i32
    %162 = arith.addi %161, %c16_i32 : i32
    %163 = arith.index_cast %162 : i32 to index
    %164 = memref.load %arg1[%163] : memref<32xi32, #tpu.memory_space<smem>>
    %c0_i32_97 = arith.constant 0 : i32
    %c16_i32_98 = arith.constant 16 : i32
    %c0_i32_99 = arith.constant 0 : i32
    %c0_i32_100 = arith.constant 0 : i32
    %165 = tpu.memref_slice %arg2[%164, %c0_i32_100] : memref<32x128xf32, #tpu.memory_space<any>> -> memref<1x128xf32, #tpu.memory_space<any>>
    %166 = tpu.memref_squeeze %165 : memref<1x128xf32, #tpu.memory_space<any>> -> memref<128xf32, #tpu.memory_space<any>>
    %c0_i32_101 = arith.constant 0 : i32
    %167 = tpu.memref_slice %arg4[%c0_i32_97, %c16_i32_98, %c0_i32_101] : memref<2x32x128xf32, #tpu.memory_space<vmem>> -> memref<1x1x128xf32, #tpu.memory_space<vmem>>
    %168 = tpu.memref_squeeze %167 : memref<1x1x128xf32, #tpu.memory_space<vmem>> -> memref<128xf32, #tpu.memory_space<vmem>>
    %169 = tpu.memref_slice %arg5[%c0_i32_99] : memref<2x!tpu.dma_semaphore, #tpu.memory_space<semaphore_mem>> -> memref<1x!tpu.dma_semaphore, #tpu.memory_space<semaphore_mem>>
    %170 = tpu.memref_squeeze %169 : memref<1x!tpu.dma_semaphore, #tpu.memory_space<semaphore_mem>> -> memref<!tpu.dma_semaphore, #tpu.memory_space<semaphore_mem>>
    tpu.enqueue_dma source(%166 : memref<128xf32, #tpu.memory_space<any>>) target(%168 : memref<128xf32, #tpu.memory_space<vmem>>) target_semaphore(%170 : memref<!tpu.dma_semaphore, #tpu.memory_space<semaphore_mem>>)
    %c0_i32_102 = arith.constant 0 : i32
    %171 = arith.addi %0, %c0_i32_102 : i32
    %c17_i32 = arith.constant 17 : i32
    %172 = arith.addi %171, %c17_i32 : i32
    %173 = arith.index_cast %172 : i32 to index
    %174 = memref.load %arg1[%173] : memref<32xi32, #tpu.memory_space<smem>>
    %c0_i32_103 = arith.constant 0 : i32
    %c17_i32_104 = arith.constant 17 : i32
    %c0_i32_105 = arith.constant 0 : i32
    %c0_i32_106 = arith.constant 0 : i32
    %175 = tpu.memref_slice %arg2[%174, %c0_i32_106] : memref<32x128xf32, #tpu.memory_space<any>> -> memref<1x128xf32, #tpu.memory_space<any>>
    %176 = tpu.memref_squeeze %175 : memref<1x128xf32, #tpu.memory_space<any>> -> memref<128xf32, #tpu.memory_space<any>>
    %c0_i32_107 = arith.constant 0 : i32
    %177 = tpu.memref_slice %arg4[%c0_i32_103, %c17_i32_104, %c0_i32_107] : memref<2x32x128xf32, #tpu.memory_space<vmem>> -> memref<1x1x128xf32, #tpu.memory_space<vmem>>
    %178 = tpu.memref_squeeze %177 : memref<1x1x128xf32, #tpu.memory_space<vmem>> -> memref<128xf32, #tpu.memory_space<vmem>>
    %179 = tpu.memref_slice %arg5[%c0_i32_105] : memref<2x!tpu.dma_semaphore, #tpu.memory_space<semaphore_mem>> -> memref<1x!tpu.dma_semaphore, #tpu.memory_space<semaphore_mem>>
    %180 = tpu.memref_squeeze %179 : memref<1x!tpu.dma_semaphore, #tpu.memory_space<semaphore_mem>> -> memref<!tpu.dma_semaphore, #tpu.memory_space<semaphore_mem>>
    tpu.enqueue_dma source(%176 : memref<128xf32, #tpu.memory_space<any>>) target(%178 : memref<128xf32, #tpu.memory_space<vmem>>) target_semaphore(%180 : memref<!tpu.dma_semaphore, #tpu.memory_space<semaphore_mem>>)
    %c0_i32_108 = arith.constant 0 : i32
    %181 = arith.addi %0, %c0_i32_108 : i32
    %c18_i32 = arith.constant 18 : i32
    %182 = arith.addi %181, %c18_i32 : i32
    %183 = arith.index_cast %182 : i32 to index
    %184 = memref.load %arg1[%183] : memref<32xi32, #tpu.memory_space<smem>>
    %c0_i32_109 = arith.constant 0 : i32
    %c18_i32_110 = arith.constant 18 : i32
    %c0_i32_111 = arith.constant 0 : i32
    %c0_i32_112 = arith.constant 0 : i32
    %185 = tpu.memref_slice %arg2[%184, %c0_i32_112] : memref<32x128xf32, #tpu.memory_space<any>> -> memref<1x128xf32, #tpu.memory_space<any>>
    %186 = tpu.memref_squeeze %185 : memref<1x128xf32, #tpu.memory_space<any>> -> memref<128xf32, #tpu.memory_space<any>>
    %c0_i32_113 = arith.constant 0 : i32
    %187 = tpu.memref_slice %arg4[%c0_i32_109, %c18_i32_110, %c0_i32_113] : memref<2x32x128xf32, #tpu.memory_space<vmem>> -> memref<1x1x128xf32, #tpu.memory_space<vmem>>
    %188 = tpu.memref_squeeze %187 : memref<1x1x128xf32, #tpu.memory_space<vmem>> -> memref<128xf32, #tpu.memory_space<vmem>>
    %189 = tpu.memref_slice %arg5[%c0_i32_111] : memref<2x!tpu.dma_semaphore, #tpu.memory_space<semaphore_mem>> -> memref<1x!tpu.dma_semaphore, #tpu.memory_space<semaphore_mem>>
    %190 = tpu.memref_squeeze %189 : memref<1x!tpu.dma_semaphore, #tpu.memory_space<semaphore_mem>> -> memref<!tpu.dma_semaphore, #tpu.memory_space<semaphore_mem>>
    tpu.enqueue_dma source(%186 : memref<128xf32, #tpu.memory_space<any>>) target(%188 : memref<128xf32, #tpu.memory_space<vmem>>) target_semaphore(%190 : memref<!tpu.dma_semaphore, #tpu.memory_space<semaphore_mem>>)
    %c0_i32_114 = arith.constant 0 : i32
    %191 = arith.addi %0, %c0_i32_114 : i32
    %c19_i32 = arith.constant 19 : i32
    %192 = arith.addi %191, %c19_i32 : i32
    %193 = arith.index_cast %192 : i32 to index
    %194 = memref.load %arg1[%193] : memref<32xi32, #tpu.memory_space<smem>>
    %c0_i32_115 = arith.constant 0 : i32
    %c19_i32_116 = arith.constant 19 : i32
    %c0_i32_117 = arith.constant 0 : i32
    %c0_i32_118 = arith.constant 0 : i32
    %195 = tpu.memref_slice %arg2[%194, %c0_i32_118] : memref<32x128xf32, #tpu.memory_space<any>> -> memref<1x128xf32, #tpu.memory_space<any>>
    %196 = tpu.memref_squeeze %195 : memref<1x128xf32, #tpu.memory_space<any>> -> memref<128xf32, #tpu.memory_space<any>>
    %c0_i32_119 = arith.constant 0 : i32
    %197 = tpu.memref_slice %arg4[%c0_i32_115, %c19_i32_116, %c0_i32_119] : memref<2x32x128xf32, #tpu.memory_space<vmem>> -> memref<1x1x128xf32, #tpu.memory_space<vmem>>
    %198 = tpu.memref_squeeze %197 : memref<1x1x128xf32, #tpu.memory_space<vmem>> -> memref<128xf32, #tpu.memory_space<vmem>>
    %199 = tpu.memref_slice %arg5[%c0_i32_117] : memref<2x!tpu.dma_semaphore, #tpu.memory_space<semaphore_mem>> -> memref<1x!tpu.dma_semaphore, #tpu.memory_space<semaphore_mem>>
    %200 = tpu.memref_squeeze %199 : memref<1x!tpu.dma_semaphore, #tpu.memory_space<semaphore_mem>> -> memref<!tpu.dma_semaphore, #tpu.memory_space<semaphore_mem>>
    tpu.enqueue_dma source(%196 : memref<128xf32, #tpu.memory_space<any>>) target(%198 : memref<128xf32, #tpu.memory_space<vmem>>) target_semaphore(%200 : memref<!tpu.dma_semaphore, #tpu.memory_space<semaphore_mem>>)
    %c0_i32_120 = arith.constant 0 : i32
    %201 = arith.addi %0, %c0_i32_120 : i32
    %c20_i32 = arith.constant 20 : i32
    %202 = arith.addi %201, %c20_i32 : i32
    %203 = arith.index_cast %202 : i32 to index
    %204 = memref.load %arg1[%203] : memref<32xi32, #tpu.memory_space<smem>>
    %c0_i32_121 = arith.constant 0 : i32
    %c20_i32_122 = arith.constant 20 : i32
    %c0_i32_123 = arith.constant 0 : i32
    %c0_i32_124 = arith.constant 0 : i32
    %205 = tpu.memref_slice %arg2[%204, %c0_i32_124] : memref<32x128xf32, #tpu.memory_space<any>> -> memref<1x128xf32, #tpu.memory_space<any>>
    %206 = tpu.memref_squeeze %205 : memref<1x128xf32, #tpu.memory_space<any>> -> memref<128xf32, #tpu.memory_space<any>>
    %c0_i32_125 = arith.constant 0 : i32
    %207 = tpu.memref_slice %arg4[%c0_i32_121, %c20_i32_122, %c0_i32_125] : memref<2x32x128xf32, #tpu.memory_space<vmem>> -> memref<1x1x128xf32, #tpu.memory_space<vmem>>
    %208 = tpu.memref_squeeze %207 : memref<1x1x128xf32, #tpu.memory_space<vmem>> -> memref<128xf32, #tpu.memory_space<vmem>>
    %209 = tpu.memref_slice %arg5[%c0_i32_123] : memref<2x!tpu.dma_semaphore, #tpu.memory_space<semaphore_mem>> -> memref<1x!tpu.dma_semaphore, #tpu.memory_space<semaphore_mem>>
    %210 = tpu.memref_squeeze %209 : memref<1x!tpu.dma_semaphore, #tpu.memory_space<semaphore_mem>> -> memref<!tpu.dma_semaphore, #tpu.memory_space<semaphore_mem>>
    tpu.enqueue_dma source(%206 : memref<128xf32, #tpu.memory_space<any>>) target(%208 : memref<128xf32, #tpu.memory_space<vmem>>) target_semaphore(%210 : memref<!tpu.dma_semaphore, #tpu.memory_space<semaphore_mem>>)
    %c0_i32_126 = arith.constant 0 : i32
    %211 = arith.addi %0, %c0_i32_126 : i32
    %c21_i32 = arith.constant 21 : i32
    %212 = arith.addi %211, %c21_i32 : i32
    %213 = arith.index_cast %212 : i32 to index
    %214 = memref.load %arg1[%213] : memref<32xi32, #tpu.memory_space<smem>>
    %c0_i32_127 = arith.constant 0 : i32
    %c21_i32_128 = arith.constant 21 : i32
    %c0_i32_129 = arith.constant 0 : i32
    %c0_i32_130 = arith.constant 0 : i32
    %215 = tpu.memref_slice %arg2[%214, %c0_i32_130] : memref<32x128xf32, #tpu.memory_space<any>> -> memref<1x128xf32, #tpu.memory_space<any>>
    %216 = tpu.memref_squeeze %215 : memref<1x128xf32, #tpu.memory_space<any>> -> memref<128xf32, #tpu.memory_space<any>>
    %c0_i32_131 = arith.constant 0 : i32
    %217 = tpu.memref_slice %arg4[%c0_i32_127, %c21_i32_128, %c0_i32_131] : memref<2x32x128xf32, #tpu.memory_space<vmem>> -> memref<1x1x128xf32, #tpu.memory_space<vmem>>
    %218 = tpu.memref_squeeze %217 : memref<1x1x128xf32, #tpu.memory_space<vmem>> -> memref<128xf32, #tpu.memory_space<vmem>>
    %219 = tpu.memref_slice %arg5[%c0_i32_129] : memref<2x!tpu.dma_semaphore, #tpu.memory_space<semaphore_mem>> -> memref<1x!tpu.dma_semaphore, #tpu.memory_space<semaphore_mem>>
    %220 = tpu.memref_squeeze %219 : memref<1x!tpu.dma_semaphore, #tpu.memory_space<semaphore_mem>> -> memref<!tpu.dma_semaphore, #tpu.memory_space<semaphore_mem>>
    tpu.enqueue_dma source(%216 : memref<128xf32, #tpu.memory_space<any>>) target(%218 : memref<128xf32, #tpu.memory_space<vmem>>) target_semaphore(%220 : memref<!tpu.dma_semaphore, #tpu.memory_space<semaphore_mem>>)
    %c0_i32_132 = arith.constant 0 : i32
    %221 = arith.addi %0, %c0_i32_132 : i32
    %c22_i32 = arith.constant 22 : i32
    %222 = arith.addi %221, %c22_i32 : i32
    %223 = arith.index_cast %222 : i32 to index
    %224 = memref.load %arg1[%223] : memref<32xi32, #tpu.memory_space<smem>>
    %c0_i32_133 = arith.constant 0 : i32
    %c22_i32_134 = arith.constant 22 : i32
    %c0_i32_135 = arith.constant 0 : i32
    %c0_i32_136 = arith.constant 0 : i32
    %225 = tpu.memref_slice %arg2[%224, %c0_i32_136] : memref<32x128xf32, #tpu.memory_space<any>> -> memref<1x128xf32, #tpu.memory_space<any>>
    %226 = tpu.memref_squeeze %225 : memref<1x128xf32, #tpu.memory_space<any>> -> memref<128xf32, #tpu.memory_space<any>>
    %c0_i32_137 = arith.constant 0 : i32
    %227 = tpu.memref_slice %arg4[%c0_i32_133, %c22_i32_134, %c0_i32_137] : memref<2x32x128xf32, #tpu.memory_space<vmem>> -> memref<1x1x128xf32, #tpu.memory_space<vmem>>
    %228 = tpu.memref_squeeze %227 : memref<1x1x128xf32, #tpu.memory_space<vmem>> -> memref<128xf32, #tpu.memory_space<vmem>>
    %229 = tpu.memref_slice %arg5[%c0_i32_135] : memref<2x!tpu.dma_semaphore, #tpu.memory_space<semaphore_mem>> -> memref<1x!tpu.dma_semaphore, #tpu.memory_space<semaphore_mem>>
    %230 = tpu.memref_squeeze %229 : memref<1x!tpu.dma_semaphore, #tpu.memory_space<semaphore_mem>> -> memref<!tpu.dma_semaphore, #tpu.memory_space<semaphore_mem>>
    tpu.enqueue_dma source(%226 : memref<128xf32, #tpu.memory_space<any>>) target(%228 : memref<128xf32, #tpu.memory_space<vmem>>) target_semaphore(%230 : memref<!tpu.dma_semaphore, #tpu.memory_space<semaphore_mem>>)
    %c0_i32_138 = arith.constant 0 : i32
    %231 = arith.addi %0, %c0_i32_138 : i32
    %c23_i32 = arith.constant 23 : i32
    %232 = arith.addi %231, %c23_i32 : i32
    %233 = arith.index_cast %232 : i32 to index
    %234 = memref.load %arg1[%233] : memref<32xi32, #tpu.memory_space<smem>>
    %c0_i32_139 = arith.constant 0 : i32
    %c23_i32_140 = arith.constant 23 : i32
    %c0_i32_141 = arith.constant 0 : i32
    %c0_i32_142 = arith.constant 0 : i32
    %235 = tpu.memref_slice %arg2[%234, %c0_i32_142] : memref<32x128xf32, #tpu.memory_space<any>> -> memref<1x128xf32, #tpu.memory_space<any>>
    %236 = tpu.memref_squeeze %235 : memref<1x128xf32, #tpu.memory_space<any>> -> memref<128xf32, #tpu.memory_space<any>>
    %c0_i32_143 = arith.constant 0 : i32
    %237 = tpu.memref_slice %arg4[%c0_i32_139, %c23_i32_140, %c0_i32_143] : memref<2x32x128xf32, #tpu.memory_space<vmem>> -> memref<1x1x128xf32, #tpu.memory_space<vmem>>
    %238 = tpu.memref_squeeze %237 : memref<1x1x128xf32, #tpu.memory_space<vmem>> -> memref<128xf32, #tpu.memory_space<vmem>>
    %239 = tpu.memref_slice %arg5[%c0_i32_141] : memref<2x!tpu.dma_semaphore, #tpu.memory_space<semaphore_mem>> -> memref<1x!tpu.dma_semaphore, #tpu.memory_space<semaphore_mem>>
    %240 = tpu.memref_squeeze %239 : memref<1x!tpu.dma_semaphore, #tpu.memory_space<semaphore_mem>> -> memref<!tpu.dma_semaphore, #tpu.memory_space<semaphore_mem>>
    tpu.enqueue_dma source(%236 : memref<128xf32, #tpu.memory_space<any>>) target(%238 : memref<128xf32, #tpu.memory_space<vmem>>) target_semaphore(%240 : memref<!tpu.dma_semaphore, #tpu.memory_space<semaphore_mem>>)
    %c0_i32_144 = arith.constant 0 : i32
    %241 = arith.addi %0, %c0_i32_144 : i32
    %c24_i32 = arith.constant 24 : i32
    %242 = arith.addi %241, %c24_i32 : i32
    %243 = arith.index_cast %242 : i32 to index
    %244 = memref.load %arg1[%243] : memref<32xi32, #tpu.memory_space<smem>>
    %c0_i32_145 = arith.constant 0 : i32
    %c24_i32_146 = arith.constant 24 : i32
    %c0_i32_147 = arith.constant 0 : i32
    %c0_i32_148 = arith.constant 0 : i32
    %245 = tpu.memref_slice %arg2[%244, %c0_i32_148] : memref<32x128xf32, #tpu.memory_space<any>> -> memref<1x128xf32, #tpu.memory_space<any>>
    %246 = tpu.memref_squeeze %245 : memref<1x128xf32, #tpu.memory_space<any>> -> memref<128xf32, #tpu.memory_space<any>>
    %c0_i32_149 = arith.constant 0 : i32
    %247 = tpu.memref_slice %arg4[%c0_i32_145, %c24_i32_146, %c0_i32_149] : memref<2x32x128xf32, #tpu.memory_space<vmem>> -> memref<1x1x128xf32, #tpu.memory_space<vmem>>
    %248 = tpu.memref_squeeze %247 : memref<1x1x128xf32, #tpu.memory_space<vmem>> -> memref<128xf32, #tpu.memory_space<vmem>>
    %249 = tpu.memref_slice %arg5[%c0_i32_147] : memref<2x!tpu.dma_semaphore, #tpu.memory_space<semaphore_mem>> -> memref<1x!tpu.dma_semaphore, #tpu.memory_space<semaphore_mem>>
    %250 = tpu.memref_squeeze %249 : memref<1x!tpu.dma_semaphore, #tpu.memory_space<semaphore_mem>> -> memref<!tpu.dma_semaphore, #tpu.memory_space<semaphore_mem>>
    tpu.enqueue_dma source(%246 : memref<128xf32, #tpu.memory_space<any>>) target(%248 : memref<128xf32, #tpu.memory_space<vmem>>) target_semaphore(%250 : memref<!tpu.dma_semaphore, #tpu.memory_space<semaphore_mem>>)
    %c0_i32_150 = arith.constant 0 : i32
    %251 = arith.addi %0, %c0_i32_150 : i32
    %c25_i32 = arith.constant 25 : i32
    %252 = arith.addi %251, %c25_i32 : i32
    %253 = arith.index_cast %252 : i32 to index
    %254 = memref.load %arg1[%253] : memref<32xi32, #tpu.memory_space<smem>>
    %c0_i32_151 = arith.constant 0 : i32
    %c25_i32_152 = arith.constant 25 : i32
    %c0_i32_153 = arith.constant 0 : i32
    %c0_i32_154 = arith.constant 0 : i32
    %255 = tpu.memref_slice %arg2[%254, %c0_i32_154] : memref<32x128xf32, #tpu.memory_space<any>> -> memref<1x128xf32, #tpu.memory_space<any>>
    %256 = tpu.memref_squeeze %255 : memref<1x128xf32, #tpu.memory_space<any>> -> memref<128xf32, #tpu.memory_space<any>>
    %c0_i32_155 = arith.constant 0 : i32
    %257 = tpu.memref_slice %arg4[%c0_i32_151, %c25_i32_152, %c0_i32_155] : memref<2x32x128xf32, #tpu.memory_space<vmem>> -> memref<1x1x128xf32, #tpu.memory_space<vmem>>
    %258 = tpu.memref_squeeze %257 : memref<1x1x128xf32, #tpu.memory_space<vmem>> -> memref<128xf32, #tpu.memory_space<vmem>>
    %259 = tpu.memref_slice %arg5[%c0_i32_153] : memref<2x!tpu.dma_semaphore, #tpu.memory_space<semaphore_mem>> -> memref<1x!tpu.dma_semaphore, #tpu.memory_space<semaphore_mem>>
    %260 = tpu.memref_squeeze %259 : memref<1x!tpu.dma_semaphore, #tpu.memory_space<semaphore_mem>> -> memref<!tpu.dma_semaphore, #tpu.memory_space<semaphore_mem>>
    tpu.enqueue_dma source(%256 : memref<128xf32, #tpu.memory_space<any>>) target(%258 : memref<128xf32, #tpu.memory_space<vmem>>) target_semaphore(%260 : memref<!tpu.dma_semaphore, #tpu.memory_space<semaphore_mem>>)
    %c0_i32_156 = arith.constant 0 : i32
    %261 = arith.addi %0, %c0_i32_156 : i32
    %c26_i32 = arith.constant 26 : i32
    %262 = arith.addi %261, %c26_i32 : i32
    %263 = arith.index_cast %262 : i32 to index
    %264 = memref.load %arg1[%263] : memref<32xi32, #tpu.memory_space<smem>>
    %c0_i32_157 = arith.constant 0 : i32
    %c26_i32_158 = arith.constant 26 : i32
    %c0_i32_159 = arith.constant 0 : i32
    %c0_i32_160 = arith.constant 0 : i32
    %265 = tpu.memref_slice %arg2[%264, %c0_i32_160] : memref<32x128xf32, #tpu.memory_space<any>> -> memref<1x128xf32, #tpu.memory_space<any>>
    %266 = tpu.memref_squeeze %265 : memref<1x128xf32, #tpu.memory_space<any>> -> memref<128xf32, #tpu.memory_space<any>>
    %c0_i32_161 = arith.constant 0 : i32
    %267 = tpu.memref_slice %arg4[%c0_i32_157, %c26_i32_158, %c0_i32_161] : memref<2x32x128xf32, #tpu.memory_space<vmem>> -> memref<1x1x128xf32, #tpu.memory_space<vmem>>
    %268 = tpu.memref_squeeze %267 : memref<1x1x128xf32, #tpu.memory_space<vmem>> -> memref<128xf32, #tpu.memory_space<vmem>>
    %269 = tpu.memref_slice %arg5[%c0_i32_159] : memref<2x!tpu.dma_semaphore, #tpu.memory_space<semaphore_mem>> -> memref<1x!tpu.dma_semaphore, #tpu.memory_space<semaphore_mem>>
    %270 = tpu.memref_squeeze %269 : memref<1x!tpu.dma_semaphore, #tpu.memory_space<semaphore_mem>> -> memref<!tpu.dma_semaphore, #tpu.memory_space<semaphore_mem>>
    tpu.enqueue_dma source(%266 : memref<128xf32, #tpu.memory_space<any>>) target(%268 : memref<128xf32, #tpu.memory_space<vmem>>) target_semaphore(%270 : memref<!tpu.dma_semaphore, #tpu.memory_space<semaphore_mem>>)
    %c0_i32_162 = arith.constant 0 : i32
    %271 = arith.addi %0, %c0_i32_162 : i32
    %c27_i32 = arith.constant 27 : i32
    %272 = arith.addi %271, %c27_i32 : i32
    %273 = arith.index_cast %272 : i32 to index
    %274 = memref.load %arg1[%273] : memref<32xi32, #tpu.memory_space<smem>>
    %c0_i32_163 = arith.constant 0 : i32
    %c27_i32_164 = arith.constant 27 : i32
    %c0_i32_165 = arith.constant 0 : i32
    %c0_i32_166 = arith.constant 0 : i32
    %275 = tpu.memref_slice %arg2[%274, %c0_i32_166] : memref<32x128xf32, #tpu.memory_space<any>> -> memref<1x128xf32, #tpu.memory_space<any>>
    %276 = tpu.memref_squeeze %275 : memref<1x128xf32, #tpu.memory_space<any>> -> memref<128xf32, #tpu.memory_space<any>>
    %c0_i32_167 = arith.constant 0 : i32
    %277 = tpu.memref_slice %arg4[%c0_i32_163, %c27_i32_164, %c0_i32_167] : memref<2x32x128xf32, #tpu.memory_space<vmem>> -> memref<1x1x128xf32, #tpu.memory_space<vmem>>
    %278 = tpu.memref_squeeze %277 : memref<1x1x128xf32, #tpu.memory_space<vmem>> -> memref<128xf32, #tpu.memory_space<vmem>>
    %279 = tpu.memref_slice %arg5[%c0_i32_165] : memref<2x!tpu.dma_semaphore, #tpu.memory_space<semaphore_mem>> -> memref<1x!tpu.dma_semaphore, #tpu.memory_space<semaphore_mem>>
    %280 = tpu.memref_squeeze %279 : memref<1x!tpu.dma_semaphore, #tpu.memory_space<semaphore_mem>> -> memref<!tpu.dma_semaphore, #tpu.memory_space<semaphore_mem>>
    tpu.enqueue_dma source(%276 : memref<128xf32, #tpu.memory_space<any>>) target(%278 : memref<128xf32, #tpu.memory_space<vmem>>) target_semaphore(%280 : memref<!tpu.dma_semaphore, #tpu.memory_space<semaphore_mem>>)
    %c0_i32_168 = arith.constant 0 : i32
    %281 = arith.addi %0, %c0_i32_168 : i32
    %c28_i32 = arith.constant 28 : i32
    %282 = arith.addi %281, %c28_i32 : i32
    %283 = arith.index_cast %282 : i32 to index
    %284 = memref.load %arg1[%283] : memref<32xi32, #tpu.memory_space<smem>>
    %c0_i32_169 = arith.constant 0 : i32
    %c28_i32_170 = arith.constant 28 : i32
    %c0_i32_171 = arith.constant 0 : i32
    %c0_i32_172 = arith.constant 0 : i32
    %285 = tpu.memref_slice %arg2[%284, %c0_i32_172] : memref<32x128xf32, #tpu.memory_space<any>> -> memref<1x128xf32, #tpu.memory_space<any>>
    %286 = tpu.memref_squeeze %285 : memref<1x128xf32, #tpu.memory_space<any>> -> memref<128xf32, #tpu.memory_space<any>>
    %c0_i32_173 = arith.constant 0 : i32
    %287 = tpu.memref_slice %arg4[%c0_i32_169, %c28_i32_170, %c0_i32_173] : memref<2x32x128xf32, #tpu.memory_space<vmem>> -> memref<1x1x128xf32, #tpu.memory_space<vmem>>
    %288 = tpu.memref_squeeze %287 : memref<1x1x128xf32, #tpu.memory_space<vmem>> -> memref<128xf32, #tpu.memory_space<vmem>>
    %289 = tpu.memref_slice %arg5[%c0_i32_171] : memref<2x!tpu.dma_semaphore, #tpu.memory_space<semaphore_mem>> -> memref<1x!tpu.dma_semaphore, #tpu.memory_space<semaphore_mem>>
    %290 = tpu.memref_squeeze %289 : memref<1x!tpu.dma_semaphore, #tpu.memory_space<semaphore_mem>> -> memref<!tpu.dma_semaphore, #tpu.memory_space<semaphore_mem>>
    tpu.enqueue_dma source(%286 : memref<128xf32, #tpu.memory_space<any>>) target(%288 : memref<128xf32, #tpu.memory_space<vmem>>) target_semaphore(%290 : memref<!tpu.dma_semaphore, #tpu.memory_space<semaphore_mem>>)
    %c0_i32_174 = arith.constant 0 : i32
    %291 = arith.addi %0, %c0_i32_174 : i32
    %c29_i32 = arith.constant 29 : i32
    %292 = arith.addi %291, %c29_i32 : i32
    %293 = arith.index_cast %292 : i32 to index
    %294 = memref.load %arg1[%293] : memref<32xi32, #tpu.memory_space<smem>>
    %c0_i32_175 = arith.constant 0 : i32
    %c29_i32_176 = arith.constant 29 : i32
    %c0_i32_177 = arith.constant 0 : i32
    %c0_i32_178 = arith.constant 0 : i32
    %295 = tpu.memref_slice %arg2[%294, %c0_i32_178] : memref<32x128xf32, #tpu.memory_space<any>> -> memref<1x128xf32, #tpu.memory_space<any>>
    %296 = tpu.memref_squeeze %295 : memref<1x128xf32, #tpu.memory_space<any>> -> memref<128xf32, #tpu.memory_space<any>>
    %c0_i32_179 = arith.constant 0 : i32
    %297 = tpu.memref_slice %arg4[%c0_i32_175, %c29_i32_176, %c0_i32_179] : memref<2x32x128xf32, #tpu.memory_space<vmem>> -> memref<1x1x128xf32, #tpu.memory_space<vmem>>
    %298 = tpu.memref_squeeze %297 : memref<1x1x128xf32, #tpu.memory_space<vmem>> -> memref<128xf32, #tpu.memory_space<vmem>>
    %299 = tpu.memref_slice %arg5[%c0_i32_177] : memref<2x!tpu.dma_semaphore, #tpu.memory_space<semaphore_mem>> -> memref<1x!tpu.dma_semaphore, #tpu.memory_space<semaphore_mem>>
    %300 = tpu.memref_squeeze %299 : memref<1x!tpu.dma_semaphore, #tpu.memory_space<semaphore_mem>> -> memref<!tpu.dma_semaphore, #tpu.memory_space<semaphore_mem>>
    tpu.enqueue_dma source(%296 : memref<128xf32, #tpu.memory_space<any>>) target(%298 : memref<128xf32, #tpu.memory_space<vmem>>) target_semaphore(%300 : memref<!tpu.dma_semaphore, #tpu.memory_space<semaphore_mem>>)
    %c0_i32_180 = arith.constant 0 : i32
    %301 = arith.addi %0, %c0_i32_180 : i32
    %c30_i32 = arith.constant 30 : i32
    %302 = arith.addi %301, %c30_i32 : i32
    %303 = arith.index_cast %302 : i32 to index
    %304 = memref.load %arg1[%303] : memref<32xi32, #tpu.memory_space<smem>>
    %c0_i32_181 = arith.constant 0 : i32
    %c30_i32_182 = arith.constant 30 : i32
    %c0_i32_183 = arith.constant 0 : i32
    %c0_i32_184 = arith.constant 0 : i32
    %305 = tpu.memref_slice %arg2[%304, %c0_i32_184] : memref<32x128xf32, #tpu.memory_space<any>> -> memref<1x128xf32, #tpu.memory_space<any>>
    %306 = tpu.memref_squeeze %305 : memref<1x128xf32, #tpu.memory_space<any>> -> memref<128xf32, #tpu.memory_space<any>>
    %c0_i32_185 = arith.constant 0 : i32
    %307 = tpu.memref_slice %arg4[%c0_i32_181, %c30_i32_182, %c0_i32_185] : memref<2x32x128xf32, #tpu.memory_space<vmem>> -> memref<1x1x128xf32, #tpu.memory_space<vmem>>
    %308 = tpu.memref_squeeze %307 : memref<1x1x128xf32, #tpu.memory_space<vmem>> -> memref<128xf32, #tpu.memory_space<vmem>>
    %309 = tpu.memref_slice %arg5[%c0_i32_183] : memref<2x!tpu.dma_semaphore, #tpu.memory_space<semaphore_mem>> -> memref<1x!tpu.dma_semaphore, #tpu.memory_space<semaphore_mem>>
    %310 = tpu.memref_squeeze %309 : memref<1x!tpu.dma_semaphore, #tpu.memory_space<semaphore_mem>> -> memref<!tpu.dma_semaphore, #tpu.memory_space<semaphore_mem>>
    tpu.enqueue_dma source(%306 : memref<128xf32, #tpu.memory_space<any>>) target(%308 : memref<128xf32, #tpu.memory_space<vmem>>) target_semaphore(%310 : memref<!tpu.dma_semaphore, #tpu.memory_space<semaphore_mem>>)
    %c0_i32_186 = arith.constant 0 : i32
    %311 = arith.addi %0, %c0_i32_186 : i32
    %c31_i32 = arith.constant 31 : i32
    %312 = arith.addi %311, %c31_i32 : i32
    %313 = arith.index_cast %312 : i32 to index
    %314 = memref.load %arg1[%313] : memref<32xi32, #tpu.memory_space<smem>>
    %c0_i32_187 = arith.constant 0 : i32
    %c31_i32_188 = arith.constant 31 : i32
    %c0_i32_189 = arith.constant 0 : i32
    %c0_i32_190 = arith.constant 0 : i32
    %315 = tpu.memref_slice %arg2[%314, %c0_i32_190] : memref<32x128xf32, #tpu.memory_space<any>> -> memref<1x128xf32, #tpu.memory_space<any>>
    %316 = tpu.memref_squeeze %315 : memref<1x128xf32, #tpu.memory_space<any>> -> memref<128xf32, #tpu.memory_space<any>>
    %c0_i32_191 = arith.constant 0 : i32
    %317 = tpu.memref_slice %arg4[%c0_i32_187, %c31_i32_188, %c0_i32_191] : memref<2x32x128xf32, #tpu.memory_space<vmem>> -> memref<1x1x128xf32, #tpu.memory_space<vmem>>
    %318 = tpu.memref_squeeze %317 : memref<1x1x128xf32, #tpu.memory_space<vmem>> -> memref<128xf32, #tpu.memory_space<vmem>>
    %319 = tpu.memref_slice %arg5[%c0_i32_189] : memref<2x!tpu.dma_semaphore, #tpu.memory_space<semaphore_mem>> -> memref<1x!tpu.dma_semaphore, #tpu.memory_space<semaphore_mem>>
    %320 = tpu.memref_squeeze %319 : memref<1x!tpu.dma_semaphore, #tpu.memory_space<semaphore_mem>> -> memref<!tpu.dma_semaphore, #tpu.memory_space<semaphore_mem>>
    tpu.enqueue_dma source(%316 : memref<128xf32, #tpu.memory_space<any>>) target(%318 : memref<128xf32, #tpu.memory_space<vmem>>) target_semaphore(%320 : memref<!tpu.dma_semaphore, #tpu.memory_space<semaphore_mem>>)
    %c0_i32_192 = arith.constant 0 : i32
    %c1_i32_193 = arith.constant 1 : i32
    %321 = arith.muli %c0_i32_192, %c1_i32_193 : i32
    %c0_i32_194 = arith.constant 0 : i32
    %322 = arith.addi %c0_i32_194, %321 : i32
    %c2_i32_195 = arith.constant 2 : i32
    %c0_i32_196 = arith.constant 0 : i32
    %323 = arith.cmpi eq, %c2_i32_195, %c0_i32_196 : i32
    %c1_i32_197 = arith.constant 1 : i32
    %324 = arith.select %323, %c1_i32_197, %c2_i32_195 : i32
    %325 = arith.remsi %322, %324 : i32
    %c0_i32_198 = arith.constant 0 : i32
    %326 = arith.cmpi ne, %325, %c0_i32_198 : i32
    %c0_i32_199 = arith.constant 0 : i32
    %327 = arith.cmpi slt, %325, %c0_i32_199 : i32
    %c0_i32_200 = arith.constant 0 : i32
    %328 = arith.cmpi slt, %324, %c0_i32_200 : i32
    %329 = arith.xori %327, %328 : i1
    %330 = arith.andi %329, %326 : i1
    %331 = arith.addi %325, %324 : i32
    %332 = arith.select %330, %331, %325 : i32
    %c1_i32_201 = arith.constant 1 : i32
    %333 = arith.addi %322, %c1_i32_201 : i32
    %c1_i32_202 = arith.constant 1 : i32
    %334 = arith.cmpi slt, %333, %c1_i32_202 : i32
    %335 = arith.extui %334 : i1 to i32
    %c0_i32_203 = arith.constant 0 : i32
    %336 = arith.cmpi ne, %335, %c0_i32_203 : i32
    scf.if %336 {
      %c1_i32_336 = arith.constant 1 : i32
      %538 = arith.addi %322, %c1_i32_336 : i32
      %c1_i32_337 = arith.constant 1 : i32
      %539 = arith.subi %c1_i32_337, %332 : i32
      %c32_i32_338 = arith.constant 32 : i32
      %540 = arith.muli %538, %c32_i32_338 : i32
      %541 = arith.addi %0, %540 : i32
      %c0_i32_339 = arith.constant 0 : i32
      %542 = arith.addi %541, %c0_i32_339 : i32
      %543 = arith.index_cast %542 : i32 to index
      %544 = memref.load %arg1[%543] : memref<32xi32, #tpu.memory_space<smem>>
      %c0_i32_340 = arith.constant 0 : i32
      %c0_i32_341 = arith.constant 0 : i32
      %545 = tpu.memref_slice %arg2[%544, %c0_i32_341] : memref<32x128xf32, #tpu.memory_space<any>> -> memref<1x128xf32, #tpu.memory_space<any>>
      %546 = tpu.memref_squeeze %545 : memref<1x128xf32, #tpu.memory_space<any>> -> memref<128xf32, #tpu.memory_space<any>>
      %c0_i32_342 = arith.constant 0 : i32
      %547 = tpu.memref_slice %arg4[%539, %c0_i32_340, %c0_i32_342] : memref<2x32x128xf32, #tpu.memory_space<vmem>> -> memref<1x1x128xf32, #tpu.memory_space<vmem>>
      %548 = tpu.memref_squeeze %547 : memref<1x1x128xf32, #tpu.memory_space<vmem>> -> memref<128xf32, #tpu.memory_space<vmem>>
      %549 = tpu.memref_slice %arg5[%539] : memref<2x!tpu.dma_semaphore, #tpu.memory_space<semaphore_mem>> -> memref<1x!tpu.dma_semaphore, #tpu.memory_space<semaphore_mem>>
      %550 = tpu.memref_squeeze %549 : memref<1x!tpu.dma_semaphore, #tpu.memory_space<semaphore_mem>> -> memref<!tpu.dma_semaphore, #tpu.memory_space<semaphore_mem>>
      tpu.enqueue_dma source(%546 : memref<128xf32, #tpu.memory_space<any>>) target(%548 : memref<128xf32, #tpu.memory_space<vmem>>) target_semaphore(%550 : memref<!tpu.dma_semaphore, #tpu.memory_space<semaphore_mem>>)
      %c32_i32_343 = arith.constant 32 : i32
      %551 = arith.muli %538, %c32_i32_343 : i32
      %552 = arith.addi %0, %551 : i32
      %c1_i32_344 = arith.constant 1 : i32
      %553 = arith.addi %552, %c1_i32_344 : i32
      %554 = arith.index_cast %553 : i32 to index
      %555 = memref.load %arg1[%554] : memref<32xi32, #tpu.memory_space<smem>>
      %c1_i32_345 = arith.constant 1 : i32
      %c0_i32_346 = arith.constant 0 : i32
      %556 = tpu.memref_slice %arg2[%555, %c0_i32_346] : memref<32x128xf32, #tpu.memory_space<any>> -> memref<1x128xf32, #tpu.memory_space<any>>
      %557 = tpu.memref_squeeze %556 : memref<1x128xf32, #tpu.memory_space<any>> -> memref<128xf32, #tpu.memory_space<any>>
      %c0_i32_347 = arith.constant 0 : i32
      %558 = tpu.memref_slice %arg4[%539, %c1_i32_345, %c0_i32_347] : memref<2x32x128xf32, #tpu.memory_space<vmem>> -> memref<1x1x128xf32, #tpu.memory_space<vmem>>
      %559 = tpu.memref_squeeze %558 : memref<1x1x128xf32, #tpu.memory_space<vmem>> -> memref<128xf32, #tpu.memory_space<vmem>>
      %560 = tpu.memref_slice %arg5[%539] : memref<2x!tpu.dma_semaphore, #tpu.memory_space<semaphore_mem>> -> memref<1x!tpu.dma_semaphore, #tpu.memory_space<semaphore_mem>>
      %561 = tpu.memref_squeeze %560 : memref<1x!tpu.dma_semaphore, #tpu.memory_space<semaphore_mem>> -> memref<!tpu.dma_semaphore, #tpu.memory_space<semaphore_mem>>
      tpu.enqueue_dma source(%557 : memref<128xf32, #tpu.memory_space<any>>) target(%559 : memref<128xf32, #tpu.memory_space<vmem>>) target_semaphore(%561 : memref<!tpu.dma_semaphore, #tpu.memory_space<semaphore_mem>>)
      %c32_i32_348 = arith.constant 32 : i32
      %562 = arith.muli %538, %c32_i32_348 : i32
      %563 = arith.addi %0, %562 : i32
      %c2_i32_349 = arith.constant 2 : i32
      %564 = arith.addi %563, %c2_i32_349 : i32
      %565 = arith.index_cast %564 : i32 to index
      %566 = memref.load %arg1[%565] : memref<32xi32, #tpu.memory_space<smem>>
      %c2_i32_350 = arith.constant 2 : i32
      %c0_i32_351 = arith.constant 0 : i32
      %567 = tpu.memref_slice %arg2[%566, %c0_i32_351] : memref<32x128xf32, #tpu.memory_space<any>> -> memref<1x128xf32, #tpu.memory_space<any>>
      %568 = tpu.memref_squeeze %567 : memref<1x128xf32, #tpu.memory_space<any>> -> memref<128xf32, #tpu.memory_space<any>>
      %c0_i32_352 = arith.constant 0 : i32
      %569 = tpu.memref_slice %arg4[%539, %c2_i32_350, %c0_i32_352] : memref<2x32x128xf32, #tpu.memory_space<vmem>> -> memref<1x1x128xf32, #tpu.memory_space<vmem>>
      %570 = tpu.memref_squeeze %569 : memref<1x1x128xf32, #tpu.memory_space<vmem>> -> memref<128xf32, #tpu.memory_space<vmem>>
      %571 = tpu.memref_slice %arg5[%539] : memref<2x!tpu.dma_semaphore, #tpu.memory_space<semaphore_mem>> -> memref<1x!tpu.dma_semaphore, #tpu.memory_space<semaphore_mem>>
      %572 = tpu.memref_squeeze %571 : memref<1x!tpu.dma_semaphore, #tpu.memory_space<semaphore_mem>> -> memref<!tpu.dma_semaphore, #tpu.memory_space<semaphore_mem>>
      tpu.enqueue_dma source(%568 : memref<128xf32, #tpu.memory_space<any>>) target(%570 : memref<128xf32, #tpu.memory_space<vmem>>) target_semaphore(%572 : memref<!tpu.dma_semaphore, #tpu.memory_space<semaphore_mem>>)
      %c32_i32_353 = arith.constant 32 : i32
      %573 = arith.muli %538, %c32_i32_353 : i32
      %574 = arith.addi %0, %573 : i32
      %c3_i32_354 = arith.constant 3 : i32
      %575 = arith.addi %574, %c3_i32_354 : i32
      %576 = arith.index_cast %575 : i32 to index
      %577 = memref.load %arg1[%576] : memref<32xi32, #tpu.memory_space<smem>>
      %c3_i32_355 = arith.constant 3 : i32
      %c0_i32_356 = arith.constant 0 : i32
      %578 = tpu.memref_slice %arg2[%577, %c0_i32_356] : memref<32x128xf32, #tpu.memory_space<any>> -> memref<1x128xf32, #tpu.memory_space<any>>
      %579 = tpu.memref_squeeze %578 : memref<1x128xf32, #tpu.memory_space<any>> -> memref<128xf32, #tpu.memory_space<any>>
      %c0_i32_357 = arith.constant 0 : i32
      %580 = tpu.memref_slice %arg4[%539, %c3_i32_355, %c0_i32_357] : memref<2x32x128xf32, #tpu.memory_space<vmem>> -> memref<1x1x128xf32, #tpu.memory_space<vmem>>
      %581 = tpu.memref_squeeze %580 : memref<1x1x128xf32, #tpu.memory_space<vmem>> -> memref<128xf32, #tpu.memory_space<vmem>>
      %582 = tpu.memref_slice %arg5[%539] : memref<2x!tpu.dma_semaphore, #tpu.memory_space<semaphore_mem>> -> memref<1x!tpu.dma_semaphore, #tpu.memory_space<semaphore_mem>>
      %583 = tpu.memref_squeeze %582 : memref<1x!tpu.dma_semaphore, #tpu.memory_space<semaphore_mem>> -> memref<!tpu.dma_semaphore, #tpu.memory_space<semaphore_mem>>
      tpu.enqueue_dma source(%579 : memref<128xf32, #tpu.memory_space<any>>) target(%581 : memref<128xf32, #tpu.memory_space<vmem>>) target_semaphore(%583 : memref<!tpu.dma_semaphore, #tpu.memory_space<semaphore_mem>>)
      %c32_i32_358 = arith.constant 32 : i32
      %584 = arith.muli %538, %c32_i32_358 : i32
      %585 = arith.addi %0, %584 : i32
      %c4_i32_359 = arith.constant 4 : i32
      %586 = arith.addi %585, %c4_i32_359 : i32
      %587 = arith.index_cast %586 : i32 to index
      %588 = memref.load %arg1[%587] : memref<32xi32, #tpu.memory_space<smem>>
      %c4_i32_360 = arith.constant 4 : i32
      %c0_i32_361 = arith.constant 0 : i32
      %589 = tpu.memref_slice %arg2[%588, %c0_i32_361] : memref<32x128xf32, #tpu.memory_space<any>> -> memref<1x128xf32, #tpu.memory_space<any>>
      %590 = tpu.memref_squeeze %589 : memref<1x128xf32, #tpu.memory_space<any>> -> memref<128xf32, #tpu.memory_space<any>>
      %c0_i32_362 = arith.constant 0 : i32
      %591 = tpu.memref_slice %arg4[%539, %c4_i32_360, %c0_i32_362] : memref<2x32x128xf32, #tpu.memory_space<vmem>> -> memref<1x1x128xf32, #tpu.memory_space<vmem>>
      %592 = tpu.memref_squeeze %591 : memref<1x1x128xf32, #tpu.memory_space<vmem>> -> memref<128xf32, #tpu.memory_space<vmem>>
      %593 = tpu.memref_slice %arg5[%539] : memref<2x!tpu.dma_semaphore, #tpu.memory_space<semaphore_mem>> -> memref<1x!tpu.dma_semaphore, #tpu.memory_space<semaphore_mem>>
      %594 = tpu.memref_squeeze %593 : memref<1x!tpu.dma_semaphore, #tpu.memory_space<semaphore_mem>> -> memref<!tpu.dma_semaphore, #tpu.memory_space<semaphore_mem>>
      tpu.enqueue_dma source(%590 : memref<128xf32, #tpu.memory_space<any>>) target(%592 : memref<128xf32, #tpu.memory_space<vmem>>) target_semaphore(%594 : memref<!tpu.dma_semaphore, #tpu.memory_space<semaphore_mem>>)
      %c32_i32_363 = arith.constant 32 : i32
      %595 = arith.muli %538, %c32_i32_363 : i32
      %596 = arith.addi %0, %595 : i32
      %c5_i32_364 = arith.constant 5 : i32
      %597 = arith.addi %596, %c5_i32_364 : i32
      %598 = arith.index_cast %597 : i32 to index
      %599 = memref.load %arg1[%598] : memref<32xi32, #tpu.memory_space<smem>>
      %c5_i32_365 = arith.constant 5 : i32
      %c0_i32_366 = arith.constant 0 : i32
      %600 = tpu.memref_slice %arg2[%599, %c0_i32_366] : memref<32x128xf32, #tpu.memory_space<any>> -> memref<1x128xf32, #tpu.memory_space<any>>
      %601 = tpu.memref_squeeze %600 : memref<1x128xf32, #tpu.memory_space<any>> -> memref<128xf32, #tpu.memory_space<any>>
      %c0_i32_367 = arith.constant 0 : i32
      %602 = tpu.memref_slice %arg4[%539, %c5_i32_365, %c0_i32_367] : memref<2x32x128xf32, #tpu.memory_space<vmem>> -> memref<1x1x128xf32, #tpu.memory_space<vmem>>
      %603 = tpu.memref_squeeze %602 : memref<1x1x128xf32, #tpu.memory_space<vmem>> -> memref<128xf32, #tpu.memory_space<vmem>>
      %604 = tpu.memref_slice %arg5[%539] : memref<2x!tpu.dma_semaphore, #tpu.memory_space<semaphore_mem>> -> memref<1x!tpu.dma_semaphore, #tpu.memory_space<semaphore_mem>>
      %605 = tpu.memref_squeeze %604 : memref<1x!tpu.dma_semaphore, #tpu.memory_space<semaphore_mem>> -> memref<!tpu.dma_semaphore, #tpu.memory_space<semaphore_mem>>
      tpu.enqueue_dma source(%601 : memref<128xf32, #tpu.memory_space<any>>) target(%603 : memref<128xf32, #tpu.memory_space<vmem>>) target_semaphore(%605 : memref<!tpu.dma_semaphore, #tpu.memory_space<semaphore_mem>>)
      %c32_i32_368 = arith.constant 32 : i32
      %606 = arith.muli %538, %c32_i32_368 : i32
      %607 = arith.addi %0, %606 : i32
      %c6_i32_369 = arith.constant 6 : i32
      %608 = arith.addi %607, %c6_i32_369 : i32
      %609 = arith.index_cast %608 : i32 to index
      %610 = memref.load %arg1[%609] : memref<32xi32, #tpu.memory_space<smem>>
      %c6_i32_370 = arith.constant 6 : i32
      %c0_i32_371 = arith.constant 0 : i32
      %611 = tpu.memref_slice %arg2[%610, %c0_i32_371] : memref<32x128xf32, #tpu.memory_space<any>> -> memref<1x128xf32, #tpu.memory_space<any>>
      %612 = tpu.memref_squeeze %611 : memref<1x128xf32, #tpu.memory_space<any>> -> memref<128xf32, #tpu.memory_space<any>>
      %c0_i32_372 = arith.constant 0 : i32
      %613 = tpu.memref_slice %arg4[%539, %c6_i32_370, %c0_i32_372] : memref<2x32x128xf32, #tpu.memory_space<vmem>> -> memref<1x1x128xf32, #tpu.memory_space<vmem>>
      %614 = tpu.memref_squeeze %613 : memref<1x1x128xf32, #tpu.memory_space<vmem>> -> memref<128xf32, #tpu.memory_space<vmem>>
      %615 = tpu.memref_slice %arg5[%539] : memref<2x!tpu.dma_semaphore, #tpu.memory_space<semaphore_mem>> -> memref<1x!tpu.dma_semaphore, #tpu.memory_space<semaphore_mem>>
      %616 = tpu.memref_squeeze %615 : memref<1x!tpu.dma_semaphore, #tpu.memory_space<semaphore_mem>> -> memref<!tpu.dma_semaphore, #tpu.memory_space<semaphore_mem>>
      tpu.enqueue_dma source(%612 : memref<128xf32, #tpu.memory_space<any>>) target(%614 : memref<128xf32, #tpu.memory_space<vmem>>) target_semaphore(%616 : memref<!tpu.dma_semaphore, #tpu.memory_space<semaphore_mem>>)
      %c32_i32_373 = arith.constant 32 : i32
      %617 = arith.muli %538, %c32_i32_373 : i32
      %618 = arith.addi %0, %617 : i32
      %c7_i32_374 = arith.constant 7 : i32
      %619 = arith.addi %618, %c7_i32_374 : i32
      %620 = arith.index_cast %619 : i32 to index
      %621 = memref.load %arg1[%620] : memref<32xi32, #tpu.memory_space<smem>>
      %c7_i32_375 = arith.constant 7 : i32
      %c0_i32_376 = arith.constant 0 : i32
      %622 = tpu.memref_slice %arg2[%621, %c0_i32_376] : memref<32x128xf32, #tpu.memory_space<any>> -> memref<1x128xf32, #tpu.memory_space<any>>
      %623 = tpu.memref_squeeze %622 : memref<1x128xf32, #tpu.memory_space<any>> -> memref<128xf32, #tpu.memory_space<any>>
      %c0_i32_377 = arith.constant 0 : i32
      %624 = tpu.memref_slice %arg4[%539, %c7_i32_375, %c0_i32_377] : memref<2x32x128xf32, #tpu.memory_space<vmem>> -> memref<1x1x128xf32, #tpu.memory_space<vmem>>
      %625 = tpu.memref_squeeze %624 : memref<1x1x128xf32, #tpu.memory_space<vmem>> -> memref<128xf32, #tpu.memory_space<vmem>>
      %626 = tpu.memref_slice %arg5[%539] : memref<2x!tpu.dma_semaphore, #tpu.memory_space<semaphore_mem>> -> memref<1x!tpu.dma_semaphore, #tpu.memory_space<semaphore_mem>>
      %627 = tpu.memref_squeeze %626 : memref<1x!tpu.dma_semaphore, #tpu.memory_space<semaphore_mem>> -> memref<!tpu.dma_semaphore, #tpu.memory_space<semaphore_mem>>
      tpu.enqueue_dma source(%623 : memref<128xf32, #tpu.memory_space<any>>) target(%625 : memref<128xf32, #tpu.memory_space<vmem>>) target_semaphore(%627 : memref<!tpu.dma_semaphore, #tpu.memory_space<semaphore_mem>>)
      %c32_i32_378 = arith.constant 32 : i32
      %628 = arith.muli %538, %c32_i32_378 : i32
      %629 = arith.addi %0, %628 : i32
      %c8_i32_379 = arith.constant 8 : i32
      %630 = arith.addi %629, %c8_i32_379 : i32
      %631 = arith.index_cast %630 : i32 to index
      %632 = memref.load %arg1[%631] : memref<32xi32, #tpu.memory_space<smem>>
      %c8_i32_380 = arith.constant 8 : i32
      %c0_i32_381 = arith.constant 0 : i32
      %633 = tpu.memref_slice %arg2[%632, %c0_i32_381] : memref<32x128xf32, #tpu.memory_space<any>> -> memref<1x128xf32, #tpu.memory_space<any>>
      %634 = tpu.memref_squeeze %633 : memref<1x128xf32, #tpu.memory_space<any>> -> memref<128xf32, #tpu.memory_space<any>>
      %c0_i32_382 = arith.constant 0 : i32
      %635 = tpu.memref_slice %arg4[%539, %c8_i32_380, %c0_i32_382] : memref<2x32x128xf32, #tpu.memory_space<vmem>> -> memref<1x1x128xf32, #tpu.memory_space<vmem>>
      %636 = tpu.memref_squeeze %635 : memref<1x1x128xf32, #tpu.memory_space<vmem>> -> memref<128xf32, #tpu.memory_space<vmem>>
      %637 = tpu.memref_slice %arg5[%539] : memref<2x!tpu.dma_semaphore, #tpu.memory_space<semaphore_mem>> -> memref<1x!tpu.dma_semaphore, #tpu.memory_space<semaphore_mem>>
      %638 = tpu.memref_squeeze %637 : memref<1x!tpu.dma_semaphore, #tpu.memory_space<semaphore_mem>> -> memref<!tpu.dma_semaphore, #tpu.memory_space<semaphore_mem>>
      tpu.enqueue_dma source(%634 : memref<128xf32, #tpu.memory_space<any>>) target(%636 : memref<128xf32, #tpu.memory_space<vmem>>) target_semaphore(%638 : memref<!tpu.dma_semaphore, #tpu.memory_space<semaphore_mem>>)
      %c32_i32_383 = arith.constant 32 : i32
      %639 = arith.muli %538, %c32_i32_383 : i32
      %640 = arith.addi %0, %639 : i32
      %c9_i32_384 = arith.constant 9 : i32
      %641 = arith.addi %640, %c9_i32_384 : i32
      %642 = arith.index_cast %641 : i32 to index
      %643 = memref.load %arg1[%642] : memref<32xi32, #tpu.memory_space<smem>>
      %c9_i32_385 = arith.constant 9 : i32
      %c0_i32_386 = arith.constant 0 : i32
      %644 = tpu.memref_slice %arg2[%643, %c0_i32_386] : memref<32x128xf32, #tpu.memory_space<any>> -> memref<1x128xf32, #tpu.memory_space<any>>
      %645 = tpu.memref_squeeze %644 : memref<1x128xf32, #tpu.memory_space<any>> -> memref<128xf32, #tpu.memory_space<any>>
      %c0_i32_387 = arith.constant 0 : i32
      %646 = tpu.memref_slice %arg4[%539, %c9_i32_385, %c0_i32_387] : memref<2x32x128xf32, #tpu.memory_space<vmem>> -> memref<1x1x128xf32, #tpu.memory_space<vmem>>
      %647 = tpu.memref_squeeze %646 : memref<1x1x128xf32, #tpu.memory_space<vmem>> -> memref<128xf32, #tpu.memory_space<vmem>>
      %648 = tpu.memref_slice %arg5[%539] : memref<2x!tpu.dma_semaphore, #tpu.memory_space<semaphore_mem>> -> memref<1x!tpu.dma_semaphore, #tpu.memory_space<semaphore_mem>>
      %649 = tpu.memref_squeeze %648 : memref<1x!tpu.dma_semaphore, #tpu.memory_space<semaphore_mem>> -> memref<!tpu.dma_semaphore, #tpu.memory_space<semaphore_mem>>
      tpu.enqueue_dma source(%645 : memref<128xf32, #tpu.memory_space<any>>) target(%647 : memref<128xf32, #tpu.memory_space<vmem>>) target_semaphore(%649 : memref<!tpu.dma_semaphore, #tpu.memory_space<semaphore_mem>>)
      %c32_i32_388 = arith.constant 32 : i32
      %650 = arith.muli %538, %c32_i32_388 : i32
      %651 = arith.addi %0, %650 : i32
      %c10_i32_389 = arith.constant 10 : i32
      %652 = arith.addi %651, %c10_i32_389 : i32
      %653 = arith.index_cast %652 : i32 to index
      %654 = memref.load %arg1[%653] : memref<32xi32, #tpu.memory_space<smem>>
      %c10_i32_390 = arith.constant 10 : i32
      %c0_i32_391 = arith.constant 0 : i32
      %655 = tpu.memref_slice %arg2[%654, %c0_i32_391] : memref<32x128xf32, #tpu.memory_space<any>> -> memref<1x128xf32, #tpu.memory_space<any>>
      %656 = tpu.memref_squeeze %655 : memref<1x128xf32, #tpu.memory_space<any>> -> memref<128xf32, #tpu.memory_space<any>>
      %c0_i32_392 = arith.constant 0 : i32
      %657 = tpu.memref_slice %arg4[%539, %c10_i32_390, %c0_i32_392] : memref<2x32x128xf32, #tpu.memory_space<vmem>> -> memref<1x1x128xf32, #tpu.memory_space<vmem>>
      %658 = tpu.memref_squeeze %657 : memref<1x1x128xf32, #tpu.memory_space<vmem>> -> memref<128xf32, #tpu.memory_space<vmem>>
      %659 = tpu.memref_slice %arg5[%539] : memref<2x!tpu.dma_semaphore, #tpu.memory_space<semaphore_mem>> -> memref<1x!tpu.dma_semaphore, #tpu.memory_space<semaphore_mem>>
      %660 = tpu.memref_squeeze %659 : memref<1x!tpu.dma_semaphore, #tpu.memory_space<semaphore_mem>> -> memref<!tpu.dma_semaphore, #tpu.memory_space<semaphore_mem>>
      tpu.enqueue_dma source(%656 : memref<128xf32, #tpu.memory_space<any>>) target(%658 : memref<128xf32, #tpu.memory_space<vmem>>) target_semaphore(%660 : memref<!tpu.dma_semaphore, #tpu.memory_space<semaphore_mem>>)
      %c32_i32_393 = arith.constant 32 : i32
      %661 = arith.muli %538, %c32_i32_393 : i32
      %662 = arith.addi %0, %661 : i32
      %c11_i32_394 = arith.constant 11 : i32
      %663 = arith.addi %662, %c11_i32_394 : i32
      %664 = arith.index_cast %663 : i32 to index
      %665 = memref.load %arg1[%664] : memref<32xi32, #tpu.memory_space<smem>>
      %c11_i32_395 = arith.constant 11 : i32
      %c0_i32_396 = arith.constant 0 : i32
      %666 = tpu.memref_slice %arg2[%665, %c0_i32_396] : memref<32x128xf32, #tpu.memory_space<any>> -> memref<1x128xf32, #tpu.memory_space<any>>
      %667 = tpu.memref_squeeze %666 : memref<1x128xf32, #tpu.memory_space<any>> -> memref<128xf32, #tpu.memory_space<any>>
      %c0_i32_397 = arith.constant 0 : i32
      %668 = tpu.memref_slice %arg4[%539, %c11_i32_395, %c0_i32_397] : memref<2x32x128xf32, #tpu.memory_space<vmem>> -> memref<1x1x128xf32, #tpu.memory_space<vmem>>
      %669 = tpu.memref_squeeze %668 : memref<1x1x128xf32, #tpu.memory_space<vmem>> -> memref<128xf32, #tpu.memory_space<vmem>>
      %670 = tpu.memref_slice %arg5[%539] : memref<2x!tpu.dma_semaphore, #tpu.memory_space<semaphore_mem>> -> memref<1x!tpu.dma_semaphore, #tpu.memory_space<semaphore_mem>>
      %671 = tpu.memref_squeeze %670 : memref<1x!tpu.dma_semaphore, #tpu.memory_space<semaphore_mem>> -> memref<!tpu.dma_semaphore, #tpu.memory_space<semaphore_mem>>
      tpu.enqueue_dma source(%667 : memref<128xf32, #tpu.memory_space<any>>) target(%669 : memref<128xf32, #tpu.memory_space<vmem>>) target_semaphore(%671 : memref<!tpu.dma_semaphore, #tpu.memory_space<semaphore_mem>>)
      %c32_i32_398 = arith.constant 32 : i32
      %672 = arith.muli %538, %c32_i32_398 : i32
      %673 = arith.addi %0, %672 : i32
      %c12_i32_399 = arith.constant 12 : i32
      %674 = arith.addi %673, %c12_i32_399 : i32
      %675 = arith.index_cast %674 : i32 to index
      %676 = memref.load %arg1[%675] : memref<32xi32, #tpu.memory_space<smem>>
      %c12_i32_400 = arith.constant 12 : i32
      %c0_i32_401 = arith.constant 0 : i32
      %677 = tpu.memref_slice %arg2[%676, %c0_i32_401] : memref<32x128xf32, #tpu.memory_space<any>> -> memref<1x128xf32, #tpu.memory_space<any>>
      %678 = tpu.memref_squeeze %677 : memref<1x128xf32, #tpu.memory_space<any>> -> memref<128xf32, #tpu.memory_space<any>>
      %c0_i32_402 = arith.constant 0 : i32
      %679 = tpu.memref_slice %arg4[%539, %c12_i32_400, %c0_i32_402] : memref<2x32x128xf32, #tpu.memory_space<vmem>> -> memref<1x1x128xf32, #tpu.memory_space<vmem>>
      %680 = tpu.memref_squeeze %679 : memref<1x1x128xf32, #tpu.memory_space<vmem>> -> memref<128xf32, #tpu.memory_space<vmem>>
      %681 = tpu.memref_slice %arg5[%539] : memref<2x!tpu.dma_semaphore, #tpu.memory_space<semaphore_mem>> -> memref<1x!tpu.dma_semaphore, #tpu.memory_space<semaphore_mem>>
      %682 = tpu.memref_squeeze %681 : memref<1x!tpu.dma_semaphore, #tpu.memory_space<semaphore_mem>> -> memref<!tpu.dma_semaphore, #tpu.memory_space<semaphore_mem>>
      tpu.enqueue_dma source(%678 : memref<128xf32, #tpu.memory_space<any>>) target(%680 : memref<128xf32, #tpu.memory_space<vmem>>) target_semaphore(%682 : memref<!tpu.dma_semaphore, #tpu.memory_space<semaphore_mem>>)
      %c32_i32_403 = arith.constant 32 : i32
      %683 = arith.muli %538, %c32_i32_403 : i32
      %684 = arith.addi %0, %683 : i32
      %c13_i32_404 = arith.constant 13 : i32
      %685 = arith.addi %684, %c13_i32_404 : i32
      %686 = arith.index_cast %685 : i32 to index
      %687 = memref.load %arg1[%686] : memref<32xi32, #tpu.memory_space<smem>>
      %c13_i32_405 = arith.constant 13 : i32
      %c0_i32_406 = arith.constant 0 : i32
      %688 = tpu.memref_slice %arg2[%687, %c0_i32_406] : memref<32x128xf32, #tpu.memory_space<any>> -> memref<1x128xf32, #tpu.memory_space<any>>
      %689 = tpu.memref_squeeze %688 : memref<1x128xf32, #tpu.memory_space<any>> -> memref<128xf32, #tpu.memory_space<any>>
      %c0_i32_407 = arith.constant 0 : i32
      %690 = tpu.memref_slice %arg4[%539, %c13_i32_405, %c0_i32_407] : memref<2x32x128xf32, #tpu.memory_space<vmem>> -> memref<1x1x128xf32, #tpu.memory_space<vmem>>
      %691 = tpu.memref_squeeze %690 : memref<1x1x128xf32, #tpu.memory_space<vmem>> -> memref<128xf32, #tpu.memory_space<vmem>>
      %692 = tpu.memref_slice %arg5[%539] : memref<2x!tpu.dma_semaphore, #tpu.memory_space<semaphore_mem>> -> memref<1x!tpu.dma_semaphore, #tpu.memory_space<semaphore_mem>>
      %693 = tpu.memref_squeeze %692 : memref<1x!tpu.dma_semaphore, #tpu.memory_space<semaphore_mem>> -> memref<!tpu.dma_semaphore, #tpu.memory_space<semaphore_mem>>
      tpu.enqueue_dma source(%689 : memref<128xf32, #tpu.memory_space<any>>) target(%691 : memref<128xf32, #tpu.memory_space<vmem>>) target_semaphore(%693 : memref<!tpu.dma_semaphore, #tpu.memory_space<semaphore_mem>>)
      %c32_i32_408 = arith.constant 32 : i32
      %694 = arith.muli %538, %c32_i32_408 : i32
      %695 = arith.addi %0, %694 : i32
      %c14_i32_409 = arith.constant 14 : i32
      %696 = arith.addi %695, %c14_i32_409 : i32
      %697 = arith.index_cast %696 : i32 to index
      %698 = memref.load %arg1[%697] : memref<32xi32, #tpu.memory_space<smem>>
      %c14_i32_410 = arith.constant 14 : i32
      %c0_i32_411 = arith.constant 0 : i32
      %699 = tpu.memref_slice %arg2[%698, %c0_i32_411] : memref<32x128xf32, #tpu.memory_space<any>> -> memref<1x128xf32, #tpu.memory_space<any>>
      %700 = tpu.memref_squeeze %699 : memref<1x128xf32, #tpu.memory_space<any>> -> memref<128xf32, #tpu.memory_space<any>>
      %c0_i32_412 = arith.constant 0 : i32
      %701 = tpu.memref_slice %arg4[%539, %c14_i32_410, %c0_i32_412] : memref<2x32x128xf32, #tpu.memory_space<vmem>> -> memref<1x1x128xf32, #tpu.memory_space<vmem>>
      %702 = tpu.memref_squeeze %701 : memref<1x1x128xf32, #tpu.memory_space<vmem>> -> memref<128xf32, #tpu.memory_space<vmem>>
      %703 = tpu.memref_slice %arg5[%539] : memref<2x!tpu.dma_semaphore, #tpu.memory_space<semaphore_mem>> -> memref<1x!tpu.dma_semaphore, #tpu.memory_space<semaphore_mem>>
      %704 = tpu.memref_squeeze %703 : memref<1x!tpu.dma_semaphore, #tpu.memory_space<semaphore_mem>> -> memref<!tpu.dma_semaphore, #tpu.memory_space<semaphore_mem>>
      tpu.enqueue_dma source(%700 : memref<128xf32, #tpu.memory_space<any>>) target(%702 : memref<128xf32, #tpu.memory_space<vmem>>) target_semaphore(%704 : memref<!tpu.dma_semaphore, #tpu.memory_space<semaphore_mem>>)
      %c32_i32_413 = arith.constant 32 : i32
      %705 = arith.muli %538, %c32_i32_413 : i32
      %706 = arith.addi %0, %705 : i32
      %c15_i32_414 = arith.constant 15 : i32
      %707 = arith.addi %706, %c15_i32_414 : i32
      %708 = arith.index_cast %707 : i32 to index
      %709 = memref.load %arg1[%708] : memref<32xi32, #tpu.memory_space<smem>>
      %c15_i32_415 = arith.constant 15 : i32
      %c0_i32_416 = arith.constant 0 : i32
      %710 = tpu.memref_slice %arg2[%709, %c0_i32_416] : memref<32x128xf32, #tpu.memory_space<any>> -> memref<1x128xf32, #tpu.memory_space<any>>
      %711 = tpu.memref_squeeze %710 : memref<1x128xf32, #tpu.memory_space<any>> -> memref<128xf32, #tpu.memory_space<any>>
      %c0_i32_417 = arith.constant 0 : i32
      %712 = tpu.memref_slice %arg4[%539, %c15_i32_415, %c0_i32_417] : memref<2x32x128xf32, #tpu.memory_space<vmem>> -> memref<1x1x128xf32, #tpu.memory_space<vmem>>
      %713 = tpu.memref_squeeze %712 : memref<1x1x128xf32, #tpu.memory_space<vmem>> -> memref<128xf32, #tpu.memory_space<vmem>>
      %714 = tpu.memref_slice %arg5[%539] : memref<2x!tpu.dma_semaphore, #tpu.memory_space<semaphore_mem>> -> memref<1x!tpu.dma_semaphore, #tpu.memory_space<semaphore_mem>>
      %715 = tpu.memref_squeeze %714 : memref<1x!tpu.dma_semaphore, #tpu.memory_space<semaphore_mem>> -> memref<!tpu.dma_semaphore, #tpu.memory_space<semaphore_mem>>
      tpu.enqueue_dma source(%711 : memref<128xf32, #tpu.memory_space<any>>) target(%713 : memref<128xf32, #tpu.memory_space<vmem>>) target_semaphore(%715 : memref<!tpu.dma_semaphore, #tpu.memory_space<semaphore_mem>>)
      %c32_i32_418 = arith.constant 32 : i32
      %716 = arith.muli %538, %c32_i32_418 : i32
      %717 = arith.addi %0, %716 : i32
      %c16_i32_419 = arith.constant 16 : i32
      %718 = arith.addi %717, %c16_i32_419 : i32
      %719 = arith.index_cast %718 : i32 to index
      %720 = memref.load %arg1[%719] : memref<32xi32, #tpu.memory_space<smem>>
      %c16_i32_420 = arith.constant 16 : i32
      %c0_i32_421 = arith.constant 0 : i32
      %721 = tpu.memref_slice %arg2[%720, %c0_i32_421] : memref<32x128xf32, #tpu.memory_space<any>> -> memref<1x128xf32, #tpu.memory_space<any>>
      %722 = tpu.memref_squeeze %721 : memref<1x128xf32, #tpu.memory_space<any>> -> memref<128xf32, #tpu.memory_space<any>>
      %c0_i32_422 = arith.constant 0 : i32
      %723 = tpu.memref_slice %arg4[%539, %c16_i32_420, %c0_i32_422] : memref<2x32x128xf32, #tpu.memory_space<vmem>> -> memref<1x1x128xf32, #tpu.memory_space<vmem>>
      %724 = tpu.memref_squeeze %723 : memref<1x1x128xf32, #tpu.memory_space<vmem>> -> memref<128xf32, #tpu.memory_space<vmem>>
      %725 = tpu.memref_slice %arg5[%539] : memref<2x!tpu.dma_semaphore, #tpu.memory_space<semaphore_mem>> -> memref<1x!tpu.dma_semaphore, #tpu.memory_space<semaphore_mem>>
      %726 = tpu.memref_squeeze %725 : memref<1x!tpu.dma_semaphore, #tpu.memory_space<semaphore_mem>> -> memref<!tpu.dma_semaphore, #tpu.memory_space<semaphore_mem>>
      tpu.enqueue_dma source(%722 : memref<128xf32, #tpu.memory_space<any>>) target(%724 : memref<128xf32, #tpu.memory_space<vmem>>) target_semaphore(%726 : memref<!tpu.dma_semaphore, #tpu.memory_space<semaphore_mem>>)
      %c32_i32_423 = arith.constant 32 : i32
      %727 = arith.muli %538, %c32_i32_423 : i32
      %728 = arith.addi %0, %727 : i32
      %c17_i32_424 = arith.constant 17 : i32
      %729 = arith.addi %728, %c17_i32_424 : i32
      %730 = arith.index_cast %729 : i32 to index
      %731 = memref.load %arg1[%730] : memref<32xi32, #tpu.memory_space<smem>>
      %c17_i32_425 = arith.constant 17 : i32
      %c0_i32_426 = arith.constant 0 : i32
      %732 = tpu.memref_slice %arg2[%731, %c0_i32_426] : memref<32x128xf32, #tpu.memory_space<any>> -> memref<1x128xf32, #tpu.memory_space<any>>
      %733 = tpu.memref_squeeze %732 : memref<1x128xf32, #tpu.memory_space<any>> -> memref<128xf32, #tpu.memory_space<any>>
      %c0_i32_427 = arith.constant 0 : i32
      %734 = tpu.memref_slice %arg4[%539, %c17_i32_425, %c0_i32_427] : memref<2x32x128xf32, #tpu.memory_space<vmem>> -> memref<1x1x128xf32, #tpu.memory_space<vmem>>
      %735 = tpu.memref_squeeze %734 : memref<1x1x128xf32, #tpu.memory_space<vmem>> -> memref<128xf32, #tpu.memory_space<vmem>>
      %736 = tpu.memref_slice %arg5[%539] : memref<2x!tpu.dma_semaphore, #tpu.memory_space<semaphore_mem>> -> memref<1x!tpu.dma_semaphore, #tpu.memory_space<semaphore_mem>>
      %737 = tpu.memref_squeeze %736 : memref<1x!tpu.dma_semaphore, #tpu.memory_space<semaphore_mem>> -> memref<!tpu.dma_semaphore, #tpu.memory_space<semaphore_mem>>
      tpu.enqueue_dma source(%733 : memref<128xf32, #tpu.memory_space<any>>) target(%735 : memref<128xf32, #tpu.memory_space<vmem>>) target_semaphore(%737 : memref<!tpu.dma_semaphore, #tpu.memory_space<semaphore_mem>>)
      %c32_i32_428 = arith.constant 32 : i32
      %738 = arith.muli %538, %c32_i32_428 : i32
      %739 = arith.addi %0, %738 : i32
      %c18_i32_429 = arith.constant 18 : i32
      %740 = arith.addi %739, %c18_i32_429 : i32
      %741 = arith.index_cast %740 : i32 to index
      %742 = memref.load %arg1[%741] : memref<32xi32, #tpu.memory_space<smem>>
      %c18_i32_430 = arith.constant 18 : i32
      %c0_i32_431 = arith.constant 0 : i32
      %743 = tpu.memref_slice %arg2[%742, %c0_i32_431] : memref<32x128xf32, #tpu.memory_space<any>> -> memref<1x128xf32, #tpu.memory_space<any>>
      %744 = tpu.memref_squeeze %743 : memref<1x128xf32, #tpu.memory_space<any>> -> memref<128xf32, #tpu.memory_space<any>>
      %c0_i32_432 = arith.constant 0 : i32
      %745 = tpu.memref_slice %arg4[%539, %c18_i32_430, %c0_i32_432] : memref<2x32x128xf32, #tpu.memory_space<vmem>> -> memref<1x1x128xf32, #tpu.memory_space<vmem>>
      %746 = tpu.memref_squeeze %745 : memref<1x1x128xf32, #tpu.memory_space<vmem>> -> memref<128xf32, #tpu.memory_space<vmem>>
      %747 = tpu.memref_slice %arg5[%539] : memref<2x!tpu.dma_semaphore, #tpu.memory_space<semaphore_mem>> -> memref<1x!tpu.dma_semaphore, #tpu.memory_space<semaphore_mem>>
      %748 = tpu.memref_squeeze %747 : memref<1x!tpu.dma_semaphore, #tpu.memory_space<semaphore_mem>> -> memref<!tpu.dma_semaphore, #tpu.memory_space<semaphore_mem>>
      tpu.enqueue_dma source(%744 : memref<128xf32, #tpu.memory_space<any>>) target(%746 : memref<128xf32, #tpu.memory_space<vmem>>) target_semaphore(%748 : memref<!tpu.dma_semaphore, #tpu.memory_space<semaphore_mem>>)
      %c32_i32_433 = arith.constant 32 : i32
      %749 = arith.muli %538, %c32_i32_433 : i32
      %750 = arith.addi %0, %749 : i32
      %c19_i32_434 = arith.constant 19 : i32
      %751 = arith.addi %750, %c19_i32_434 : i32
      %752 = arith.index_cast %751 : i32 to index
      %753 = memref.load %arg1[%752] : memref<32xi32, #tpu.memory_space<smem>>
      %c19_i32_435 = arith.constant 19 : i32
      %c0_i32_436 = arith.constant 0 : i32
      %754 = tpu.memref_slice %arg2[%753, %c0_i32_436] : memref<32x128xf32, #tpu.memory_space<any>> -> memref<1x128xf32, #tpu.memory_space<any>>
      %755 = tpu.memref_squeeze %754 : memref<1x128xf32, #tpu.memory_space<any>> -> memref<128xf32, #tpu.memory_space<any>>
      %c0_i32_437 = arith.constant 0 : i32
      %756 = tpu.memref_slice %arg4[%539, %c19_i32_435, %c0_i32_437] : memref<2x32x128xf32, #tpu.memory_space<vmem>> -> memref<1x1x128xf32, #tpu.memory_space<vmem>>
      %757 = tpu.memref_squeeze %756 : memref<1x1x128xf32, #tpu.memory_space<vmem>> -> memref<128xf32, #tpu.memory_space<vmem>>
      %758 = tpu.memref_slice %arg5[%539] : memref<2x!tpu.dma_semaphore, #tpu.memory_space<semaphore_mem>> -> memref<1x!tpu.dma_semaphore, #tpu.memory_space<semaphore_mem>>
      %759 = tpu.memref_squeeze %758 : memref<1x!tpu.dma_semaphore, #tpu.memory_space<semaphore_mem>> -> memref<!tpu.dma_semaphore, #tpu.memory_space<semaphore_mem>>
      tpu.enqueue_dma source(%755 : memref<128xf32, #tpu.memory_space<any>>) target(%757 : memref<128xf32, #tpu.memory_space<vmem>>) target_semaphore(%759 : memref<!tpu.dma_semaphore, #tpu.memory_space<semaphore_mem>>)
      %c32_i32_438 = arith.constant 32 : i32
      %760 = arith.muli %538, %c32_i32_438 : i32
      %761 = arith.addi %0, %760 : i32
      %c20_i32_439 = arith.constant 20 : i32
      %762 = arith.addi %761, %c20_i32_439 : i32
      %763 = arith.index_cast %762 : i32 to index
      %764 = memref.load %arg1[%763] : memref<32xi32, #tpu.memory_space<smem>>
      %c20_i32_440 = arith.constant 20 : i32
      %c0_i32_441 = arith.constant 0 : i32
      %765 = tpu.memref_slice %arg2[%764, %c0_i32_441] : memref<32x128xf32, #tpu.memory_space<any>> -> memref<1x128xf32, #tpu.memory_space<any>>
      %766 = tpu.memref_squeeze %765 : memref<1x128xf32, #tpu.memory_space<any>> -> memref<128xf32, #tpu.memory_space<any>>
      %c0_i32_442 = arith.constant 0 : i32
      %767 = tpu.memref_slice %arg4[%539, %c20_i32_440, %c0_i32_442] : memref<2x32x128xf32, #tpu.memory_space<vmem>> -> memref<1x1x128xf32, #tpu.memory_space<vmem>>
      %768 = tpu.memref_squeeze %767 : memref<1x1x128xf32, #tpu.memory_space<vmem>> -> memref<128xf32, #tpu.memory_space<vmem>>
      %769 = tpu.memref_slice %arg5[%539] : memref<2x!tpu.dma_semaphore, #tpu.memory_space<semaphore_mem>> -> memref<1x!tpu.dma_semaphore, #tpu.memory_space<semaphore_mem>>
      %770 = tpu.memref_squeeze %769 : memref<1x!tpu.dma_semaphore, #tpu.memory_space<semaphore_mem>> -> memref<!tpu.dma_semaphore, #tpu.memory_space<semaphore_mem>>
      tpu.enqueue_dma source(%766 : memref<128xf32, #tpu.memory_space<any>>) target(%768 : memref<128xf32, #tpu.memory_space<vmem>>) target_semaphore(%770 : memref<!tpu.dma_semaphore, #tpu.memory_space<semaphore_mem>>)
      %c32_i32_443 = arith.constant 32 : i32
      %771 = arith.muli %538, %c32_i32_443 : i32
      %772 = arith.addi %0, %771 : i32
      %c21_i32_444 = arith.constant 21 : i32
      %773 = arith.addi %772, %c21_i32_444 : i32
      %774 = arith.index_cast %773 : i32 to index
      %775 = memref.load %arg1[%774] : memref<32xi32, #tpu.memory_space<smem>>
      %c21_i32_445 = arith.constant 21 : i32
      %c0_i32_446 = arith.constant 0 : i32
      %776 = tpu.memref_slice %arg2[%775, %c0_i32_446] : memref<32x128xf32, #tpu.memory_space<any>> -> memref<1x128xf32, #tpu.memory_space<any>>
      %777 = tpu.memref_squeeze %776 : memref<1x128xf32, #tpu.memory_space<any>> -> memref<128xf32, #tpu.memory_space<any>>
      %c0_i32_447 = arith.constant 0 : i32
      %778 = tpu.memref_slice %arg4[%539, %c21_i32_445, %c0_i32_447] : memref<2x32x128xf32, #tpu.memory_space<vmem>> -> memref<1x1x128xf32, #tpu.memory_space<vmem>>
      %779 = tpu.memref_squeeze %778 : memref<1x1x128xf32, #tpu.memory_space<vmem>> -> memref<128xf32, #tpu.memory_space<vmem>>
      %780 = tpu.memref_slice %arg5[%539] : memref<2x!tpu.dma_semaphore, #tpu.memory_space<semaphore_mem>> -> memref<1x!tpu.dma_semaphore, #tpu.memory_space<semaphore_mem>>
      %781 = tpu.memref_squeeze %780 : memref<1x!tpu.dma_semaphore, #tpu.memory_space<semaphore_mem>> -> memref<!tpu.dma_semaphore, #tpu.memory_space<semaphore_mem>>
      tpu.enqueue_dma source(%777 : memref<128xf32, #tpu.memory_space<any>>) target(%779 : memref<128xf32, #tpu.memory_space<vmem>>) target_semaphore(%781 : memref<!tpu.dma_semaphore, #tpu.memory_space<semaphore_mem>>)
      %c32_i32_448 = arith.constant 32 : i32
      %782 = arith.muli %538, %c32_i32_448 : i32
      %783 = arith.addi %0, %782 : i32
      %c22_i32_449 = arith.constant 22 : i32
      %784 = arith.addi %783, %c22_i32_449 : i32
      %785 = arith.index_cast %784 : i32 to index
      %786 = memref.load %arg1[%785] : memref<32xi32, #tpu.memory_space<smem>>
      %c22_i32_450 = arith.constant 22 : i32
      %c0_i32_451 = arith.constant 0 : i32
      %787 = tpu.memref_slice %arg2[%786, %c0_i32_451] : memref<32x128xf32, #tpu.memory_space<any>> -> memref<1x128xf32, #tpu.memory_space<any>>
      %788 = tpu.memref_squeeze %787 : memref<1x128xf32, #tpu.memory_space<any>> -> memref<128xf32, #tpu.memory_space<any>>
      %c0_i32_452 = arith.constant 0 : i32
      %789 = tpu.memref_slice %arg4[%539, %c22_i32_450, %c0_i32_452] : memref<2x32x128xf32, #tpu.memory_space<vmem>> -> memref<1x1x128xf32, #tpu.memory_space<vmem>>
      %790 = tpu.memref_squeeze %789 : memref<1x1x128xf32, #tpu.memory_space<vmem>> -> memref<128xf32, #tpu.memory_space<vmem>>
      %791 = tpu.memref_slice %arg5[%539] : memref<2x!tpu.dma_semaphore, #tpu.memory_space<semaphore_mem>> -> memref<1x!tpu.dma_semaphore, #tpu.memory_space<semaphore_mem>>
      %792 = tpu.memref_squeeze %791 : memref<1x!tpu.dma_semaphore, #tpu.memory_space<semaphore_mem>> -> memref<!tpu.dma_semaphore, #tpu.memory_space<semaphore_mem>>
      tpu.enqueue_dma source(%788 : memref<128xf32, #tpu.memory_space<any>>) target(%790 : memref<128xf32, #tpu.memory_space<vmem>>) target_semaphore(%792 : memref<!tpu.dma_semaphore, #tpu.memory_space<semaphore_mem>>)
      %c32_i32_453 = arith.constant 32 : i32
      %793 = arith.muli %538, %c32_i32_453 : i32
      %794 = arith.addi %0, %793 : i32
      %c23_i32_454 = arith.constant 23 : i32
      %795 = arith.addi %794, %c23_i32_454 : i32
      %796 = arith.index_cast %795 : i32 to index
      %797 = memref.load %arg1[%796] : memref<32xi32, #tpu.memory_space<smem>>
      %c23_i32_455 = arith.constant 23 : i32
      %c0_i32_456 = arith.constant 0 : i32
      %798 = tpu.memref_slice %arg2[%797, %c0_i32_456] : memref<32x128xf32, #tpu.memory_space<any>> -> memref<1x128xf32, #tpu.memory_space<any>>
      %799 = tpu.memref_squeeze %798 : memref<1x128xf32, #tpu.memory_space<any>> -> memref<128xf32, #tpu.memory_space<any>>
      %c0_i32_457 = arith.constant 0 : i32
      %800 = tpu.memref_slice %arg4[%539, %c23_i32_455, %c0_i32_457] : memref<2x32x128xf32, #tpu.memory_space<vmem>> -> memref<1x1x128xf32, #tpu.memory_space<vmem>>
      %801 = tpu.memref_squeeze %800 : memref<1x1x128xf32, #tpu.memory_space<vmem>> -> memref<128xf32, #tpu.memory_space<vmem>>
      %802 = tpu.memref_slice %arg5[%539] : memref<2x!tpu.dma_semaphore, #tpu.memory_space<semaphore_mem>> -> memref<1x!tpu.dma_semaphore, #tpu.memory_space<semaphore_mem>>
      %803 = tpu.memref_squeeze %802 : memref<1x!tpu.dma_semaphore, #tpu.memory_space<semaphore_mem>> -> memref<!tpu.dma_semaphore, #tpu.memory_space<semaphore_mem>>
      tpu.enqueue_dma source(%799 : memref<128xf32, #tpu.memory_space<any>>) target(%801 : memref<128xf32, #tpu.memory_space<vmem>>) target_semaphore(%803 : memref<!tpu.dma_semaphore, #tpu.memory_space<semaphore_mem>>)
      %c32_i32_458 = arith.constant 32 : i32
      %804 = arith.muli %538, %c32_i32_458 : i32
      %805 = arith.addi %0, %804 : i32
      %c24_i32_459 = arith.constant 24 : i32
      %806 = arith.addi %805, %c24_i32_459 : i32
      %807 = arith.index_cast %806 : i32 to index
      %808 = memref.load %arg1[%807] : memref<32xi32, #tpu.memory_space<smem>>
      %c24_i32_460 = arith.constant 24 : i32
      %c0_i32_461 = arith.constant 0 : i32
      %809 = tpu.memref_slice %arg2[%808, %c0_i32_461] : memref<32x128xf32, #tpu.memory_space<any>> -> memref<1x128xf32, #tpu.memory_space<any>>
      %810 = tpu.memref_squeeze %809 : memref<1x128xf32, #tpu.memory_space<any>> -> memref<128xf32, #tpu.memory_space<any>>
      %c0_i32_462 = arith.constant 0 : i32
      %811 = tpu.memref_slice %arg4[%539, %c24_i32_460, %c0_i32_462] : memref<2x32x128xf32, #tpu.memory_space<vmem>> -> memref<1x1x128xf32, #tpu.memory_space<vmem>>
      %812 = tpu.memref_squeeze %811 : memref<1x1x128xf32, #tpu.memory_space<vmem>> -> memref<128xf32, #tpu.memory_space<vmem>>
      %813 = tpu.memref_slice %arg5[%539] : memref<2x!tpu.dma_semaphore, #tpu.memory_space<semaphore_mem>> -> memref<1x!tpu.dma_semaphore, #tpu.memory_space<semaphore_mem>>
      %814 = tpu.memref_squeeze %813 : memref<1x!tpu.dma_semaphore, #tpu.memory_space<semaphore_mem>> -> memref<!tpu.dma_semaphore, #tpu.memory_space<semaphore_mem>>
      tpu.enqueue_dma source(%810 : memref<128xf32, #tpu.memory_space<any>>) target(%812 : memref<128xf32, #tpu.memory_space<vmem>>) target_semaphore(%814 : memref<!tpu.dma_semaphore, #tpu.memory_space<semaphore_mem>>)
      %c32_i32_463 = arith.constant 32 : i32
      %815 = arith.muli %538, %c32_i32_463 : i32
      %816 = arith.addi %0, %815 : i32
      %c25_i32_464 = arith.constant 25 : i32
      %817 = arith.addi %816, %c25_i32_464 : i32
      %818 = arith.index_cast %817 : i32 to index
      %819 = memref.load %arg1[%818] : memref<32xi32, #tpu.memory_space<smem>>
      %c25_i32_465 = arith.constant 25 : i32
      %c0_i32_466 = arith.constant 0 : i32
      %820 = tpu.memref_slice %arg2[%819, %c0_i32_466] : memref<32x128xf32, #tpu.memory_space<any>> -> memref<1x128xf32, #tpu.memory_space<any>>
      %821 = tpu.memref_squeeze %820 : memref<1x128xf32, #tpu.memory_space<any>> -> memref<128xf32, #tpu.memory_space<any>>
      %c0_i32_467 = arith.constant 0 : i32
      %822 = tpu.memref_slice %arg4[%539, %c25_i32_465, %c0_i32_467] : memref<2x32x128xf32, #tpu.memory_space<vmem>> -> memref<1x1x128xf32, #tpu.memory_space<vmem>>
      %823 = tpu.memref_squeeze %822 : memref<1x1x128xf32, #tpu.memory_space<vmem>> -> memref<128xf32, #tpu.memory_space<vmem>>
      %824 = tpu.memref_slice %arg5[%539] : memref<2x!tpu.dma_semaphore, #tpu.memory_space<semaphore_mem>> -> memref<1x!tpu.dma_semaphore, #tpu.memory_space<semaphore_mem>>
      %825 = tpu.memref_squeeze %824 : memref<1x!tpu.dma_semaphore, #tpu.memory_space<semaphore_mem>> -> memref<!tpu.dma_semaphore, #tpu.memory_space<semaphore_mem>>
      tpu.enqueue_dma source(%821 : memref<128xf32, #tpu.memory_space<any>>) target(%823 : memref<128xf32, #tpu.memory_space<vmem>>) target_semaphore(%825 : memref<!tpu.dma_semaphore, #tpu.memory_space<semaphore_mem>>)
      %c32_i32_468 = arith.constant 32 : i32
      %826 = arith.muli %538, %c32_i32_468 : i32
      %827 = arith.addi %0, %826 : i32
      %c26_i32_469 = arith.constant 26 : i32
      %828 = arith.addi %827, %c26_i32_469 : i32
      %829 = arith.index_cast %828 : i32 to index
      %830 = memref.load %arg1[%829] : memref<32xi32, #tpu.memory_space<smem>>
      %c26_i32_470 = arith.constant 26 : i32
      %c0_i32_471 = arith.constant 0 : i32
      %831 = tpu.memref_slice %arg2[%830, %c0_i32_471] : memref<32x128xf32, #tpu.memory_space<any>> -> memref<1x128xf32, #tpu.memory_space<any>>
      %832 = tpu.memref_squeeze %831 : memref<1x128xf32, #tpu.memory_space<any>> -> memref<128xf32, #tpu.memory_space<any>>
      %c0_i32_472 = arith.constant 0 : i32
      %833 = tpu.memref_slice %arg4[%539, %c26_i32_470, %c0_i32_472] : memref<2x32x128xf32, #tpu.memory_space<vmem>> -> memref<1x1x128xf32, #tpu.memory_space<vmem>>
      %834 = tpu.memref_squeeze %833 : memref<1x1x128xf32, #tpu.memory_space<vmem>> -> memref<128xf32, #tpu.memory_space<vmem>>
      %835 = tpu.memref_slice %arg5[%539] : memref<2x!tpu.dma_semaphore, #tpu.memory_space<semaphore_mem>> -> memref<1x!tpu.dma_semaphore, #tpu.memory_space<semaphore_mem>>
      %836 = tpu.memref_squeeze %835 : memref<1x!tpu.dma_semaphore, #tpu.memory_space<semaphore_mem>> -> memref<!tpu.dma_semaphore, #tpu.memory_space<semaphore_mem>>
      tpu.enqueue_dma source(%832 : memref<128xf32, #tpu.memory_space<any>>) target(%834 : memref<128xf32, #tpu.memory_space<vmem>>) target_semaphore(%836 : memref<!tpu.dma_semaphore, #tpu.memory_space<semaphore_mem>>)
      %c32_i32_473 = arith.constant 32 : i32
      %837 = arith.muli %538, %c32_i32_473 : i32
      %838 = arith.addi %0, %837 : i32
      %c27_i32_474 = arith.constant 27 : i32
      %839 = arith.addi %838, %c27_i32_474 : i32
      %840 = arith.index_cast %839 : i32 to index
      %841 = memref.load %arg1[%840] : memref<32xi32, #tpu.memory_space<smem>>
      %c27_i32_475 = arith.constant 27 : i32
      %c0_i32_476 = arith.constant 0 : i32
      %842 = tpu.memref_slice %arg2[%841, %c0_i32_476] : memref<32x128xf32, #tpu.memory_space<any>> -> memref<1x128xf32, #tpu.memory_space<any>>
      %843 = tpu.memref_squeeze %842 : memref<1x128xf32, #tpu.memory_space<any>> -> memref<128xf32, #tpu.memory_space<any>>
      %c0_i32_477 = arith.constant 0 : i32
      %844 = tpu.memref_slice %arg4[%539, %c27_i32_475, %c0_i32_477] : memref<2x32x128xf32, #tpu.memory_space<vmem>> -> memref<1x1x128xf32, #tpu.memory_space<vmem>>
      %845 = tpu.memref_squeeze %844 : memref<1x1x128xf32, #tpu.memory_space<vmem>> -> memref<128xf32, #tpu.memory_space<vmem>>
      %846 = tpu.memref_slice %arg5[%539] : memref<2x!tpu.dma_semaphore, #tpu.memory_space<semaphore_mem>> -> memref<1x!tpu.dma_semaphore, #tpu.memory_space<semaphore_mem>>
      %847 = tpu.memref_squeeze %846 : memref<1x!tpu.dma_semaphore, #tpu.memory_space<semaphore_mem>> -> memref<!tpu.dma_semaphore, #tpu.memory_space<semaphore_mem>>
      tpu.enqueue_dma source(%843 : memref<128xf32, #tpu.memory_space<any>>) target(%845 : memref<128xf32, #tpu.memory_space<vmem>>) target_semaphore(%847 : memref<!tpu.dma_semaphore, #tpu.memory_space<semaphore_mem>>)
      %c32_i32_478 = arith.constant 32 : i32
      %848 = arith.muli %538, %c32_i32_478 : i32
      %849 = arith.addi %0, %848 : i32
      %c28_i32_479 = arith.constant 28 : i32
      %850 = arith.addi %849, %c28_i32_479 : i32
      %851 = arith.index_cast %850 : i32 to index
      %852 = memref.load %arg1[%851] : memref<32xi32, #tpu.memory_space<smem>>
      %c28_i32_480 = arith.constant 28 : i32
      %c0_i32_481 = arith.constant 0 : i32
      %853 = tpu.memref_slice %arg2[%852, %c0_i32_481] : memref<32x128xf32, #tpu.memory_space<any>> -> memref<1x128xf32, #tpu.memory_space<any>>
      %854 = tpu.memref_squeeze %853 : memref<1x128xf32, #tpu.memory_space<any>> -> memref<128xf32, #tpu.memory_space<any>>
      %c0_i32_482 = arith.constant 0 : i32
      %855 = tpu.memref_slice %arg4[%539, %c28_i32_480, %c0_i32_482] : memref<2x32x128xf32, #tpu.memory_space<vmem>> -> memref<1x1x128xf32, #tpu.memory_space<vmem>>
      %856 = tpu.memref_squeeze %855 : memref<1x1x128xf32, #tpu.memory_space<vmem>> -> memref<128xf32, #tpu.memory_space<vmem>>
      %857 = tpu.memref_slice %arg5[%539] : memref<2x!tpu.dma_semaphore, #tpu.memory_space<semaphore_mem>> -> memref<1x!tpu.dma_semaphore, #tpu.memory_space<semaphore_mem>>
      %858 = tpu.memref_squeeze %857 : memref<1x!tpu.dma_semaphore, #tpu.memory_space<semaphore_mem>> -> memref<!tpu.dma_semaphore, #tpu.memory_space<semaphore_mem>>
      tpu.enqueue_dma source(%854 : memref<128xf32, #tpu.memory_space<any>>) target(%856 : memref<128xf32, #tpu.memory_space<vmem>>) target_semaphore(%858 : memref<!tpu.dma_semaphore, #tpu.memory_space<semaphore_mem>>)
      %c32_i32_483 = arith.constant 32 : i32
      %859 = arith.muli %538, %c32_i32_483 : i32
      %860 = arith.addi %0, %859 : i32
      %c29_i32_484 = arith.constant 29 : i32
      %861 = arith.addi %860, %c29_i32_484 : i32
      %862 = arith.index_cast %861 : i32 to index
      %863 = memref.load %arg1[%862] : memref<32xi32, #tpu.memory_space<smem>>
      %c29_i32_485 = arith.constant 29 : i32
      %c0_i32_486 = arith.constant 0 : i32
      %864 = tpu.memref_slice %arg2[%863, %c0_i32_486] : memref<32x128xf32, #tpu.memory_space<any>> -> memref<1x128xf32, #tpu.memory_space<any>>
      %865 = tpu.memref_squeeze %864 : memref<1x128xf32, #tpu.memory_space<any>> -> memref<128xf32, #tpu.memory_space<any>>
      %c0_i32_487 = arith.constant 0 : i32
      %866 = tpu.memref_slice %arg4[%539, %c29_i32_485, %c0_i32_487] : memref<2x32x128xf32, #tpu.memory_space<vmem>> -> memref<1x1x128xf32, #tpu.memory_space<vmem>>
      %867 = tpu.memref_squeeze %866 : memref<1x1x128xf32, #tpu.memory_space<vmem>> -> memref<128xf32, #tpu.memory_space<vmem>>
      %868 = tpu.memref_slice %arg5[%539] : memref<2x!tpu.dma_semaphore, #tpu.memory_space<semaphore_mem>> -> memref<1x!tpu.dma_semaphore, #tpu.memory_space<semaphore_mem>>
      %869 = tpu.memref_squeeze %868 : memref<1x!tpu.dma_semaphore, #tpu.memory_space<semaphore_mem>> -> memref<!tpu.dma_semaphore, #tpu.memory_space<semaphore_mem>>
      tpu.enqueue_dma source(%865 : memref<128xf32, #tpu.memory_space<any>>) target(%867 : memref<128xf32, #tpu.memory_space<vmem>>) target_semaphore(%869 : memref<!tpu.dma_semaphore, #tpu.memory_space<semaphore_mem>>)
      %c32_i32_488 = arith.constant 32 : i32
      %870 = arith.muli %538, %c32_i32_488 : i32
      %871 = arith.addi %0, %870 : i32
      %c30_i32_489 = arith.constant 30 : i32
      %872 = arith.addi %871, %c30_i32_489 : i32
      %873 = arith.index_cast %872 : i32 to index
      %874 = memref.load %arg1[%873] : memref<32xi32, #tpu.memory_space<smem>>
      %c30_i32_490 = arith.constant 30 : i32
      %c0_i32_491 = arith.constant 0 : i32
      %875 = tpu.memref_slice %arg2[%874, %c0_i32_491] : memref<32x128xf32, #tpu.memory_space<any>> -> memref<1x128xf32, #tpu.memory_space<any>>
      %876 = tpu.memref_squeeze %875 : memref<1x128xf32, #tpu.memory_space<any>> -> memref<128xf32, #tpu.memory_space<any>>
      %c0_i32_492 = arith.constant 0 : i32
      %877 = tpu.memref_slice %arg4[%539, %c30_i32_490, %c0_i32_492] : memref<2x32x128xf32, #tpu.memory_space<vmem>> -> memref<1x1x128xf32, #tpu.memory_space<vmem>>
      %878 = tpu.memref_squeeze %877 : memref<1x1x128xf32, #tpu.memory_space<vmem>> -> memref<128xf32, #tpu.memory_space<vmem>>
      %879 = tpu.memref_slice %arg5[%539] : memref<2x!tpu.dma_semaphore, #tpu.memory_space<semaphore_mem>> -> memref<1x!tpu.dma_semaphore, #tpu.memory_space<semaphore_mem>>
      %880 = tpu.memref_squeeze %879 : memref<1x!tpu.dma_semaphore, #tpu.memory_space<semaphore_mem>> -> memref<!tpu.dma_semaphore, #tpu.memory_space<semaphore_mem>>
      tpu.enqueue_dma source(%876 : memref<128xf32, #tpu.memory_space<any>>) target(%878 : memref<128xf32, #tpu.memory_space<vmem>>) target_semaphore(%880 : memref<!tpu.dma_semaphore, #tpu.memory_space<semaphore_mem>>)
      %c32_i32_493 = arith.constant 32 : i32
      %881 = arith.muli %538, %c32_i32_493 : i32
      %882 = arith.addi %0, %881 : i32
      %c31_i32_494 = arith.constant 31 : i32
      %883 = arith.addi %882, %c31_i32_494 : i32
      %884 = arith.index_cast %883 : i32 to index
      %885 = memref.load %arg1[%884] : memref<32xi32, #tpu.memory_space<smem>>
      %c31_i32_495 = arith.constant 31 : i32
      %c0_i32_496 = arith.constant 0 : i32
      %886 = tpu.memref_slice %arg2[%885, %c0_i32_496] : memref<32x128xf32, #tpu.memory_space<any>> -> memref<1x128xf32, #tpu.memory_space<any>>
      %887 = tpu.memref_squeeze %886 : memref<1x128xf32, #tpu.memory_space<any>> -> memref<128xf32, #tpu.memory_space<any>>
      %c0_i32_497 = arith.constant 0 : i32
      %888 = tpu.memref_slice %arg4[%539, %c31_i32_495, %c0_i32_497] : memref<2x32x128xf32, #tpu.memory_space<vmem>> -> memref<1x1x128xf32, #tpu.memory_space<vmem>>
      %889 = tpu.memref_squeeze %888 : memref<1x1x128xf32, #tpu.memory_space<vmem>> -> memref<128xf32, #tpu.memory_space<vmem>>
      %890 = tpu.memref_slice %arg5[%539] : memref<2x!tpu.dma_semaphore, #tpu.memory_space<semaphore_mem>> -> memref<1x!tpu.dma_semaphore, #tpu.memory_space<semaphore_mem>>
      %891 = tpu.memref_squeeze %890 : memref<1x!tpu.dma_semaphore, #tpu.memory_space<semaphore_mem>> -> memref<!tpu.dma_semaphore, #tpu.memory_space<semaphore_mem>>
      tpu.enqueue_dma source(%887 : memref<128xf32, #tpu.memory_space<any>>) target(%889 : memref<128xf32, #tpu.memory_space<vmem>>) target_semaphore(%891 : memref<!tpu.dma_semaphore, #tpu.memory_space<semaphore_mem>>)
    } else {
    }
    %c0_i32_204 = arith.constant 0 : i32
    %c0_i32_205 = arith.constant 0 : i32
    %c0_i32_206 = arith.constant 0 : i32
    %337 = tpu.memref_slice %arg2[%c0_i32_204, %c0_i32_206] : memref<32x128xf32, #tpu.memory_space<any>> -> memref<1x128xf32, #tpu.memory_space<any>>
    %338 = tpu.memref_squeeze %337 : memref<1x128xf32, #tpu.memory_space<any>> -> memref<128xf32, #tpu.memory_space<any>>
    %c0_i32_207 = arith.constant 0 : i32
    %339 = tpu.memref_slice %arg4[%332, %c0_i32_205, %c0_i32_207] : memref<2x32x128xf32, #tpu.memory_space<vmem>> -> memref<1x1x128xf32, #tpu.memory_space<vmem>>
    %340 = tpu.memref_squeeze %339 : memref<1x1x128xf32, #tpu.memory_space<vmem>> -> memref<128xf32, #tpu.memory_space<vmem>>
    %341 = tpu.memref_slice %arg5[%332] : memref<2x!tpu.dma_semaphore, #tpu.memory_space<semaphore_mem>> -> memref<1x!tpu.dma_semaphore, #tpu.memory_space<semaphore_mem>>
    %342 = tpu.memref_squeeze %341 : memref<1x!tpu.dma_semaphore, #tpu.memory_space<semaphore_mem>> -> memref<!tpu.dma_semaphore, #tpu.memory_space<semaphore_mem>>
    tpu.wait_dma2 semaphore(%342 : memref<!tpu.dma_semaphore, #tpu.memory_space<semaphore_mem>>) src(%338 : memref<128xf32, #tpu.memory_space<any>>) dst(%340 : memref<128xf32, #tpu.memory_space<vmem>>)
    %c0_i32_208 = arith.constant 0 : i32
    %c1_i32_209 = arith.constant 1 : i32
    %c0_i32_210 = arith.constant 0 : i32
    %343 = tpu.memref_slice %arg2[%c0_i32_208, %c0_i32_210] : memref<32x128xf32, #tpu.memory_space<any>> -> memref<1x128xf32, #tpu.memory_space<any>>
    %344 = tpu.memref_squeeze %343 : memref<1x128xf32, #tpu.memory_space<any>> -> memref<128xf32, #tpu.memory_space<any>>
    %c0_i32_211 = arith.constant 0 : i32
    %345 = tpu.memref_slice %arg4[%332, %c1_i32_209, %c0_i32_211] : memref<2x32x128xf32, #tpu.memory_space<vmem>> -> memref<1x1x128xf32, #tpu.memory_space<vmem>>
    %346 = tpu.memref_squeeze %345 : memref<1x1x128xf32, #tpu.memory_space<vmem>> -> memref<128xf32, #tpu.memory_space<vmem>>
    %347 = tpu.memref_slice %arg5[%332] : memref<2x!tpu.dma_semaphore, #tpu.memory_space<semaphore_mem>> -> memref<1x!tpu.dma_semaphore, #tpu.memory_space<semaphore_mem>>
    %348 = tpu.memref_squeeze %347 : memref<1x!tpu.dma_semaphore, #tpu.memory_space<semaphore_mem>> -> memref<!tpu.dma_semaphore, #tpu.memory_space<semaphore_mem>>
    tpu.wait_dma2 semaphore(%348 : memref<!tpu.dma_semaphore, #tpu.memory_space<semaphore_mem>>) src(%344 : memref<128xf32, #tpu.memory_space<any>>) dst(%346 : memref<128xf32, #tpu.memory_space<vmem>>)
    %c0_i32_212 = arith.constant 0 : i32
    %c2_i32_213 = arith.constant 2 : i32
    %c0_i32_214 = arith.constant 0 : i32
    %349 = tpu.memref_slice %arg2[%c0_i32_212, %c0_i32_214] : memref<32x128xf32, #tpu.memory_space<any>> -> memref<1x128xf32, #tpu.memory_space<any>>
    %350 = tpu.memref_squeeze %349 : memref<1x128xf32, #tpu.memory_space<any>> -> memref<128xf32, #tpu.memory_space<any>>
    %c0_i32_215 = arith.constant 0 : i32
    %351 = tpu.memref_slice %arg4[%332, %c2_i32_213, %c0_i32_215] : memref<2x32x128xf32, #tpu.memory_space<vmem>> -> memref<1x1x128xf32, #tpu.memory_space<vmem>>
    %352 = tpu.memref_squeeze %351 : memref<1x1x128xf32, #tpu.memory_space<vmem>> -> memref<128xf32, #tpu.memory_space<vmem>>
    %353 = tpu.memref_slice %arg5[%332] : memref<2x!tpu.dma_semaphore, #tpu.memory_space<semaphore_mem>> -> memref<1x!tpu.dma_semaphore, #tpu.memory_space<semaphore_mem>>
    %354 = tpu.memref_squeeze %353 : memref<1x!tpu.dma_semaphore, #tpu.memory_space<semaphore_mem>> -> memref<!tpu.dma_semaphore, #tpu.memory_space<semaphore_mem>>
    tpu.wait_dma2 semaphore(%354 : memref<!tpu.dma_semaphore, #tpu.memory_space<semaphore_mem>>) src(%350 : memref<128xf32, #tpu.memory_space<any>>) dst(%352 : memref<128xf32, #tpu.memory_space<vmem>>)
    %c0_i32_216 = arith.constant 0 : i32
    %c3_i32_217 = arith.constant 3 : i32
    %c0_i32_218 = arith.constant 0 : i32
    %355 = tpu.memref_slice %arg2[%c0_i32_216, %c0_i32_218] : memref<32x128xf32, #tpu.memory_space<any>> -> memref<1x128xf32, #tpu.memory_space<any>>
    %356 = tpu.memref_squeeze %355 : memref<1x128xf32, #tpu.memory_space<any>> -> memref<128xf32, #tpu.memory_space<any>>
    %c0_i32_219 = arith.constant 0 : i32
    %357 = tpu.memref_slice %arg4[%332, %c3_i32_217, %c0_i32_219] : memref<2x32x128xf32, #tpu.memory_space<vmem>> -> memref<1x1x128xf32, #tpu.memory_space<vmem>>
    %358 = tpu.memref_squeeze %357 : memref<1x1x128xf32, #tpu.memory_space<vmem>> -> memref<128xf32, #tpu.memory_space<vmem>>
    %359 = tpu.memref_slice %arg5[%332] : memref<2x!tpu.dma_semaphore, #tpu.memory_space<semaphore_mem>> -> memref<1x!tpu.dma_semaphore, #tpu.memory_space<semaphore_mem>>
    %360 = tpu.memref_squeeze %359 : memref<1x!tpu.dma_semaphore, #tpu.memory_space<semaphore_mem>> -> memref<!tpu.dma_semaphore, #tpu.memory_space<semaphore_mem>>
    tpu.wait_dma2 semaphore(%360 : memref<!tpu.dma_semaphore, #tpu.memory_space<semaphore_mem>>) src(%356 : memref<128xf32, #tpu.memory_space<any>>) dst(%358 : memref<128xf32, #tpu.memory_space<vmem>>)
    %c0_i32_220 = arith.constant 0 : i32
    %c4_i32_221 = arith.constant 4 : i32
    %c0_i32_222 = arith.constant 0 : i32
    %361 = tpu.memref_slice %arg2[%c0_i32_220, %c0_i32_222] : memref<32x128xf32, #tpu.memory_space<any>> -> memref<1x128xf32, #tpu.memory_space<any>>
    %362 = tpu.memref_squeeze %361 : memref<1x128xf32, #tpu.memory_space<any>> -> memref<128xf32, #tpu.memory_space<any>>
    %c0_i32_223 = arith.constant 0 : i32
    %363 = tpu.memref_slice %arg4[%332, %c4_i32_221, %c0_i32_223] : memref<2x32x128xf32, #tpu.memory_space<vmem>> -> memref<1x1x128xf32, #tpu.memory_space<vmem>>
    %364 = tpu.memref_squeeze %363 : memref<1x1x128xf32, #tpu.memory_space<vmem>> -> memref<128xf32, #tpu.memory_space<vmem>>
    %365 = tpu.memref_slice %arg5[%332] : memref<2x!tpu.dma_semaphore, #tpu.memory_space<semaphore_mem>> -> memref<1x!tpu.dma_semaphore, #tpu.memory_space<semaphore_mem>>
    %366 = tpu.memref_squeeze %365 : memref<1x!tpu.dma_semaphore, #tpu.memory_space<semaphore_mem>> -> memref<!tpu.dma_semaphore, #tpu.memory_space<semaphore_mem>>
    tpu.wait_dma2 semaphore(%366 : memref<!tpu.dma_semaphore, #tpu.memory_space<semaphore_mem>>) src(%362 : memref<128xf32, #tpu.memory_space<any>>) dst(%364 : memref<128xf32, #tpu.memory_space<vmem>>)
    %c0_i32_224 = arith.constant 0 : i32
    %c5_i32_225 = arith.constant 5 : i32
    %c0_i32_226 = arith.constant 0 : i32
    %367 = tpu.memref_slice %arg2[%c0_i32_224, %c0_i32_226] : memref<32x128xf32, #tpu.memory_space<any>> -> memref<1x128xf32, #tpu.memory_space<any>>
    %368 = tpu.memref_squeeze %367 : memref<1x128xf32, #tpu.memory_space<any>> -> memref<128xf32, #tpu.memory_space<any>>
    %c0_i32_227 = arith.constant 0 : i32
    %369 = tpu.memref_slice %arg4[%332, %c5_i32_225, %c0_i32_227] : memref<2x32x128xf32, #tpu.memory_space<vmem>> -> memref<1x1x128xf32, #tpu.memory_space<vmem>>
    %370 = tpu.memref_squeeze %369 : memref<1x1x128xf32, #tpu.memory_space<vmem>> -> memref<128xf32, #tpu.memory_space<vmem>>
    %371 = tpu.memref_slice %arg5[%332] : memref<2x!tpu.dma_semaphore, #tpu.memory_space<semaphore_mem>> -> memref<1x!tpu.dma_semaphore, #tpu.memory_space<semaphore_mem>>
    %372 = tpu.memref_squeeze %371 : memref<1x!tpu.dma_semaphore, #tpu.memory_space<semaphore_mem>> -> memref<!tpu.dma_semaphore, #tpu.memory_space<semaphore_mem>>
    tpu.wait_dma2 semaphore(%372 : memref<!tpu.dma_semaphore, #tpu.memory_space<semaphore_mem>>) src(%368 : memref<128xf32, #tpu.memory_space<any>>) dst(%370 : memref<128xf32, #tpu.memory_space<vmem>>)
    %c0_i32_228 = arith.constant 0 : i32
    %c6_i32_229 = arith.constant 6 : i32
    %c0_i32_230 = arith.constant 0 : i32
    %373 = tpu.memref_slice %arg2[%c0_i32_228, %c0_i32_230] : memref<32x128xf32, #tpu.memory_space<any>> -> memref<1x128xf32, #tpu.memory_space<any>>
    %374 = tpu.memref_squeeze %373 : memref<1x128xf32, #tpu.memory_space<any>> -> memref<128xf32, #tpu.memory_space<any>>
    %c0_i32_231 = arith.constant 0 : i32
    %375 = tpu.memref_slice %arg4[%332, %c6_i32_229, %c0_i32_231] : memref<2x32x128xf32, #tpu.memory_space<vmem>> -> memref<1x1x128xf32, #tpu.memory_space<vmem>>
    %376 = tpu.memref_squeeze %375 : memref<1x1x128xf32, #tpu.memory_space<vmem>> -> memref<128xf32, #tpu.memory_space<vmem>>
    %377 = tpu.memref_slice %arg5[%332] : memref<2x!tpu.dma_semaphore, #tpu.memory_space<semaphore_mem>> -> memref<1x!tpu.dma_semaphore, #tpu.memory_space<semaphore_mem>>
    %378 = tpu.memref_squeeze %377 : memref<1x!tpu.dma_semaphore, #tpu.memory_space<semaphore_mem>> -> memref<!tpu.dma_semaphore, #tpu.memory_space<semaphore_mem>>
    tpu.wait_dma2 semaphore(%378 : memref<!tpu.dma_semaphore, #tpu.memory_space<semaphore_mem>>) src(%374 : memref<128xf32, #tpu.memory_space<any>>) dst(%376 : memref<128xf32, #tpu.memory_space<vmem>>)
    %c0_i32_232 = arith.constant 0 : i32
    %c7_i32_233 = arith.constant 7 : i32
    %c0_i32_234 = arith.constant 0 : i32
    %379 = tpu.memref_slice %arg2[%c0_i32_232, %c0_i32_234] : memref<32x128xf32, #tpu.memory_space<any>> -> memref<1x128xf32, #tpu.memory_space<any>>
    %380 = tpu.memref_squeeze %379 : memref<1x128xf32, #tpu.memory_space<any>> -> memref<128xf32, #tpu.memory_space<any>>
    %c0_i32_235 = arith.constant 0 : i32
    %381 = tpu.memref_slice %arg4[%332, %c7_i32_233, %c0_i32_235] : memref<2x32x128xf32, #tpu.memory_space<vmem>> -> memref<1x1x128xf32, #tpu.memory_space<vmem>>
    %382 = tpu.memref_squeeze %381 : memref<1x1x128xf32, #tpu.memory_space<vmem>> -> memref<128xf32, #tpu.memory_space<vmem>>
    %383 = tpu.memref_slice %arg5[%332] : memref<2x!tpu.dma_semaphore, #tpu.memory_space<semaphore_mem>> -> memref<1x!tpu.dma_semaphore, #tpu.memory_space<semaphore_mem>>
    %384 = tpu.memref_squeeze %383 : memref<1x!tpu.dma_semaphore, #tpu.memory_space<semaphore_mem>> -> memref<!tpu.dma_semaphore, #tpu.memory_space<semaphore_mem>>
    tpu.wait_dma2 semaphore(%384 : memref<!tpu.dma_semaphore, #tpu.memory_space<semaphore_mem>>) src(%380 : memref<128xf32, #tpu.memory_space<any>>) dst(%382 : memref<128xf32, #tpu.memory_space<vmem>>)
    %c0_i32_236 = arith.constant 0 : i32
    %c8_i32_237 = arith.constant 8 : i32
    %c0_i32_238 = arith.constant 0 : i32
    %385 = tpu.memref_slice %arg2[%c0_i32_236, %c0_i32_238] : memref<32x128xf32, #tpu.memory_space<any>> -> memref<1x128xf32, #tpu.memory_space<any>>
    %386 = tpu.memref_squeeze %385 : memref<1x128xf32, #tpu.memory_space<any>> -> memref<128xf32, #tpu.memory_space<any>>
    %c0_i32_239 = arith.constant 0 : i32
    %387 = tpu.memref_slice %arg4[%332, %c8_i32_237, %c0_i32_239] : memref<2x32x128xf32, #tpu.memory_space<vmem>> -> memref<1x1x128xf32, #tpu.memory_space<vmem>>
    %388 = tpu.memref_squeeze %387 : memref<1x1x128xf32, #tpu.memory_space<vmem>> -> memref<128xf32, #tpu.memory_space<vmem>>
    %389 = tpu.memref_slice %arg5[%332] : memref<2x!tpu.dma_semaphore, #tpu.memory_space<semaphore_mem>> -> memref<1x!tpu.dma_semaphore, #tpu.memory_space<semaphore_mem>>
    %390 = tpu.memref_squeeze %389 : memref<1x!tpu.dma_semaphore, #tpu.memory_space<semaphore_mem>> -> memref<!tpu.dma_semaphore, #tpu.memory_space<semaphore_mem>>
    tpu.wait_dma2 semaphore(%390 : memref<!tpu.dma_semaphore, #tpu.memory_space<semaphore_mem>>) src(%386 : memref<128xf32, #tpu.memory_space<any>>) dst(%388 : memref<128xf32, #tpu.memory_space<vmem>>)
    %c0_i32_240 = arith.constant 0 : i32
    %c9_i32_241 = arith.constant 9 : i32
    %c0_i32_242 = arith.constant 0 : i32
    %391 = tpu.memref_slice %arg2[%c0_i32_240, %c0_i32_242] : memref<32x128xf32, #tpu.memory_space<any>> -> memref<1x128xf32, #tpu.memory_space<any>>
    %392 = tpu.memref_squeeze %391 : memref<1x128xf32, #tpu.memory_space<any>> -> memref<128xf32, #tpu.memory_space<any>>
    %c0_i32_243 = arith.constant 0 : i32
    %393 = tpu.memref_slice %arg4[%332, %c9_i32_241, %c0_i32_243] : memref<2x32x128xf32, #tpu.memory_space<vmem>> -> memref<1x1x128xf32, #tpu.memory_space<vmem>>
    %394 = tpu.memref_squeeze %393 : memref<1x1x128xf32, #tpu.memory_space<vmem>> -> memref<128xf32, #tpu.memory_space<vmem>>
    %395 = tpu.memref_slice %arg5[%332] : memref<2x!tpu.dma_semaphore, #tpu.memory_space<semaphore_mem>> -> memref<1x!tpu.dma_semaphore, #tpu.memory_space<semaphore_mem>>
    %396 = tpu.memref_squeeze %395 : memref<1x!tpu.dma_semaphore, #tpu.memory_space<semaphore_mem>> -> memref<!tpu.dma_semaphore, #tpu.memory_space<semaphore_mem>>
    tpu.wait_dma2 semaphore(%396 : memref<!tpu.dma_semaphore, #tpu.memory_space<semaphore_mem>>) src(%392 : memref<128xf32, #tpu.memory_space<any>>) dst(%394 : memref<128xf32, #tpu.memory_space<vmem>>)
    %c0_i32_244 = arith.constant 0 : i32
    %c10_i32_245 = arith.constant 10 : i32
    %c0_i32_246 = arith.constant 0 : i32
    %397 = tpu.memref_slice %arg2[%c0_i32_244, %c0_i32_246] : memref<32x128xf32, #tpu.memory_space<any>> -> memref<1x128xf32, #tpu.memory_space<any>>
    %398 = tpu.memref_squeeze %397 : memref<1x128xf32, #tpu.memory_space<any>> -> memref<128xf32, #tpu.memory_space<any>>
    %c0_i32_247 = arith.constant 0 : i32
    %399 = tpu.memref_slice %arg4[%332, %c10_i32_245, %c0_i32_247] : memref<2x32x128xf32, #tpu.memory_space<vmem>> -> memref<1x1x128xf32, #tpu.memory_space<vmem>>
    %400 = tpu.memref_squeeze %399 : memref<1x1x128xf32, #tpu.memory_space<vmem>> -> memref<128xf32, #tpu.memory_space<vmem>>
    %401 = tpu.memref_slice %arg5[%332] : memref<2x!tpu.dma_semaphore, #tpu.memory_space<semaphore_mem>> -> memref<1x!tpu.dma_semaphore, #tpu.memory_space<semaphore_mem>>
    %402 = tpu.memref_squeeze %401 : memref<1x!tpu.dma_semaphore, #tpu.memory_space<semaphore_mem>> -> memref<!tpu.dma_semaphore, #tpu.memory_space<semaphore_mem>>
    tpu.wait_dma2 semaphore(%402 : memref<!tpu.dma_semaphore, #tpu.memory_space<semaphore_mem>>) src(%398 : memref<128xf32, #tpu.memory_space<any>>) dst(%400 : memref<128xf32, #tpu.memory_space<vmem>>)
    %c0_i32_248 = arith.constant 0 : i32
    %c11_i32_249 = arith.constant 11 : i32
    %c0_i32_250 = arith.constant 0 : i32
    %403 = tpu.memref_slice %arg2[%c0_i32_248, %c0_i32_250] : memref<32x128xf32, #tpu.memory_space<any>> -> memref<1x128xf32, #tpu.memory_space<any>>
    %404 = tpu.memref_squeeze %403 : memref<1x128xf32, #tpu.memory_space<any>> -> memref<128xf32, #tpu.memory_space<any>>
    %c0_i32_251 = arith.constant 0 : i32
    %405 = tpu.memref_slice %arg4[%332, %c11_i32_249, %c0_i32_251] : memref<2x32x128xf32, #tpu.memory_space<vmem>> -> memref<1x1x128xf32, #tpu.memory_space<vmem>>
    %406 = tpu.memref_squeeze %405 : memref<1x1x128xf32, #tpu.memory_space<vmem>> -> memref<128xf32, #tpu.memory_space<vmem>>
    %407 = tpu.memref_slice %arg5[%332] : memref<2x!tpu.dma_semaphore, #tpu.memory_space<semaphore_mem>> -> memref<1x!tpu.dma_semaphore, #tpu.memory_space<semaphore_mem>>
    %408 = tpu.memref_squeeze %407 : memref<1x!tpu.dma_semaphore, #tpu.memory_space<semaphore_mem>> -> memref<!tpu.dma_semaphore, #tpu.memory_space<semaphore_mem>>
    tpu.wait_dma2 semaphore(%408 : memref<!tpu.dma_semaphore, #tpu.memory_space<semaphore_mem>>) src(%404 : memref<128xf32, #tpu.memory_space<any>>) dst(%406 : memref<128xf32, #tpu.memory_space<vmem>>)
    %c0_i32_252 = arith.constant 0 : i32
    %c12_i32_253 = arith.constant 12 : i32
    %c0_i32_254 = arith.constant 0 : i32
    %409 = tpu.memref_slice %arg2[%c0_i32_252, %c0_i32_254] : memref<32x128xf32, #tpu.memory_space<any>> -> memref<1x128xf32, #tpu.memory_space<any>>
    %410 = tpu.memref_squeeze %409 : memref<1x128xf32, #tpu.memory_space<any>> -> memref<128xf32, #tpu.memory_space<any>>
    %c0_i32_255 = arith.constant 0 : i32
    %411 = tpu.memref_slice %arg4[%332, %c12_i32_253, %c0_i32_255] : memref<2x32x128xf32, #tpu.memory_space<vmem>> -> memref<1x1x128xf32, #tpu.memory_space<vmem>>
    %412 = tpu.memref_squeeze %411 : memref<1x1x128xf32, #tpu.memory_space<vmem>> -> memref<128xf32, #tpu.memory_space<vmem>>
    %413 = tpu.memref_slice %arg5[%332] : memref<2x!tpu.dma_semaphore, #tpu.memory_space<semaphore_mem>> -> memref<1x!tpu.dma_semaphore, #tpu.memory_space<semaphore_mem>>
    %414 = tpu.memref_squeeze %413 : memref<1x!tpu.dma_semaphore, #tpu.memory_space<semaphore_mem>> -> memref<!tpu.dma_semaphore, #tpu.memory_space<semaphore_mem>>
    tpu.wait_dma2 semaphore(%414 : memref<!tpu.dma_semaphore, #tpu.memory_space<semaphore_mem>>) src(%410 : memref<128xf32, #tpu.memory_space<any>>) dst(%412 : memref<128xf32, #tpu.memory_space<vmem>>)
    %c0_i32_256 = arith.constant 0 : i32
    %c13_i32_257 = arith.constant 13 : i32
    %c0_i32_258 = arith.constant 0 : i32
    %415 = tpu.memref_slice %arg2[%c0_i32_256, %c0_i32_258] : memref<32x128xf32, #tpu.memory_space<any>> -> memref<1x128xf32, #tpu.memory_space<any>>
    %416 = tpu.memref_squeeze %415 : memref<1x128xf32, #tpu.memory_space<any>> -> memref<128xf32, #tpu.memory_space<any>>
    %c0_i32_259 = arith.constant 0 : i32
    %417 = tpu.memref_slice %arg4[%332, %c13_i32_257, %c0_i32_259] : memref<2x32x128xf32, #tpu.memory_space<vmem>> -> memref<1x1x128xf32, #tpu.memory_space<vmem>>
    %418 = tpu.memref_squeeze %417 : memref<1x1x128xf32, #tpu.memory_space<vmem>> -> memref<128xf32, #tpu.memory_space<vmem>>
    %419 = tpu.memref_slice %arg5[%332] : memref<2x!tpu.dma_semaphore, #tpu.memory_space<semaphore_mem>> -> memref<1x!tpu.dma_semaphore, #tpu.memory_space<semaphore_mem>>
    %420 = tpu.memref_squeeze %419 : memref<1x!tpu.dma_semaphore, #tpu.memory_space<semaphore_mem>> -> memref<!tpu.dma_semaphore, #tpu.memory_space<semaphore_mem>>
    tpu.wait_dma2 semaphore(%420 : memref<!tpu.dma_semaphore, #tpu.memory_space<semaphore_mem>>) src(%416 : memref<128xf32, #tpu.memory_space<any>>) dst(%418 : memref<128xf32, #tpu.memory_space<vmem>>)
    %c0_i32_260 = arith.constant 0 : i32
    %c14_i32_261 = arith.constant 14 : i32
    %c0_i32_262 = arith.constant 0 : i32
    %421 = tpu.memref_slice %arg2[%c0_i32_260, %c0_i32_262] : memref<32x128xf32, #tpu.memory_space<any>> -> memref<1x128xf32, #tpu.memory_space<any>>
    %422 = tpu.memref_squeeze %421 : memref<1x128xf32, #tpu.memory_space<any>> -> memref<128xf32, #tpu.memory_space<any>>
    %c0_i32_263 = arith.constant 0 : i32
    %423 = tpu.memref_slice %arg4[%332, %c14_i32_261, %c0_i32_263] : memref<2x32x128xf32, #tpu.memory_space<vmem>> -> memref<1x1x128xf32, #tpu.memory_space<vmem>>
    %424 = tpu.memref_squeeze %423 : memref<1x1x128xf32, #tpu.memory_space<vmem>> -> memref<128xf32, #tpu.memory_space<vmem>>
    %425 = tpu.memref_slice %arg5[%332] : memref<2x!tpu.dma_semaphore, #tpu.memory_space<semaphore_mem>> -> memref<1x!tpu.dma_semaphore, #tpu.memory_space<semaphore_mem>>
    %426 = tpu.memref_squeeze %425 : memref<1x!tpu.dma_semaphore, #tpu.memory_space<semaphore_mem>> -> memref<!tpu.dma_semaphore, #tpu.memory_space<semaphore_mem>>
    tpu.wait_dma2 semaphore(%426 : memref<!tpu.dma_semaphore, #tpu.memory_space<semaphore_mem>>) src(%422 : memref<128xf32, #tpu.memory_space<any>>) dst(%424 : memref<128xf32, #tpu.memory_space<vmem>>)
    %c0_i32_264 = arith.constant 0 : i32
    %c15_i32_265 = arith.constant 15 : i32
    %c0_i32_266 = arith.constant 0 : i32
    %427 = tpu.memref_slice %arg2[%c0_i32_264, %c0_i32_266] : memref<32x128xf32, #tpu.memory_space<any>> -> memref<1x128xf32, #tpu.memory_space<any>>
    %428 = tpu.memref_squeeze %427 : memref<1x128xf32, #tpu.memory_space<any>> -> memref<128xf32, #tpu.memory_space<any>>
    %c0_i32_267 = arith.constant 0 : i32
    %429 = tpu.memref_slice %arg4[%332, %c15_i32_265, %c0_i32_267] : memref<2x32x128xf32, #tpu.memory_space<vmem>> -> memref<1x1x128xf32, #tpu.memory_space<vmem>>
    %430 = tpu.memref_squeeze %429 : memref<1x1x128xf32, #tpu.memory_space<vmem>> -> memref<128xf32, #tpu.memory_space<vmem>>
    %431 = tpu.memref_slice %arg5[%332] : memref<2x!tpu.dma_semaphore, #tpu.memory_space<semaphore_mem>> -> memref<1x!tpu.dma_semaphore, #tpu.memory_space<semaphore_mem>>
    %432 = tpu.memref_squeeze %431 : memref<1x!tpu.dma_semaphore, #tpu.memory_space<semaphore_mem>> -> memref<!tpu.dma_semaphore, #tpu.memory_space<semaphore_mem>>
    tpu.wait_dma2 semaphore(%432 : memref<!tpu.dma_semaphore, #tpu.memory_space<semaphore_mem>>) src(%428 : memref<128xf32, #tpu.memory_space<any>>) dst(%430 : memref<128xf32, #tpu.memory_space<vmem>>)
    %c0_i32_268 = arith.constant 0 : i32
    %c16_i32_269 = arith.constant 16 : i32
    %c0_i32_270 = arith.constant 0 : i32
    %433 = tpu.memref_slice %arg2[%c0_i32_268, %c0_i32_270] : memref<32x128xf32, #tpu.memory_space<any>> -> memref<1x128xf32, #tpu.memory_space<any>>
    %434 = tpu.memref_squeeze %433 : memref<1x128xf32, #tpu.memory_space<any>> -> memref<128xf32, #tpu.memory_space<any>>
    %c0_i32_271 = arith.constant 0 : i32
    %435 = tpu.memref_slice %arg4[%332, %c16_i32_269, %c0_i32_271] : memref<2x32x128xf32, #tpu.memory_space<vmem>> -> memref<1x1x128xf32, #tpu.memory_space<vmem>>
    %436 = tpu.memref_squeeze %435 : memref<1x1x128xf32, #tpu.memory_space<vmem>> -> memref<128xf32, #tpu.memory_space<vmem>>
    %437 = tpu.memref_slice %arg5[%332] : memref<2x!tpu.dma_semaphore, #tpu.memory_space<semaphore_mem>> -> memref<1x!tpu.dma_semaphore, #tpu.memory_space<semaphore_mem>>
    %438 = tpu.memref_squeeze %437 : memref<1x!tpu.dma_semaphore, #tpu.memory_space<semaphore_mem>> -> memref<!tpu.dma_semaphore, #tpu.memory_space<semaphore_mem>>
    tpu.wait_dma2 semaphore(%438 : memref<!tpu.dma_semaphore, #tpu.memory_space<semaphore_mem>>) src(%434 : memref<128xf32, #tpu.memory_space<any>>) dst(%436 : memref<128xf32, #tpu.memory_space<vmem>>)
    %c0_i32_272 = arith.constant 0 : i32
    %c17_i32_273 = arith.constant 17 : i32
    %c0_i32_274 = arith.constant 0 : i32
    %439 = tpu.memref_slice %arg2[%c0_i32_272, %c0_i32_274] : memref<32x128xf32, #tpu.memory_space<any>> -> memref<1x128xf32, #tpu.memory_space<any>>
    %440 = tpu.memref_squeeze %439 : memref<1x128xf32, #tpu.memory_space<any>> -> memref<128xf32, #tpu.memory_space<any>>
    %c0_i32_275 = arith.constant 0 : i32
    %441 = tpu.memref_slice %arg4[%332, %c17_i32_273, %c0_i32_275] : memref<2x32x128xf32, #tpu.memory_space<vmem>> -> memref<1x1x128xf32, #tpu.memory_space<vmem>>
    %442 = tpu.memref_squeeze %441 : memref<1x1x128xf32, #tpu.memory_space<vmem>> -> memref<128xf32, #tpu.memory_space<vmem>>
    %443 = tpu.memref_slice %arg5[%332] : memref<2x!tpu.dma_semaphore, #tpu.memory_space<semaphore_mem>> -> memref<1x!tpu.dma_semaphore, #tpu.memory_space<semaphore_mem>>
    %444 = tpu.memref_squeeze %443 : memref<1x!tpu.dma_semaphore, #tpu.memory_space<semaphore_mem>> -> memref<!tpu.dma_semaphore, #tpu.memory_space<semaphore_mem>>
    tpu.wait_dma2 semaphore(%444 : memref<!tpu.dma_semaphore, #tpu.memory_space<semaphore_mem>>) src(%440 : memref<128xf32, #tpu.memory_space<any>>) dst(%442 : memref<128xf32, #tpu.memory_space<vmem>>)
    %c0_i32_276 = arith.constant 0 : i32
    %c18_i32_277 = arith.constant 18 : i32
    %c0_i32_278 = arith.constant 0 : i32
    %445 = tpu.memref_slice %arg2[%c0_i32_276, %c0_i32_278] : memref<32x128xf32, #tpu.memory_space<any>> -> memref<1x128xf32, #tpu.memory_space<any>>
    %446 = tpu.memref_squeeze %445 : memref<1x128xf32, #tpu.memory_space<any>> -> memref<128xf32, #tpu.memory_space<any>>
    %c0_i32_279 = arith.constant 0 : i32
    %447 = tpu.memref_slice %arg4[%332, %c18_i32_277, %c0_i32_279] : memref<2x32x128xf32, #tpu.memory_space<vmem>> -> memref<1x1x128xf32, #tpu.memory_space<vmem>>
    %448 = tpu.memref_squeeze %447 : memref<1x1x128xf32, #tpu.memory_space<vmem>> -> memref<128xf32, #tpu.memory_space<vmem>>
    %449 = tpu.memref_slice %arg5[%332] : memref<2x!tpu.dma_semaphore, #tpu.memory_space<semaphore_mem>> -> memref<1x!tpu.dma_semaphore, #tpu.memory_space<semaphore_mem>>
    %450 = tpu.memref_squeeze %449 : memref<1x!tpu.dma_semaphore, #tpu.memory_space<semaphore_mem>> -> memref<!tpu.dma_semaphore, #tpu.memory_space<semaphore_mem>>
    tpu.wait_dma2 semaphore(%450 : memref<!tpu.dma_semaphore, #tpu.memory_space<semaphore_mem>>) src(%446 : memref<128xf32, #tpu.memory_space<any>>) dst(%448 : memref<128xf32, #tpu.memory_space<vmem>>)
    %c0_i32_280 = arith.constant 0 : i32
    %c19_i32_281 = arith.constant 19 : i32
    %c0_i32_282 = arith.constant 0 : i32
    %451 = tpu.memref_slice %arg2[%c0_i32_280, %c0_i32_282] : memref<32x128xf32, #tpu.memory_space<any>> -> memref<1x128xf32, #tpu.memory_space<any>>
    %452 = tpu.memref_squeeze %451 : memref<1x128xf32, #tpu.memory_space<any>> -> memref<128xf32, #tpu.memory_space<any>>
    %c0_i32_283 = arith.constant 0 : i32
    %453 = tpu.memref_slice %arg4[%332, %c19_i32_281, %c0_i32_283] : memref<2x32x128xf32, #tpu.memory_space<vmem>> -> memref<1x1x128xf32, #tpu.memory_space<vmem>>
    %454 = tpu.memref_squeeze %453 : memref<1x1x128xf32, #tpu.memory_space<vmem>> -> memref<128xf32, #tpu.memory_space<vmem>>
    %455 = tpu.memref_slice %arg5[%332] : memref<2x!tpu.dma_semaphore, #tpu.memory_space<semaphore_mem>> -> memref<1x!tpu.dma_semaphore, #tpu.memory_space<semaphore_mem>>
    %456 = tpu.memref_squeeze %455 : memref<1x!tpu.dma_semaphore, #tpu.memory_space<semaphore_mem>> -> memref<!tpu.dma_semaphore, #tpu.memory_space<semaphore_mem>>
    tpu.wait_dma2 semaphore(%456 : memref<!tpu.dma_semaphore, #tpu.memory_space<semaphore_mem>>) src(%452 : memref<128xf32, #tpu.memory_space<any>>) dst(%454 : memref<128xf32, #tpu.memory_space<vmem>>)
    %c0_i32_284 = arith.constant 0 : i32
    %c20_i32_285 = arith.constant 20 : i32
    %c0_i32_286 = arith.constant 0 : i32
    %457 = tpu.memref_slice %arg2[%c0_i32_284, %c0_i32_286] : memref<32x128xf32, #tpu.memory_space<any>> -> memref<1x128xf32, #tpu.memory_space<any>>
    %458 = tpu.memref_squeeze %457 : memref<1x128xf32, #tpu.memory_space<any>> -> memref<128xf32, #tpu.memory_space<any>>
    %c0_i32_287 = arith.constant 0 : i32
    %459 = tpu.memref_slice %arg4[%332, %c20_i32_285, %c0_i32_287] : memref<2x32x128xf32, #tpu.memory_space<vmem>> -> memref<1x1x128xf32, #tpu.memory_space<vmem>>
    %460 = tpu.memref_squeeze %459 : memref<1x1x128xf32, #tpu.memory_space<vmem>> -> memref<128xf32, #tpu.memory_space<vmem>>
    %461 = tpu.memref_slice %arg5[%332] : memref<2x!tpu.dma_semaphore, #tpu.memory_space<semaphore_mem>> -> memref<1x!tpu.dma_semaphore, #tpu.memory_space<semaphore_mem>>
    %462 = tpu.memref_squeeze %461 : memref<1x!tpu.dma_semaphore, #tpu.memory_space<semaphore_mem>> -> memref<!tpu.dma_semaphore, #tpu.memory_space<semaphore_mem>>
    tpu.wait_dma2 semaphore(%462 : memref<!tpu.dma_semaphore, #tpu.memory_space<semaphore_mem>>) src(%458 : memref<128xf32, #tpu.memory_space<any>>) dst(%460 : memref<128xf32, #tpu.memory_space<vmem>>)
    %c0_i32_288 = arith.constant 0 : i32
    %c21_i32_289 = arith.constant 21 : i32
    %c0_i32_290 = arith.constant 0 : i32
    %463 = tpu.memref_slice %arg2[%c0_i32_288, %c0_i32_290] : memref<32x128xf32, #tpu.memory_space<any>> -> memref<1x128xf32, #tpu.memory_space<any>>
    %464 = tpu.memref_squeeze %463 : memref<1x128xf32, #tpu.memory_space<any>> -> memref<128xf32, #tpu.memory_space<any>>
    %c0_i32_291 = arith.constant 0 : i32
    %465 = tpu.memref_slice %arg4[%332, %c21_i32_289, %c0_i32_291] : memref<2x32x128xf32, #tpu.memory_space<vmem>> -> memref<1x1x128xf32, #tpu.memory_space<vmem>>
    %466 = tpu.memref_squeeze %465 : memref<1x1x128xf32, #tpu.memory_space<vmem>> -> memref<128xf32, #tpu.memory_space<vmem>>
    %467 = tpu.memref_slice %arg5[%332] : memref<2x!tpu.dma_semaphore, #tpu.memory_space<semaphore_mem>> -> memref<1x!tpu.dma_semaphore, #tpu.memory_space<semaphore_mem>>
    %468 = tpu.memref_squeeze %467 : memref<1x!tpu.dma_semaphore, #tpu.memory_space<semaphore_mem>> -> memref<!tpu.dma_semaphore, #tpu.memory_space<semaphore_mem>>
    tpu.wait_dma2 semaphore(%468 : memref<!tpu.dma_semaphore, #tpu.memory_space<semaphore_mem>>) src(%464 : memref<128xf32, #tpu.memory_space<any>>) dst(%466 : memref<128xf32, #tpu.memory_space<vmem>>)
    %c0_i32_292 = arith.constant 0 : i32
    %c22_i32_293 = arith.constant 22 : i32
    %c0_i32_294 = arith.constant 0 : i32
    %469 = tpu.memref_slice %arg2[%c0_i32_292, %c0_i32_294] : memref<32x128xf32, #tpu.memory_space<any>> -> memref<1x128xf32, #tpu.memory_space<any>>
    %470 = tpu.memref_squeeze %469 : memref<1x128xf32, #tpu.memory_space<any>> -> memref<128xf32, #tpu.memory_space<any>>
    %c0_i32_295 = arith.constant 0 : i32
    %471 = tpu.memref_slice %arg4[%332, %c22_i32_293, %c0_i32_295] : memref<2x32x128xf32, #tpu.memory_space<vmem>> -> memref<1x1x128xf32, #tpu.memory_space<vmem>>
    %472 = tpu.memref_squeeze %471 : memref<1x1x128xf32, #tpu.memory_space<vmem>> -> memref<128xf32, #tpu.memory_space<vmem>>
    %473 = tpu.memref_slice %arg5[%332] : memref<2x!tpu.dma_semaphore, #tpu.memory_space<semaphore_mem>> -> memref<1x!tpu.dma_semaphore, #tpu.memory_space<semaphore_mem>>
    %474 = tpu.memref_squeeze %473 : memref<1x!tpu.dma_semaphore, #tpu.memory_space<semaphore_mem>> -> memref<!tpu.dma_semaphore, #tpu.memory_space<semaphore_mem>>
    tpu.wait_dma2 semaphore(%474 : memref<!tpu.dma_semaphore, #tpu.memory_space<semaphore_mem>>) src(%470 : memref<128xf32, #tpu.memory_space<any>>) dst(%472 : memref<128xf32, #tpu.memory_space<vmem>>)
    %c0_i32_296 = arith.constant 0 : i32
    %c23_i32_297 = arith.constant 23 : i32
    %c0_i32_298 = arith.constant 0 : i32
    %475 = tpu.memref_slice %arg2[%c0_i32_296, %c0_i32_298] : memref<32x128xf32, #tpu.memory_space<any>> -> memref<1x128xf32, #tpu.memory_space<any>>
    %476 = tpu.memref_squeeze %475 : memref<1x128xf32, #tpu.memory_space<any>> -> memref<128xf32, #tpu.memory_space<any>>
    %c0_i32_299 = arith.constant 0 : i32
    %477 = tpu.memref_slice %arg4[%332, %c23_i32_297, %c0_i32_299] : memref<2x32x128xf32, #tpu.memory_space<vmem>> -> memref<1x1x128xf32, #tpu.memory_space<vmem>>
    %478 = tpu.memref_squeeze %477 : memref<1x1x128xf32, #tpu.memory_space<vmem>> -> memref<128xf32, #tpu.memory_space<vmem>>
    %479 = tpu.memref_slice %arg5[%332] : memref<2x!tpu.dma_semaphore, #tpu.memory_space<semaphore_mem>> -> memref<1x!tpu.dma_semaphore, #tpu.memory_space<semaphore_mem>>
    %480 = tpu.memref_squeeze %479 : memref<1x!tpu.dma_semaphore, #tpu.memory_space<semaphore_mem>> -> memref<!tpu.dma_semaphore, #tpu.memory_space<semaphore_mem>>
    tpu.wait_dma2 semaphore(%480 : memref<!tpu.dma_semaphore, #tpu.memory_space<semaphore_mem>>) src(%476 : memref<128xf32, #tpu.memory_space<any>>) dst(%478 : memref<128xf32, #tpu.memory_space<vmem>>)
    %c0_i32_300 = arith.constant 0 : i32
    %c24_i32_301 = arith.constant 24 : i32
    %c0_i32_302 = arith.constant 0 : i32
    %481 = tpu.memref_slice %arg2[%c0_i32_300, %c0_i32_302] : memref<32x128xf32, #tpu.memory_space<any>> -> memref<1x128xf32, #tpu.memory_space<any>>
    %482 = tpu.memref_squeeze %481 : memref<1x128xf32, #tpu.memory_space<any>> -> memref<128xf32, #tpu.memory_space<any>>
    %c0_i32_303 = arith.constant 0 : i32
    %483 = tpu.memref_slice %arg4[%332, %c24_i32_301, %c0_i32_303] : memref<2x32x128xf32, #tpu.memory_space<vmem>> -> memref<1x1x128xf32, #tpu.memory_space<vmem>>
    %484 = tpu.memref_squeeze %483 : memref<1x1x128xf32, #tpu.memory_space<vmem>> -> memref<128xf32, #tpu.memory_space<vmem>>
    %485 = tpu.memref_slice %arg5[%332] : memref<2x!tpu.dma_semaphore, #tpu.memory_space<semaphore_mem>> -> memref<1x!tpu.dma_semaphore, #tpu.memory_space<semaphore_mem>>
    %486 = tpu.memref_squeeze %485 : memref<1x!tpu.dma_semaphore, #tpu.memory_space<semaphore_mem>> -> memref<!tpu.dma_semaphore, #tpu.memory_space<semaphore_mem>>
    tpu.wait_dma2 semaphore(%486 : memref<!tpu.dma_semaphore, #tpu.memory_space<semaphore_mem>>) src(%482 : memref<128xf32, #tpu.memory_space<any>>) dst(%484 : memref<128xf32, #tpu.memory_space<vmem>>)
    %c0_i32_304 = arith.constant 0 : i32
    %c25_i32_305 = arith.constant 25 : i32
    %c0_i32_306 = arith.constant 0 : i32
    %487 = tpu.memref_slice %arg2[%c0_i32_304, %c0_i32_306] : memref<32x128xf32, #tpu.memory_space<any>> -> memref<1x128xf32, #tpu.memory_space<any>>
    %488 = tpu.memref_squeeze %487 : memref<1x128xf32, #tpu.memory_space<any>> -> memref<128xf32, #tpu.memory_space<any>>
    %c0_i32_307 = arith.constant 0 : i32
    %489 = tpu.memref_slice %arg4[%332, %c25_i32_305, %c0_i32_307] : memref<2x32x128xf32, #tpu.memory_space<vmem>> -> memref<1x1x128xf32, #tpu.memory_space<vmem>>
    %490 = tpu.memref_squeeze %489 : memref<1x1x128xf32, #tpu.memory_space<vmem>> -> memref<128xf32, #tpu.memory_space<vmem>>
    %491 = tpu.memref_slice %arg5[%332] : memref<2x!tpu.dma_semaphore, #tpu.memory_space<semaphore_mem>> -> memref<1x!tpu.dma_semaphore, #tpu.memory_space<semaphore_mem>>
    %492 = tpu.memref_squeeze %491 : memref<1x!tpu.dma_semaphore, #tpu.memory_space<semaphore_mem>> -> memref<!tpu.dma_semaphore, #tpu.memory_space<semaphore_mem>>
    tpu.wait_dma2 semaphore(%492 : memref<!tpu.dma_semaphore, #tpu.memory_space<semaphore_mem>>) src(%488 : memref<128xf32, #tpu.memory_space<any>>) dst(%490 : memref<128xf32, #tpu.memory_space<vmem>>)
    %c0_i32_308 = arith.constant 0 : i32
    %c26_i32_309 = arith.constant 26 : i32
    %c0_i32_310 = arith.constant 0 : i32
    %493 = tpu.memref_slice %arg2[%c0_i32_308, %c0_i32_310] : memref<32x128xf32, #tpu.memory_space<any>> -> memref<1x128xf32, #tpu.memory_space<any>>
    %494 = tpu.memref_squeeze %493 : memref<1x128xf32, #tpu.memory_space<any>> -> memref<128xf32, #tpu.memory_space<any>>
    %c0_i32_311 = arith.constant 0 : i32
    %495 = tpu.memref_slice %arg4[%332, %c26_i32_309, %c0_i32_311] : memref<2x32x128xf32, #tpu.memory_space<vmem>> -> memref<1x1x128xf32, #tpu.memory_space<vmem>>
    %496 = tpu.memref_squeeze %495 : memref<1x1x128xf32, #tpu.memory_space<vmem>> -> memref<128xf32, #tpu.memory_space<vmem>>
    %497 = tpu.memref_slice %arg5[%332] : memref<2x!tpu.dma_semaphore, #tpu.memory_space<semaphore_mem>> -> memref<1x!tpu.dma_semaphore, #tpu.memory_space<semaphore_mem>>
    %498 = tpu.memref_squeeze %497 : memref<1x!tpu.dma_semaphore, #tpu.memory_space<semaphore_mem>> -> memref<!tpu.dma_semaphore, #tpu.memory_space<semaphore_mem>>
    tpu.wait_dma2 semaphore(%498 : memref<!tpu.dma_semaphore, #tpu.memory_space<semaphore_mem>>) src(%494 : memref<128xf32, #tpu.memory_space<any>>) dst(%496 : memref<128xf32, #tpu.memory_space<vmem>>)
    %c0_i32_312 = arith.constant 0 : i32
    %c27_i32_313 = arith.constant 27 : i32
    %c0_i32_314 = arith.constant 0 : i32
    %499 = tpu.memref_slice %arg2[%c0_i32_312, %c0_i32_314] : memref<32x128xf32, #tpu.memory_space<any>> -> memref<1x128xf32, #tpu.memory_space<any>>
    %500 = tpu.memref_squeeze %499 : memref<1x128xf32, #tpu.memory_space<any>> -> memref<128xf32, #tpu.memory_space<any>>
    %c0_i32_315 = arith.constant 0 : i32
    %501 = tpu.memref_slice %arg4[%332, %c27_i32_313, %c0_i32_315] : memref<2x32x128xf32, #tpu.memory_space<vmem>> -> memref<1x1x128xf32, #tpu.memory_space<vmem>>
    %502 = tpu.memref_squeeze %501 : memref<1x1x128xf32, #tpu.memory_space<vmem>> -> memref<128xf32, #tpu.memory_space<vmem>>
    %503 = tpu.memref_slice %arg5[%332] : memref<2x!tpu.dma_semaphore, #tpu.memory_space<semaphore_mem>> -> memref<1x!tpu.dma_semaphore, #tpu.memory_space<semaphore_mem>>
    %504 = tpu.memref_squeeze %503 : memref<1x!tpu.dma_semaphore, #tpu.memory_space<semaphore_mem>> -> memref<!tpu.dma_semaphore, #tpu.memory_space<semaphore_mem>>
    tpu.wait_dma2 semaphore(%504 : memref<!tpu.dma_semaphore, #tpu.memory_space<semaphore_mem>>) src(%500 : memref<128xf32, #tpu.memory_space<any>>) dst(%502 : memref<128xf32, #tpu.memory_space<vmem>>)
    %c0_i32_316 = arith.constant 0 : i32
    %c28_i32_317 = arith.constant 28 : i32
    %c0_i32_318 = arith.constant 0 : i32
    %505 = tpu.memref_slice %arg2[%c0_i32_316, %c0_i32_318] : memref<32x128xf32, #tpu.memory_space<any>> -> memref<1x128xf32, #tpu.memory_space<any>>
    %506 = tpu.memref_squeeze %505 : memref<1x128xf32, #tpu.memory_space<any>> -> memref<128xf32, #tpu.memory_space<any>>
    %c0_i32_319 = arith.constant 0 : i32
    %507 = tpu.memref_slice %arg4[%332, %c28_i32_317, %c0_i32_319] : memref<2x32x128xf32, #tpu.memory_space<vmem>> -> memref<1x1x128xf32, #tpu.memory_space<vmem>>
    %508 = tpu.memref_squeeze %507 : memref<1x1x128xf32, #tpu.memory_space<vmem>> -> memref<128xf32, #tpu.memory_space<vmem>>
    %509 = tpu.memref_slice %arg5[%332] : memref<2x!tpu.dma_semaphore, #tpu.memory_space<semaphore_mem>> -> memref<1x!tpu.dma_semaphore, #tpu.memory_space<semaphore_mem>>
    %510 = tpu.memref_squeeze %509 : memref<1x!tpu.dma_semaphore, #tpu.memory_space<semaphore_mem>> -> memref<!tpu.dma_semaphore, #tpu.memory_space<semaphore_mem>>
    tpu.wait_dma2 semaphore(%510 : memref<!tpu.dma_semaphore, #tpu.memory_space<semaphore_mem>>) src(%506 : memref<128xf32, #tpu.memory_space<any>>) dst(%508 : memref<128xf32, #tpu.memory_space<vmem>>)
    %c0_i32_320 = arith.constant 0 : i32
    %c29_i32_321 = arith.constant 29 : i32
    %c0_i32_322 = arith.constant 0 : i32
    %511 = tpu.memref_slice %arg2[%c0_i32_320, %c0_i32_322] : memref<32x128xf32, #tpu.memory_space<any>> -> memref<1x128xf32, #tpu.memory_space<any>>
    %512 = tpu.memref_squeeze %511 : memref<1x128xf32, #tpu.memory_space<any>> -> memref<128xf32, #tpu.memory_space<any>>
    %c0_i32_323 = arith.constant 0 : i32
    %513 = tpu.memref_slice %arg4[%332, %c29_i32_321, %c0_i32_323] : memref<2x32x128xf32, #tpu.memory_space<vmem>> -> memref<1x1x128xf32, #tpu.memory_space<vmem>>
    %514 = tpu.memref_squeeze %513 : memref<1x1x128xf32, #tpu.memory_space<vmem>> -> memref<128xf32, #tpu.memory_space<vmem>>
    %515 = tpu.memref_slice %arg5[%332] : memref<2x!tpu.dma_semaphore, #tpu.memory_space<semaphore_mem>> -> memref<1x!tpu.dma_semaphore, #tpu.memory_space<semaphore_mem>>
    %516 = tpu.memref_squeeze %515 : memref<1x!tpu.dma_semaphore, #tpu.memory_space<semaphore_mem>> -> memref<!tpu.dma_semaphore, #tpu.memory_space<semaphore_mem>>
    tpu.wait_dma2 semaphore(%516 : memref<!tpu.dma_semaphore, #tpu.memory_space<semaphore_mem>>) src(%512 : memref<128xf32, #tpu.memory_space<any>>) dst(%514 : memref<128xf32, #tpu.memory_space<vmem>>)
    %c0_i32_324 = arith.constant 0 : i32
    %c30_i32_325 = arith.constant 30 : i32
    %c0_i32_326 = arith.constant 0 : i32
    %517 = tpu.memref_slice %arg2[%c0_i32_324, %c0_i32_326] : memref<32x128xf32, #tpu.memory_space<any>> -> memref<1x128xf32, #tpu.memory_space<any>>
    %518 = tpu.memref_squeeze %517 : memref<1x128xf32, #tpu.memory_space<any>> -> memref<128xf32, #tpu.memory_space<any>>
    %c0_i32_327 = arith.constant 0 : i32
    %519 = tpu.memref_slice %arg4[%332, %c30_i32_325, %c0_i32_327] : memref<2x32x128xf32, #tpu.memory_space<vmem>> -> memref<1x1x128xf32, #tpu.memory_space<vmem>>
    %520 = tpu.memref_squeeze %519 : memref<1x1x128xf32, #tpu.memory_space<vmem>> -> memref<128xf32, #tpu.memory_space<vmem>>
    %521 = tpu.memref_slice %arg5[%332] : memref<2x!tpu.dma_semaphore, #tpu.memory_space<semaphore_mem>> -> memref<1x!tpu.dma_semaphore, #tpu.memory_space<semaphore_mem>>
    %522 = tpu.memref_squeeze %521 : memref<1x!tpu.dma_semaphore, #tpu.memory_space<semaphore_mem>> -> memref<!tpu.dma_semaphore, #tpu.memory_space<semaphore_mem>>
    tpu.wait_dma2 semaphore(%522 : memref<!tpu.dma_semaphore, #tpu.memory_space<semaphore_mem>>) src(%518 : memref<128xf32, #tpu.memory_space<any>>) dst(%520 : memref<128xf32, #tpu.memory_space<vmem>>)
    %c0_i32_328 = arith.constant 0 : i32
    %c31_i32_329 = arith.constant 31 : i32
    %c0_i32_330 = arith.constant 0 : i32
    %523 = tpu.memref_slice %arg2[%c0_i32_328, %c0_i32_330] : memref<32x128xf32, #tpu.memory_space<any>> -> memref<1x128xf32, #tpu.memory_space<any>>
    %524 = tpu.memref_squeeze %523 : memref<1x128xf32, #tpu.memory_space<any>> -> memref<128xf32, #tpu.memory_space<any>>
    %c0_i32_331 = arith.constant 0 : i32
    %525 = tpu.memref_slice %arg4[%332, %c31_i32_329, %c0_i32_331] : memref<2x32x128xf32, #tpu.memory_space<vmem>> -> memref<1x1x128xf32, #tpu.memory_space<vmem>>
    %526 = tpu.memref_squeeze %525 : memref<1x1x128xf32, #tpu.memory_space<vmem>> -> memref<128xf32, #tpu.memory_space<vmem>>
    %527 = tpu.memref_slice %arg5[%332] : memref<2x!tpu.dma_semaphore, #tpu.memory_space<semaphore_mem>> -> memref<1x!tpu.dma_semaphore, #tpu.memory_space<semaphore_mem>>
    %528 = tpu.memref_squeeze %527 : memref<1x!tpu.dma_semaphore, #tpu.memory_space<semaphore_mem>> -> memref<!tpu.dma_semaphore, #tpu.memory_space<semaphore_mem>>
    tpu.wait_dma2 semaphore(%528 : memref<!tpu.dma_semaphore, #tpu.memory_space<semaphore_mem>>) src(%524 : memref<128xf32, #tpu.memory_space<any>>) dst(%526 : memref<128xf32, #tpu.memory_space<vmem>>)
    %c32_i32_332 = arith.constant 32 : i32
    %529 = arith.muli %322, %c32_i32_332 : i32
    %530 = tpu.assume_multiple %529, 32 : i32
    %531 = arith.index_cast %332 : i32 to index
    %c0 = arith.constant 0 : index
    %c0_333 = arith.constant 0 : index
    %532 = vector.load %arg4[%531, %c0, %c0_333] : memref<2x32x128xf32, #tpu.memory_space<vmem>>, vector<1x32x128xf32>
    %533 = vector.shape_cast %532 : vector<1x32x128xf32> to vector<32x128xf32>
    %cst = arith.constant 11.3137083 : f32
    %534 = vector.broadcast %cst : f32 to vector<32x128xf32>
    %535 = arith.mulf %533, %534 : vector<32x128xf32>
    %536 = arith.index_cast %530 : i32 to index
    %c0_334 = arith.constant 0 : index
    %537 = vector.load %arg3[%536, %c0_334] : memref<32x128xf32, #tpu.memory_space<vmem>>, vector<32x128xf32>
    tpu.vector_store %arg3[%536, %c0_334], %535 {strides = array<i32>} : memref<32x128xf32, #tpu.memory_space<vmem>>, vector<32x128xf32>,
    %c1_i32_335 = arith.constant 1 : i32
    return
  }
  func.func @transform_1(%arg0: i32, %arg1: memref<32xi32, #tpu.memory_space<smem>>) -> (i32, i32) {
    %c0_i32 = arith.constant 0 : i32
    %c0_i32_0 = arith.constant 0 : i32
    return %arg0, %c0_i32 : i32, i32
  }
}

</mosaic_0001>

<bundles_post_ra>
// kernel: tpu_custom_call.1
= control target key start
LH: loop header
LB: loop body
LE: loop exit
PB: predicated region body
PF: predicated region fallthrough
CT: control target
= control target key end

     0   :  { %s1531_s9 = smov [#allocation5]   ;;  %s2046_s0 = inlined_call_operand.hbm [shape: s32[32], index: 0, kind: input, shape index: {}]   ;;  %s2047_s1 = inlined_call_operand.hbm [shape: f32[32,128], index: 1, kind: input, shape index: {}]   ;;  %s2048_s2 = inlined_call_operand.hbm [shape: f32[32,128], index: 2, kind: output, shape index: {}]  }
   0x1   :  { %8 = dma.hbm_to_smem %s2046_s0, 16, %s1531_s9, [#allocation4] }
   0x2   :  { %1525 = dma.done.wait [#allocation4], 16 }
   0x3   :  { %1526 = vsyncadd [#allocation4], 4294967280 }
   0x4   :  { %10 = sfence }
   0x5   :  { %11 = vsyncpa [#allocation7], 0  ;;  %s13_s12 = sld [smem:[#allocation5]]  ;;  %s1532_s13 = smov [#allocation2]  }
   0x6   :  { %s23_s14 = sshll.u32 %s1532_s13, 4  ;;  %s1585_s15 = sld [smem:[#allocation5 + $0x1]]  ;;  %s1587_s14 = int_to_ptr.vmem [resolvable:$true] %s23_s14 }
   0x7   :  { %s1533_s16 = smov [#allocation2 + $0x1]   ;;  %s1589_s18 = sld [smem:[#allocation5 + $0x2]] }
   0x8   :  { %s39_s17 = sshll.u32 %s1533_s16, 4  ;;  %s1534_s19 = smov [#allocation2 + $0x2]   ;;  %s1591_s17 = int_to_ptr.vmem [resolvable:$true] %s39_s17 }
   0x9   :  { %s55_s0 = sshll.u32 %s1534_s19, 4  ;;  %s1593_s20 = sld [smem:[#allocation5 + $0x3]]  ;;  %s1595_s0 = int_to_ptr.vmem [resolvable:$true] %s55_s0 }
   0xa   :  { %s1604_s29 = scalar_lea.hbm %s2047_s1, 512 }
   0xb   :  { %s692_s21 = sshll.u32 %s13_s12, 4 }
   0xc   :  { %s15_s24 = scalar_lea.hbm %s2047_s1, %s692_s21  ;;  %s694_s25 = sshll.u32 %s1585_s15, 4 }
   0xd   :  { %s801_s26 = scalar_lea.hbm %s15_s24, 16  ;;  %p804_p1 = scmp.lt.s32.totalorder %s15_s24, %s2047_s1 }
   0xe   :  { %p802_p0 = scmp.ne.s32.totalorder %s15_s24, %s801_s26  ;;  %p805_p2 = scmp.lt.s32.totalorder %s1604_s29, %s801_s26 }
  0x10   :  { %p806_p3 = por %p805_p2, %p804_p1 }
  0x12   :  { %p807_p4 = pnand %p806_p3, %p802_p0 }
  0x14   :  { %810 = shalt.err (!%p807_p4)  }
  0x15   :  { %s811_s4 = scalar_lea.vmem %s1587_s14, 16  ;;  %s1613_s5 = scalar_lea.vmem %s1587_s14, 1024 }
  0x16   :  { %p812_p5 = scmp.ne.s32.totalorder %s1587_s14, %s811_s4  ;;  %p816_p6 = scmp.lt.s32.totalorder %s1587_s14, %s1587_s14 }
  0x17   :  { %p817_p7 = scmp.lt.s32.totalorder %s1613_s5, %s811_s4 }
  0x19   :  { %p818_p8 = por %p817_p7, %p816_p6 }
  0x1b   :  { %p819_p9 = pnand %p818_p8, %p812_p5 }
  0x1d   :  { %822 = shalt.err (!%p819_p9)  }
  0x1e   :  { %26 = dma.hbm_to_vmem [thread:$0]  %s15_s24, 16, %s1587_s14, [#allocation3] }
  0x1f   :  { %s30_s8 = scalar_lea.hbm %s2047_s1, %s694_s25  ;;  %s696_s9 = sshll.u32 %s1589_s18, 4 }
  0x20   :  { %s823_s10 = scalar_lea.hbm %s30_s8, 16  ;;  %p826_p11 = scmp.lt.s32.totalorder %s30_s8, %s2047_s1 }
  0x21   :  { %p824_p10 = scmp.ne.s32.totalorder %s30_s8, %s823_s10  ;;  %p827_p12 = scmp.lt.s32.totalorder %s1604_s29, %s823_s10 }
  0x23   :  { %p828_p13 = por %p827_p12, %p826_p11 }
  0x25   :  { %p829_p0 = pnand %p828_p13, %p824_p10 }
  0x27   :  { %832 = shalt.err (!%p829_p0)  }
  0x28   :  { %s833_s13 = scalar_lea.vmem %s1591_s17, 16  ;;  %p838_p2 = scmp.lt.s32.totalorder %s1591_s17, %s1587_s14 }
  0x29   :  { %p834_p1 = scmp.ne.s32.totalorder %s1591_s17, %s833_s13  ;;  %p839_p3 = scmp.lt.s32.totalorder %s1613_s5, %s833_s13 }
  0x2b   :  { %p840_p4 = por %p839_p3, %p838_p2 }
  0x2d   :  { %p841_p5 = pnand %p840_p4, %p834_p1 }
  0x2f   :  { %844 = shalt.err (!%p841_p5)  }
  0x30   :  { %42 = dma.hbm_to_vmem [thread:$0]  %s30_s8, 16, %s1591_s17, [#allocation3] }
  0x31   :  { %s46_s18 = scalar_lea.hbm %s2047_s1, %s696_s9  ;;  %s698_s19 = sshll.u32 %s1593_s20, 4 }
  0x32   :  { %s845_s21 = scalar_lea.hbm %s46_s18, 16  ;;  %p848_p7 = scmp.lt.s32.totalorder %s46_s18, %s2047_s1 }
  0x33   :  { %p846_p6 = scmp.ne.s32.totalorder %s46_s18, %s845_s21  ;;  %p849_p8 = scmp.lt.s32.totalorder %s1604_s29, %s845_s21 }
  0x35   :  { %p850_p9 = por %p849_p8, %p848_p7 }
  0x37   :  { %p851_p10 = pnand %p850_p9, %p846_p6 }
  0x39   :  { %854 = shalt.err (!%p851_p10)  }
  0x3a   :  { %s855_s17 = scalar_lea.vmem %s1595_s0, 16  ;;  %p860_p12 = scmp.lt.s32.totalorder %s1595_s0, %s1587_s14 }
  0x3b   :  { %p856_p11 = scmp.ne.s32.totalorder %s1595_s0, %s855_s17  ;;  %p861_p13 = scmp.lt.s32.totalorder %s1613_s5, %s855_s17 }
  0x3d   :  { %p862_p0 = por %p861_p13, %p860_p12 }
  0x3f   :  { %p863_p1 = pnand %p862_p0, %p856_p11 }
  0x41   :  { %866 = shalt.err (!%p863_p1)  }
  0x42   :  { %58 = dma.hbm_to_vmem [thread:$0]  %s46_s18, 16, %s1595_s0, [#allocation3] }
  0x43   :  { %s62_s25 = scalar_lea.hbm %s2047_s1, %s698_s19  ;;  %s1535_s26 = smov [#allocation2 + $0x3]  }
  0x44   :  { %s71_s27 = sshll.u32 %s1535_s26, 4  ;;  %s699_s28 = sld [smem:[#allocation5 + $0x4]]  ;;  %s72_s27 = int_to_ptr.vmem [resolvable:$true] %s71_s27 }
  0x45   :  { %s867_s30 = scalar_lea.hbm %s62_s25, 16  ;;  %p870_p3 = scmp.lt.s32.totalorder %s62_s25, %s2047_s1 }
  0x46   :  { %p868_p2 = scmp.ne.s32.totalorder %s62_s25, %s867_s30  ;;  %p871_p4 = scmp.lt.s32.totalorder %s1604_s29, %s867_s30 }
  0x48   :  { %p872_p5 = por %p871_p4, %p870_p3 }
  0x4a   :  { %p873_p6 = pnand %p872_p5, %p868_p2 }
  0x4c   :  { %876 = shalt.err (!%p873_p6)  }
  0x4d   :  { %s877_s6 = scalar_lea.vmem %s72_s27, 16  ;;  %p882_p8 = scmp.lt.s32.totalorder %s72_s27, %s1587_s14 }
  0x4e   :  { %p878_p7 = scmp.ne.s32.totalorder %s72_s27, %s877_s6  ;;  %p883_p9 = scmp.lt.s32.totalorder %s1613_s5, %s877_s6 }
  0x50   :  { %p884_p10 = por %p883_p9, %p882_p8 }
  0x52   :  { %p885_p11 = pnand %p884_p10, %p878_p7 }
  0x54   :  { %888 = shalt.err (!%p885_p11)  }
  0x55   :  { %74 = dma.hbm_to_vmem [thread:$0]  %s62_s25, 16, %s72_s27, [#allocation3] }
  0x56   :  { %s1536_s0 = smov [#allocation2 + $0x4]   ;;  %s701_s8 = sld [smem:[#allocation5 + $0x5]] }
  0x57   :  { %s87_s7 = sshll.u32 %s1536_s0, 4  ;;  %s1537_s9 = smov [#allocation2 + $0x5]   ;;  %s88_s7 = int_to_ptr.vmem [resolvable:$true] %s87_s7 }
  0x58   :  { %s103_s10 = sshll.u32 %s1537_s9, 4  ;;  %s1656_s11 = sld [smem:[#allocation5 + $0x6]]  ;;  %s1658_s10 = int_to_ptr.vmem [resolvable:$true] %s103_s10 }
  0x59   :  { %s700_s12 = sshll.u32 %s699_s28, 4 }
  0x5a   :  { %s78_s16 = scalar_lea.hbm %s2047_s1, %s700_s12 }
  0x5b   :  { %s889_s18 = scalar_lea.hbm %s78_s16, 16  ;;  %p892_p13 = scmp.lt.s32.totalorder %s78_s16, %s2047_s1 }
  0x5c   :  { %p890_p12 = scmp.ne.s32.totalorder %s78_s16, %s889_s18  ;;  %p893_p0 = scmp.lt.s32.totalorder %s1604_s29, %s889_s18 }
  0x5e   :  { %p894_p1 = por %p893_p0, %p892_p13 }
  0x60   :  { %p895_p2 = pnand %p894_p1, %p890_p12 }
  0x62   :  { %898 = shalt.err (!%p895_p2)  }
  0x63   :  { %s899_s22 = scalar_lea.vmem %s88_s7, 16  ;;  %p904_p4 = scmp.lt.s32.totalorder %s88_s7, %s1587_s14 }
  0x64   :  { %p900_p3 = scmp.ne.s32.totalorder %s88_s7, %s899_s22  ;;  %p905_p5 = scmp.lt.s32.totalorder %s1613_s5, %s899_s22 }
  0x66   :  { %p906_p6 = por %p905_p5, %p904_p4 }
  0x68   :  { %p907_p7 = pnand %p906_p6, %p900_p3 }
  0x6a   :  { %910 = shalt.err (!%p907_p7)  }
  0x6b   :  { %90 = dma.hbm_to_vmem [thread:$0]  %s78_s16, 16, %s88_s7, [#allocation3] }
  0x6c   :  { %s702_s23 = sshll.u32 %s701_s8, 4  ;;  %s1538_s17 = smov [#allocation2 + $0x6]  }
  0x6d   :  { %s119_s20 = sshll.u32 %s1538_s17, 4  ;;  %s94_s26 = scalar_lea.hbm %s2047_s1, %s702_s23  ;;  %s1672_s20 = int_to_ptr.vmem [resolvable:$true] %s119_s20 }
  0x6e   :  { %s911_s27 = scalar_lea.hbm %s94_s26, 16  ;;  %p914_p9 = scmp.lt.s32.totalorder %s94_s26, %s2047_s1 }
  0x6f   :  { %p912_p8 = scmp.ne.s32.totalorder %s94_s26, %s911_s27  ;;  %p915_p10 = scmp.lt.s32.totalorder %s1604_s29, %s911_s27 }
  0x71   :  { %p916_p11 = por %p915_p10, %p914_p9 }
  0x73   :  { %p917_p12 = pnand %p916_p11, %p912_p8 }
  0x75   :  { %920 = shalt.err (!%p917_p12)  }
  0x76   :  { %s921_s3 = scalar_lea.vmem %s1658_s10, 16  ;;  %p926_p0 = scmp.lt.s32.totalorder %s1658_s10, %s1587_s14 }
  0x77   :  { %p922_p13 = scmp.ne.s32.totalorder %s1658_s10, %s921_s3  ;;  %p927_p1 = scmp.lt.s32.totalorder %s1613_s5, %s921_s3 }
  0x79   :  { %p928_p2 = por %p927_p1, %p926_p0 }
  0x7b   :  { %p929_p3 = pnand %p928_p2, %p922_p13 }
  0x7d   :  { %932 = shalt.err (!%p929_p3)  }
  0x7e   :  { %106 = dma.hbm_to_vmem [thread:$0]  %s94_s26, 16, %s1658_s10, [#allocation3] }
  0x7f   :  { %s704_s4 = sshll.u32 %s1656_s11, 4  ;;  %s705_s6 = sld [smem:[#allocation5 + $0x7]] }
  0x80   :  { %s110_s8 = scalar_lea.hbm %s2047_s1, %s704_s4 }
  0x81   :  { %s933_s9 = scalar_lea.hbm %s110_s8, 16  ;;  %p936_p5 = scmp.lt.s32.totalorder %s110_s8, %s2047_s1 }
  0x82   :  { %p934_p4 = scmp.ne.s32.totalorder %s110_s8, %s933_s9  ;;  %p937_p6 = scmp.lt.s32.totalorder %s1604_s29, %s933_s9 }
  0x84   :  { %p938_p7 = por %p937_p6, %p936_p5 }
  0x86   :  { %p939_p8 = pnand %p938_p7, %p934_p4 }
  0x88   :  { %942 = shalt.err (!%p939_p8)  }
  0x89   :  { %s943_s10 = scalar_lea.vmem %s1672_s20, 16  ;;  %p948_p10 = scmp.lt.s32.totalorder %s1672_s20, %s1587_s14 }
  0x8a   :  { %p944_p9 = scmp.ne.s32.totalorder %s1672_s20, %s943_s10  ;;  %p949_p11 = scmp.lt.s32.totalorder %s1613_s5, %s943_s10 }
  0x8c   :  { %p950_p12 = por %p949_p11, %p948_p10 }
  0x8e   :  { %p951_p13 = pnand %p950_p12, %p944_p9 }
  0x90   :  { %954 = shalt.err (!%p951_p13)  }
  0x91   :  { %122 = dma.hbm_to_vmem [thread:$0]  %s110_s8, 16, %s1672_s20, [#allocation3] }
  0x92   :  { %s1539_s11 = smov [#allocation2 + $0x7]   ;;  %s707_s16 = sld [smem:[#allocation5 + $0x8]] }
  0x93   :  { %s135_s15 = sshll.u32 %s1539_s11, 4  ;;  %s1540_s18 = smov [#allocation2 + $0x8]   ;;  %s136_s15 = int_to_ptr.vmem [resolvable:$true] %s135_s15 }
  0x94   :  { %s151_s19 = sshll.u32 %s1540_s18, 4  ;;  %s1698_s21 = sld [smem:[#allocation5 + $0x9]]  ;;  %s1700_s19 = int_to_ptr.vmem [resolvable:$true] %s151_s19 }
  0x95   :  { %s706_s22 = sshll.u32 %s705_s6, 4 }
  0x96   :  { %s126_s24 = scalar_lea.hbm %s2047_s1, %s706_s22 }
  0x97   :  { %s955_s25 = scalar_lea.hbm %s126_s24, 16  ;;  %p958_p1 = scmp.lt.s32.totalorder %s126_s24, %s2047_s1 }
  0x98   :  { %p956_p0 = scmp.ne.s32.totalorder %s126_s24, %s955_s25  ;;  %p959_p2 = scmp.lt.s32.totalorder %s1604_s29, %s955_s25 }
  0x9a   :  { %p960_p3 = por %p959_p2, %p958_p1 }
  0x9c   :  { %p961_p4 = pnand %p960_p3, %p956_p0 }
  0x9e   :  { %964 = shalt.err (!%p961_p4)  }
  0x9f   :  { %s965_s20 = scalar_lea.vmem %s136_s15, 16  ;;  %p970_p6 = scmp.lt.s32.totalorder %s136_s15, %s1587_s14 }
  0xa0   :  { %p966_p5 = scmp.ne.s32.totalorder %s136_s15, %s965_s20  ;;  %p971_p7 = scmp.lt.s32.totalorder %s1613_s5, %s965_s20 }
  0xa2   :  { %p972_p8 = por %p971_p7, %p970_p6 }
  0xa4   :  { %p973_p9 = pnand %p972_p8, %p966_p5 }
  0xa6   :  { %976 = shalt.err (!%p973_p9)  }
  0xa7   :  { %138 = dma.hbm_to_vmem [thread:$0]  %s126_s24, 16, %s136_s15, [#allocation3] }
  0xa8   :  { %s708_s28 = sshll.u32 %s707_s16, 4  ;;  %s1541_s30 = smov [#allocation2 + $0x9]  }
  0xa9   :  { %s167_s3 = sshll.u32 %s1541_s30, 4  ;;  %s142_s0 = scalar_lea.hbm %s2047_s1, %s708_s28  ;;  %s1714_s3 = int_to_ptr.vmem [resolvable:$true] %s167_s3 }
  0xaa   :  { %s977_s7 = scalar_lea.hbm %s142_s0, 16  ;;  %p980_p11 = scmp.lt.s32.totalorder %s142_s0, %s2047_s1 }
  0xab   :  { %p978_p10 = scmp.ne.s32.totalorder %s142_s0, %s977_s7  ;;  %p981_p12 = scmp.lt.s32.totalorder %s1604_s29, %s977_s7 }
  0xad   :  { %p982_p13 = por %p981_p12, %p980_p11 }
  0xaf   :  { %p983_p0 = pnand %p982_p13, %p978_p10 }
  0xb1   :  { %986 = shalt.err (!%p983_p0)  }
  0xb2   :  { %s987_s12 = scalar_lea.vmem %s1700_s19, 16  ;;  %p992_p2 = scmp.lt.s32.totalorder %s1700_s19, %s1587_s14 }
  0xb3   :  { %p988_p1 = scmp.ne.s32.totalorder %s1700_s19, %s987_s12  ;;  %p993_p3 = scmp.lt.s32.totalorder %s1613_s5, %s987_s12 }
  0xb5   :  { %p994_p4 = por %p993_p3, %p992_p2 }
  0xb7   :  { %p995_p5 = pnand %p994_p4, %p988_p1 }
  0xb9   :  { %998 = shalt.err (!%p995_p5)  }
  0xba   :  { %154 = dma.hbm_to_vmem [thread:$0]  %s142_s0, 16, %s1700_s19, [#allocation3] }
  0xbb   :  { %s710_s13 = sshll.u32 %s1698_s21, 4  ;;  %s711_s10 = sld [smem:[#allocation5 + $0xa]] }
  0xbc   :  { %s158_s16 = scalar_lea.hbm %s2047_s1, %s710_s13 }
  0xbd   :  { %s999_s18 = scalar_lea.hbm %s158_s16, 16  ;;  %p1002_p7 = scmp.lt.s32.totalorder %s158_s16, %s2047_s1 }
  0xbe   :  { %p1000_p6 = scmp.ne.s32.totalorder %s158_s16, %s999_s18  ;;  %p1003_p8 = scmp.lt.s32.totalorder %s1604_s29, %s999_s18 }
  0xc0   :  { %p1004_p9 = por %p1003_p8, %p1002_p7 }
  0xc2   :  { %p1005_p10 = pnand %p1004_p9, %p1000_p6 }
  0xc4   :  { %1008 = shalt.err (!%p1005_p10)  }
  0xc5   :  { %s1009_s19 = scalar_lea.vmem %s1714_s3, 16  ;;  %p1014_p12 = scmp.lt.s32.totalorder %s1714_s3, %s1587_s14 }
  0xc6   :  { %p1010_p11 = scmp.ne.s32.totalorder %s1714_s3, %s1009_s19  ;;  %p1015_p13 = scmp.lt.s32.totalorder %s1613_s5, %s1009_s19 }
  0xc8   :  { %p1016_p0 = por %p1015_p13, %p1014_p12 }
  0xca   :  { %p1017_p1 = pnand %p1016_p0, %p1010_p11 }
  0xcc   :  { %1020 = shalt.err (!%p1017_p1)  }
  0xcd   :  { %170 = dma.hbm_to_vmem [thread:$0]  %s158_s16, 16, %s1714_s3, [#allocation3] }
  0xce   :  { %s1542_s21 = smov [#allocation2 + $0xa]   ;;  %s713_s24 = sld [smem:[#allocation5 + $0xb]] }
  0xcf   :  { %s183_s17 = sshll.u32 %s1542_s21, 4  ;;  %s1543_s25 = smov [#allocation2 + $0xb]   ;;  %s184_s17 = int_to_ptr.vmem [resolvable:$true] %s183_s17 }
  0xd0   :  { %s199_s26 = sshll.u32 %s1543_s25, 4  ;;  %s1740_s27 = sld [smem:[#allocation5 + $0xc]]  ;;  %s1742_s26 = int_to_ptr.vmem [resolvable:$true] %s199_s26 }
  0xd1   :  { %s712_s20 = sshll.u32 %s711_s10, 4 }
  0xd2   :  { %s174_s4 = scalar_lea.hbm %s2047_s1, %s712_s20 }
  0xd3   :  { %s1021_s6 = scalar_lea.hbm %s174_s4, 16  ;;  %p1024_p3 = scmp.lt.s32.totalorder %s174_s4, %s2047_s1 }
  0xd4   :  { %p1022_p2 = scmp.ne.s32.totalorder %s174_s4, %s1021_s6  ;;  %p1025_p4 = scmp.lt.s32.totalorder %s1604_s29, %s1021_s6 }
  0xd6   :  { %p1026_p5 = por %p1025_p4, %p1024_p3 }
  0xd8   :  { %p1027_p6 = pnand %p1026_p5, %p1022_p2 }
  0xda   :  { %1030 = shalt.err (!%p1027_p6)  }
  0xdb   :  { %s1031_s3 = scalar_lea.vmem %s184_s17, 16  ;;  %p1036_p8 = scmp.lt.s32.totalorder %s184_s17, %s1587_s14 }
  0xdc   :  { %p1032_p7 = scmp.ne.s32.totalorder %s184_s17, %s1031_s3  ;;  %p1037_p9 = scmp.lt.s32.totalorder %s1613_s5, %s1031_s3 }
  0xde   :  { %p1038_p10 = por %p1037_p9, %p1036_p8 }
  0xe0   :  { %p1039_p11 = pnand %p1038_p10, %p1032_p7 }
  0xe2   :  { %1042 = shalt.err (!%p1039_p11)  }
  0xe3   :  { %186 = dma.hbm_to_vmem [thread:$0]  %s174_s4, 16, %s184_s17, [#allocation3] }
  0xe4   :  { %s714_s8 = sshll.u32 %s713_s24, 4  ;;  %s1544_s9 = smov [#allocation2 + $0xc]  }
  0xe5   :  { %s215_s12 = sshll.u32 %s1544_s9, 4  ;;  %s190_s11 = scalar_lea.hbm %s2047_s1, %s714_s8  ;;  %s1756_s12 = int_to_ptr.vmem [resolvable:$true] %s215_s12 }
  0xe6   :  { %s1043_s15 = scalar_lea.hbm %s190_s11, 16  ;;  %p1046_p13 = scmp.lt.s32.totalorder %s190_s11, %s2047_s1 }
  0xe7   :  { %p1044_p12 = scmp.ne.s32.totalorder %s190_s11, %s1043_s15  ;;  %p1047_p0 = scmp.lt.s32.totalorder %s1604_s29, %s1043_s15 }
  0xe9   :  { %p1048_p1 = por %p1047_p0, %p1046_p13 }
  0xeb   :  { %p1049_p2 = pnand %p1048_p1, %p1044_p12 }
  0xed   :  { %1052 = shalt.err (!%p1049_p2)  }
  0xee   :  { %s1053_s22 = scalar_lea.vmem %s1742_s26, 16  ;;  %p1058_p4 = scmp.lt.s32.totalorder %s1742_s26, %s1587_s14 }
  0xef   :  { %p1054_p3 = scmp.ne.s32.totalorder %s1742_s26, %s1053_s22  ;;  %p1059_p5 = scmp.lt.s32.totalorder %s1613_s5, %s1053_s22 }
  0xf1   :  { %p1060_p6 = por %p1059_p5, %p1058_p4 }
  0xf3   :  { %p1061_p7 = pnand %p1060_p6, %p1054_p3 }
  0xf5   :  { %1064 = shalt.err (!%p1061_p7)  }
  0xf6   :  { %202 = dma.hbm_to_vmem [thread:$0]  %s190_s11, 16, %s1742_s26, [#allocation3] }
  0xf7   :  { %s716_s23 = sshll.u32 %s1740_s27, 4  ;;  %s717_s19 = sld [smem:[#allocation5 + $0xd]] }
  0xf8   :  { %s206_s24 = scalar_lea.hbm %s2047_s1, %s716_s23 }
  0xf9   :  { %s1065_s25 = scalar_lea.hbm %s206_s24, 16  ;;  %p1068_p9 = scmp.lt.s32.totalorder %s206_s24, %s2047_s1 }
  0xfa   :  { %p1066_p8 = scmp.ne.s32.totalorder %s206_s24, %s1065_s25  ;;  %p1069_p10 = scmp.lt.s32.totalorder %s1604_s29, %s1065_s25 }
  0xfc   :  { %p1070_p11 = por %p1069_p10, %p1068_p9 }
  0xfe   :  { %p1071_p12 = pnand %p1070_p11, %p1066_p8 }
 0x100   :  { %1074 = shalt.err (!%p1071_p12)  }
 0x101   :  { %s1075_s26 = scalar_lea.vmem %s1756_s12, 16  ;;  %p1080_p0 = scmp.lt.s32.totalorder %s1756_s12, %s1587_s14 }
 0x102   :  { %p1076_p13 = scmp.ne.s32.totalorder %s1756_s12, %s1075_s26  ;;  %p1081_p1 = scmp.lt.s32.totalorder %s1613_s5, %s1075_s26 }
 0x104   :  { %p1082_p2 = por %p1081_p1, %p1080_p0 }
 0x106   :  { %p1083_p3 = pnand %p1082_p2, %p1076_p13 }
 0x108   :  { %1086 = shalt.err (!%p1083_p3)  }
 0x109   :  { %218 = dma.hbm_to_vmem [thread:$0]  %s206_s24, 16, %s1756_s12, [#allocation3] }
 0x10a   :  { %s1545_s27 = smov [#allocation2 + $0xd]   ;;  %s719_s4 = sld [smem:[#allocation5 + $0xe]] }
 0x10b   :  { %s231_s30 = sshll.u32 %s1545_s27, 4  ;;  %s1546_s6 = smov [#allocation2 + $0xe]   ;;  %s232_s30 = int_to_ptr.vmem [resolvable:$true] %s231_s30 }
 0x10c   :  { %s247_s0 = sshll.u32 %s1546_s6, 4  ;;  %s1782_s7 = sld [smem:[#allocation5 + $0xf]]  ;;  %s1784_s0 = int_to_ptr.vmem [resolvable:$true] %s247_s0 }
 0x10d   :  { %s718_s3 = sshll.u32 %s717_s19, 4 }
 0x10e   :  { %s222_s13 = scalar_lea.hbm %s2047_s1, %s718_s3 }
 0x10f   :  { %s1087_s10 = scalar_lea.hbm %s222_s13, 16  ;;  %p1090_p5 = scmp.lt.s32.totalorder %s222_s13, %s2047_s1 }
 0x110   :  { %p1088_p4 = scmp.ne.s32.totalorder %s222_s13, %s1087_s10  ;;  %p1091_p6 = scmp.lt.s32.totalorder %s1604_s29, %s1087_s10 }
 0x112   :  { %p1092_p7 = por %p1091_p6, %p1090_p5 }
 0x114   :  { %p1093_p8 = pnand %p1092_p7, %p1088_p4 }
 0x116   :  { %1096 = shalt.err (!%p1093_p8)  }
 0x117   :  { %s1097_s12 = scalar_lea.vmem %s232_s30, 16  ;;  %p1102_p10 = scmp.lt.s32.totalorder %s232_s30, %s1587_s14 }
 0x118   :  { %p1098_p9 = scmp.ne.s32.totalorder %s232_s30, %s1097_s12  ;;  %p1103_p11 = scmp.lt.s32.totalorder %s1613_s5, %s1097_s12 }
 0x11a   :  { %p1104_p12 = por %p1103_p11, %p1102_p10 }
 0x11c   :  { %p1105_p13 = pnand %p1104_p12, %p1098_p9 }
 0x11e   :  { %1108 = shalt.err (!%p1105_p13)  }
 0x11f   :  { %234 = dma.hbm_to_vmem [thread:$0]  %s222_s13, 16, %s232_s30, [#allocation3] }
 0x120   :  { %s720_s16 = sshll.u32 %s719_s4, 4  ;;  %s1547_s18 = smov [#allocation2 + $0xf]  }
 0x121   :  { %s263_s22 = sshll.u32 %s1547_s18, 4  ;;  %s238_s21 = scalar_lea.hbm %s2047_s1, %s720_s16  ;;  %s1798_s22 = int_to_ptr.vmem [resolvable:$true] %s263_s22 }
 0x122   :  { %s1109_s17 = scalar_lea.hbm %s238_s21, 16  ;;  %p1112_p1 = scmp.lt.s32.totalorder %s238_s21, %s2047_s1 }
 0x123   :  { %p1110_p0 = scmp.ne.s32.totalorder %s238_s21, %s1109_s17  ;;  %p1113_p2 = scmp.lt.s32.totalorder %s1604_s29, %s1109_s17 }
 0x125   :  { %p1114_p3 = por %p1113_p2, %p1112_p1 }
 0x127   :  { %p1115_p4 = pnand %p1114_p3, %p1110_p0 }
 0x129   :  { %1118 = shalt.err (!%p1115_p4)  }
 0x12a   :  { %s1119_s20 = scalar_lea.vmem %s1784_s0, 16  ;;  %p1124_p6 = scmp.lt.s32.totalorder %s1784_s0, %s1587_s14 }
 0x12b   :  { %p1120_p5 = scmp.ne.s32.totalorder %s1784_s0, %s1119_s20  ;;  %p1125_p7 = scmp.lt.s32.totalorder %s1613_s5, %s1119_s20 }
 0x12d   :  { %p1126_p8 = por %p1125_p7, %p1124_p6 }
 0x12f   :  { %p1127_p9 = pnand %p1126_p8, %p1120_p5 }
 0x131   :  { %1130 = shalt.err (!%p1127_p9)  }
 0x132   :  { %250 = dma.hbm_to_vmem [thread:$0]  %s238_s21, 16, %s1784_s0, [#allocation3] }
 0x133   :  { %s722_s28 = sshll.u32 %s1782_s7, 4  ;;  %s723_s26 = sld [smem:[#allocation5 + $0x10]] }
 0x134   :  { %s254_s4 = scalar_lea.hbm %s2047_s1, %s722_s28 }
 0x135   :  { %s1131_s6 = scalar_lea.hbm %s254_s4, 16  ;;  %p1134_p11 = scmp.lt.s32.totalorder %s254_s4, %s2047_s1 }
 0x136   :  { %p1132_p10 = scmp.ne.s32.totalorder %s254_s4, %s1131_s6  ;;  %p1135_p12 = scmp.lt.s32.totalorder %s1604_s29, %s1131_s6 }
 0x138   :  { %p1136_p13 = por %p1135_p12, %p1134_p11 }
 0x13a   :  { %p1137_p0 = pnand %p1136_p13, %p1132_p10 }
 0x13c   :  { %1140 = shalt.err (!%p1137_p0)  }
 0x13d   :  { %s1141_s0 = scalar_lea.vmem %s1798_s22, 16  ;;  %p1146_p2 = scmp.lt.s32.totalorder %s1798_s22, %s1587_s14 }
 0x13e   :  { %p1142_p1 = scmp.ne.s32.totalorder %s1798_s22, %s1141_s0  ;;  %p1147_p3 = scmp.lt.s32.totalorder %s1613_s5, %s1141_s0 }
 0x140   :  { %p1148_p4 = por %p1147_p3, %p1146_p2 }
 0x142   :  { %p1149_p5 = pnand %p1148_p4, %p1142_p1 }
 0x144   :  { %1152 = shalt.err (!%p1149_p5)  }
 0x145   :  { %266 = dma.hbm_to_vmem [thread:$0]  %s254_s4, 16, %s1798_s22, [#allocation3] }
 0x146   :  { %s1548_s7 = smov [#allocation2 + $0x10]   ;;  %s725_s13 = sld [smem:[#allocation5 + $0x11]] }
 0x147   :  { %s279_s9 = sshll.u32 %s1548_s7, 4  ;;  %s1549_s10 = smov [#allocation2 + $0x11]   ;;  %s280_s9 = int_to_ptr.vmem [resolvable:$true] %s279_s9 }
 0x148   :  { %s295_s11 = sshll.u32 %s1549_s10, 4  ;;  %s1824_s15 = sld [smem:[#allocation5 + $0x12]]  ;;  %s1826_s11 = int_to_ptr.vmem [resolvable:$true] %s295_s11 }
 0x149   :  { %s724_s12 = sshll.u32 %s723_s26, 4 }
 0x14a   :  { %s270_s23 = scalar_lea.hbm %s2047_s1, %s724_s12 }
 0x14b   :  { %s1153_s19 = scalar_lea.hbm %s270_s23, 16  ;;  %p1156_p7 = scmp.lt.s32.totalorder %s270_s23, %s2047_s1 }
 0x14c   :  { %p1154_p6 = scmp.ne.s32.totalorder %s270_s23, %s1153_s19  ;;  %p1157_p8 = scmp.lt.s32.totalorder %s1604_s29, %s1153_s19 }
 0x14e   :  { %p1158_p9 = por %p1157_p8, %p1156_p7 }
 0x150   :  { %p1159_p10 = pnand %p1158_p9, %p1154_p6 }
 0x152   :  { %1162 = shalt.err (!%p1159_p10)  }
 0x153   :  { %s1163_s22 = scalar_lea.vmem %s280_s9, 16  ;;  %p1168_p12 = scmp.lt.s32.totalorder %s280_s9, %s1587_s14 }
 0x154   :  { %p1164_p11 = scmp.ne.s32.totalorder %s280_s9, %s1163_s22  ;;  %p1169_p13 = scmp.lt.s32.totalorder %s1613_s5, %s1163_s22 }
 0x156   :  { %p1170_p0 = por %p1169_p13, %p1168_p12 }
 0x158   :  { %p1171_p1 = pnand %p1170_p0, %p1164_p11 }
 0x15a   :  { %1174 = shalt.err (!%p1171_p1)  }
 0x15b   :  { %282 = dma.hbm_to_vmem [thread:$0]  %s270_s23, 16, %s280_s9, [#allocation3] }
 0x15c   :  { %s726_s24 = sshll.u32 %s725_s13, 4  ;;  %s1550_s25 = smov [#allocation2 + $0x12]  }
 0x15d   :  { %s311_s20 = sshll.u32 %s1550_s25, 4  ;;  %s286_s27 = scalar_lea.hbm %s2047_s1, %s726_s24  ;;  %s1840_s20 = int_to_ptr.vmem [resolvable:$true] %s311_s20 }
 0x15e   :  { %s1175_s30 = scalar_lea.hbm %s286_s27, 16  ;;  %p1178_p3 = scmp.lt.s32.totalorder %s286_s27, %s2047_s1 }
 0x15f   :  { %p1176_p2 = scmp.ne.s32.totalorder %s286_s27, %s1175_s30  ;;  %p1179_p4 = scmp.lt.s32.totalorder %s1604_s29, %s1175_s30 }
 0x161   :  { %p1180_p5 = por %p1179_p4, %p1178_p3 }
 0x163   :  { %p1181_p6 = pnand %p1180_p5, %p1176_p2 }
 0x165   :  { %1184 = shalt.err (!%p1181_p6)  }
 0x166   :  { %s1185_s3 = scalar_lea.vmem %s1826_s11, 16  ;;  %p1190_p8 = scmp.lt.s32.totalorder %s1826_s11, %s1587_s14 }
 0x167   :  { %p1186_p7 = scmp.ne.s32.totalorder %s1826_s11, %s1185_s3  ;;  %p1191_p9 = scmp.lt.s32.totalorder %s1613_s5, %s1185_s3 }
 0x169   :  { %p1192_p10 = por %p1191_p9, %p1190_p8 }
 0x16b   :  { %p1193_p11 = pnand %p1192_p10, %p1186_p7 }
 0x16d   :  { %1196 = shalt.err (!%p1193_p11)  }
 0x16e   :  { %298 = dma.hbm_to_vmem [thread:$0]  %s286_s27, 16, %s1826_s11, [#allocation3] }
 0x16f   :  { %s728_s8 = sshll.u32 %s1824_s15, 4  ;;  %s729_s0 = sld [smem:[#allocation5 + $0x13]] }
 0x170   :  { %s302_s13 = scalar_lea.hbm %s2047_s1, %s728_s8 }
 0x171   :  { %s1197_s10 = scalar_lea.hbm %s302_s13, 16  ;;  %p1200_p13 = scmp.lt.s32.totalorder %s302_s13, %s2047_s1 }
 0x172   :  { %p1198_p12 = scmp.ne.s32.totalorder %s302_s13, %s1197_s10  ;;  %p1201_p0 = scmp.lt.s32.totalorder %s1604_s29, %s1197_s10 }
 0x174   :  { %p1202_p1 = por %p1201_p0, %p1200_p13 }
 0x176   :  { %p1203_p2 = pnand %p1202_p1, %p1198_p12 }
 0x178   :  { %1206 = shalt.err (!%p1203_p2)  }
 0x179   :  { %s1207_s11 = scalar_lea.vmem %s1840_s20, 16  ;;  %p1212_p4 = scmp.lt.s32.totalorder %s1840_s20, %s1587_s14 }
 0x17a   :  { %p1208_p3 = scmp.ne.s32.totalorder %s1840_s20, %s1207_s11  ;;  %p1213_p5 = scmp.lt.s32.totalorder %s1613_s5, %s1207_s11 }
 0x17c   :  { %p1214_p6 = por %p1213_p5, %p1212_p4 }
 0x17e   :  { %p1215_p7 = pnand %p1214_p6, %p1208_p3 }
 0x180   :  { %1218 = shalt.err (!%p1215_p7)  }
 0x181   :  { %314 = dma.hbm_to_vmem [thread:$0]  %s302_s13, 16, %s1840_s20, [#allocation3] }
 0x182   :  { %s1551_s15 = smov [#allocation2 + $0x13]   ;;  %s731_s23 = sld [smem:[#allocation5 + $0x14]] }
 0x183   :  { %s327_s18 = sshll.u32 %s1551_s15, 4  ;;  %s1552_s19 = smov [#allocation2 + $0x14]   ;;  %s328_s18 = int_to_ptr.vmem [resolvable:$true] %s327_s18 }
 0x184   :  { %s343_s21 = sshll.u32 %s1552_s19, 4  ;;  %s1866_s17 = sld [smem:[#allocation5 + $0x15]]  ;;  %s1868_s21 = int_to_ptr.vmem [resolvable:$true] %s343_s21 }
 0x185   :  { %s730_s22 = sshll.u32 %s729_s0, 4 }
 0x186   :  { %s318_s28 = scalar_lea.hbm %s2047_s1, %s730_s22 }
 0x187   :  { %s1219_s26 = scalar_lea.hbm %s318_s28, 16  ;;  %p1222_p9 = scmp.lt.s32.totalorder %s318_s28, %s2047_s1 }
 0x188   :  { %p1220_p8 = scmp.ne.s32.totalorder %s318_s28, %s1219_s26  ;;  %p1223_p10 = scmp.lt.s32.totalorder %s1604_s29, %s1219_s26 }
 0x18a   :  { %p1224_p11 = por %p1223_p10, %p1222_p9 }
 0x18c   :  { %p1225_p12 = pnand %p1224_p11, %p1220_p8 }
 0x18e   :  { %1228 = shalt.err (!%p1225_p12)  }
 0x18f   :  { %s1229_s20 = scalar_lea.vmem %s328_s18, 16  ;;  %p1234_p0 = scmp.lt.s32.totalorder %s328_s18, %s1587_s14 }
 0x190   :  { %p1230_p13 = scmp.ne.s32.totalorder %s328_s18, %s1229_s20  ;;  %p1235_p1 = scmp.lt.s32.totalorder %s1613_s5, %s1229_s20 }
 0x192   :  { %p1236_p2 = por %p1235_p1, %p1234_p0 }
 0x194   :  { %p1237_p3 = pnand %p1236_p2, %p1230_p13 }
 0x196   :  { %1240 = shalt.err (!%p1237_p3)  }
 0x197   :  { %330 = dma.hbm_to_vmem [thread:$0]  %s318_s28, 16, %s328_s18, [#allocation3] }
 0x198   :  { %s732_s4 = sshll.u32 %s731_s23, 4  ;;  %s1553_s6 = smov [#allocation2 + $0x15]  }
 0x199   :  { %s359_s3 = sshll.u32 %s1553_s6, 4  ;;  %s334_s7 = scalar_lea.hbm %s2047_s1, %s732_s4  ;;  %s1882_s3 = int_to_ptr.vmem [resolvable:$true] %s359_s3 }
 0x19a   :  { %s1241_s9 = scalar_lea.hbm %s334_s7, 16  ;;  %p1244_p5 = scmp.lt.s32.totalorder %s334_s7, %s2047_s1 }
 0x19b   :  { %p1242_p4 = scmp.ne.s32.totalorder %s334_s7, %s1241_s9  ;;  %p1245_p6 = scmp.lt.s32.totalorder %s1604_s29, %s1241_s9 }
 0x19d   :  { %p1246_p7 = por %p1245_p6, %p1244_p5 }
 0x19f   :  { %p1247_p8 = pnand %p1246_p7, %p1242_p4 }
 0x1a1   :  { %1250 = shalt.err (!%p1247_p8)  }
 0x1a2   :  { %s1251_s12 = scalar_lea.vmem %s1868_s21, 16  ;;  %p1256_p10 = scmp.lt.s32.totalorder %s1868_s21, %s1587_s14 }
 0x1a3   :  { %p1252_p9 = scmp.ne.s32.totalorder %s1868_s21, %s1251_s12  ;;  %p1257_p11 = scmp.lt.s32.totalorder %s1613_s5, %s1251_s12 }
 0x1a5   :  { %p1258_p12 = por %p1257_p11, %p1256_p10 }
 0x1a7   :  { %p1259_p13 = pnand %p1258_p12, %p1252_p9 }
 0x1a9   :  { %1262 = shalt.err (!%p1259_p13)  }
 0x1aa   :  { %346 = dma.hbm_to_vmem [thread:$0]  %s334_s7, 16, %s1868_s21, [#allocation3] }
 0x1ab   :  { %s734_s16 = sshll.u32 %s1866_s17, 4  ;;  %s735_s11 = sld [smem:[#allocation5 + $0x16]] }
 0x1ac   :  { %s350_s23 = scalar_lea.hbm %s2047_s1, %s734_s16 }
 0x1ad   :  { %s1263_s19 = scalar_lea.hbm %s350_s23, 16  ;;  %p1266_p1 = scmp.lt.s32.totalorder %s350_s23, %s2047_s1 }
 0x1ae   :  { %p1264_p0 = scmp.ne.s32.totalorder %s350_s23, %s1263_s19  ;;  %p1267_p2 = scmp.lt.s32.totalorder %s1604_s29, %s1263_s19 }
 0x1b0   :  { %p1268_p3 = por %p1267_p2, %p1266_p1 }
 0x1b2   :  { %p1269_p4 = pnand %p1268_p3, %p1264_p0 }
 0x1b4   :  { %1272 = shalt.err (!%p1269_p4)  }
 0x1b5   :  { %s1273_s21 = scalar_lea.vmem %s1882_s3, 16  ;;  %p1278_p6 = scmp.lt.s32.totalorder %s1882_s3, %s1587_s14 }
 0x1b6   :  { %p1274_p5 = scmp.ne.s32.totalorder %s1882_s3, %s1273_s21  ;;  %p1279_p7 = scmp.lt.s32.totalorder %s1613_s5, %s1273_s21 }
 0x1b8   :  { %p1280_p8 = por %p1279_p7, %p1278_p6 }
 0x1ba   :  { %p1281_p9 = pnand %p1280_p8, %p1274_p5 }
 0x1bc   :  { %1284 = shalt.err (!%p1281_p9)  }
 0x1bd   :  { %362 = dma.hbm_to_vmem [thread:$0]  %s350_s23, 16, %s1882_s3, [#allocation3] }
 0x1be   :  { %s1554_s17 = smov [#allocation2 + $0x16]   ;;  %s737_s28 = sld [smem:[#allocation5 + $0x17]] }
 0x1bf   :  { %s375_s25 = sshll.u32 %s1554_s17, 4  ;;  %s1555_s26 = smov [#allocation2 + $0x17]   ;;  %s376_s25 = int_to_ptr.vmem [resolvable:$true] %s375_s25 }
 0x1c0   :  { %s391_s27 = sshll.u32 %s1555_s26, 4  ;;  %s1908_s30 = sld [smem:[#allocation5 + $0x18]]  ;;  %s1910_s27 = int_to_ptr.vmem [resolvable:$true] %s391_s27 }
 0x1c1   :  { %s736_s20 = sshll.u32 %s735_s11, 4 }
 0x1c2   :  { %s366_s8 = scalar_lea.hbm %s2047_s1, %s736_s20 }
 0x1c3   :  { %s1285_s0 = scalar_lea.hbm %s366_s8, 16  ;;  %p1288_p11 = scmp.lt.s32.totalorder %s366_s8, %s2047_s1 }
 0x1c4   :  { %p1286_p10 = scmp.ne.s32.totalorder %s366_s8, %s1285_s0  ;;  %p1289_p12 = scmp.lt.s32.totalorder %s1604_s29, %s1285_s0 }
 0x1c6   :  { %p1290_p13 = por %p1289_p12, %p1288_p11 }
 0x1c8   :  { %p1291_p0 = pnand %p1290_p13, %p1286_p10 }
 0x1ca   :  { %1294 = shalt.err (!%p1291_p0)  }
 0x1cb   :  { %s1295_s3 = scalar_lea.vmem %s376_s25, 16  ;;  %p1300_p2 = scmp.lt.s32.totalorder %s376_s25, %s1587_s14 }
 0x1cc   :  { %p1296_p1 = scmp.ne.s32.totalorder %s376_s25, %s1295_s3  ;;  %p1301_p3 = scmp.lt.s32.totalorder %s1613_s5, %s1295_s3 }
 0x1ce   :  { %p1302_p4 = por %p1301_p3, %p1300_p2 }
 0x1d0   :  { %p1303_p5 = pnand %p1302_p4, %p1296_p1 }
 0x1d2   :  { %1306 = shalt.err (!%p1303_p5)  }
 0x1d3   :  { %378 = dma.hbm_to_vmem [thread:$0]  %s366_s8, 16, %s376_s25, [#allocation3] }
 0x1d4   :  { %s738_s13 = sshll.u32 %s737_s28, 4  ;;  %s1556_s10 = smov [#allocation2 + $0x18]  }
 0x1d5   :  { %s407_s12 = sshll.u32 %s1556_s10, 4  ;;  %s382_s15 = scalar_lea.hbm %s2047_s1, %s738_s13  ;;  %s1924_s12 = int_to_ptr.vmem [resolvable:$true] %s407_s12 }
 0x1d6   :  { %s1307_s18 = scalar_lea.hbm %s382_s15, 16  ;;  %p1310_p7 = scmp.lt.s32.totalorder %s382_s15, %s2047_s1 }
 0x1d7   :  { %p1308_p6 = scmp.ne.s32.totalorder %s382_s15, %s1307_s18  ;;  %p1311_p8 = scmp.lt.s32.totalorder %s1604_s29, %s1307_s18 }
 0x1d9   :  { %p1312_p9 = por %p1311_p8, %p1310_p7 }
 0x1db   :  { %p1313_p10 = pnand %p1312_p9, %p1308_p6 }
 0x1dd   :  { %1316 = shalt.err (!%p1313_p10)  }
 0x1de   :  { %s1317_s22 = scalar_lea.vmem %s1910_s27, 16  ;;  %p1322_p12 = scmp.lt.s32.totalorder %s1910_s27, %s1587_s14 }
 0x1df   :  { %p1318_p11 = scmp.ne.s32.totalorder %s1910_s27, %s1317_s22  ;;  %p1323_p13 = scmp.lt.s32.totalorder %s1613_s5, %s1317_s22 }
 0x1e1   :  { %p1324_p0 = por %p1323_p13, %p1322_p12 }
 0x1e3   :  { %p1325_p1 = pnand %p1324_p0, %p1318_p11 }
 0x1e5   :  { %1328 = shalt.err (!%p1325_p1)  }
 0x1e6   :  { %394 = dma.hbm_to_vmem [thread:$0]  %s382_s15, 16, %s1910_s27, [#allocation3] }
 0x1e7   :  { %s740_s24 = sshll.u32 %s1908_s30, 4  ;;  %s741_s21 = sld [smem:[#allocation5 + $0x19]] }
 0x1e8   :  { %s398_s28 = scalar_lea.hbm %s2047_s1, %s740_s24 }
 0x1e9   :  { %s1329_s26 = scalar_lea.hbm %s398_s28, 16  ;;  %p1332_p3 = scmp.lt.s32.totalorder %s398_s28, %s2047_s1 }
 0x1ea   :  { %p1330_p2 = scmp.ne.s32.totalorder %s398_s28, %s1329_s26  ;;  %p1333_p4 = scmp.lt.s32.totalorder %s1604_s29, %s1329_s26 }
 0x1ec   :  { %p1334_p5 = por %p1333_p4, %p1332_p3 }
 0x1ee   :  { %p1335_p6 = pnand %p1334_p5, %p1330_p2 }
 0x1f0   :  { %1338 = shalt.err (!%p1335_p6)  }
 0x1f1   :  { %s1339_s27 = scalar_lea.vmem %s1924_s12, 16  ;;  %p1344_p8 = scmp.lt.s32.totalorder %s1924_s12, %s1587_s14 }
 0x1f2   :  { %p1340_p7 = scmp.ne.s32.totalorder %s1924_s12, %s1339_s27  ;;  %p1345_p9 = scmp.lt.s32.totalorder %s1613_s5, %s1339_s27 }
 0x1f4   :  { %p1346_p10 = por %p1345_p9, %p1344_p8 }
 0x1f6   :  { %p1347_p11 = pnand %p1346_p10, %p1340_p7 }
 0x1f8   :  { %1350 = shalt.err (!%p1347_p11)  }
 0x1f9   :  { %410 = dma.hbm_to_vmem [thread:$0]  %s398_s28, 16, %s1924_s12, [#allocation3] }
 0x1fa   :  { %s1557_s30 = smov [#allocation2 + $0x19]   ;;  %s743_s8 = sld [smem:[#allocation5 + $0x1a]] }
 0x1fb   :  { %s423_s6 = sshll.u32 %s1557_s30, 4  ;;  %s1558_s0 = smov [#allocation2 + $0x1a]   ;;  %s424_s6 = int_to_ptr.vmem [resolvable:$true] %s423_s6 }
 0x1fc   :  { %s439_s7 = sshll.u32 %s1558_s0, 4  ;;  %s1950_s9 = sld [smem:[#allocation5 + $0x1b]]  ;;  %s1952_s7 = int_to_ptr.vmem [resolvable:$true] %s439_s7 }
 0x1fd   :  { %s742_s3 = sshll.u32 %s741_s21, 4 }
 0x1fe   :  { %s414_s16 = scalar_lea.hbm %s2047_s1, %s742_s3 }
 0x1ff   :  { %s1351_s11 = scalar_lea.hbm %s414_s16, 16  ;;  %p1354_p13 = scmp.lt.s32.totalorder %s414_s16, %s2047_s1 }
 0x200   :  { %p1352_p12 = scmp.ne.s32.totalorder %s414_s16, %s1351_s11  ;;  %p1355_p0 = scmp.lt.s32.totalorder %s1604_s29, %s1351_s11 }
 0x202   :  { %p1356_p1 = por %p1355_p0, %p1354_p13 }
 0x204   :  { %p1357_p2 = pnand %p1356_p1, %p1352_p12 }
 0x206   :  { %1360 = shalt.err (!%p1357_p2)  }
 0x207   :  { %s1361_s12 = scalar_lea.vmem %s424_s6, 16  ;;  %p1366_p4 = scmp.lt.s32.totalorder %s424_s6, %s1587_s14 }
 0x208   :  { %p1362_p3 = scmp.ne.s32.totalorder %s424_s6, %s1361_s12  ;;  %p1367_p5 = scmp.lt.s32.totalorder %s1613_s5, %s1361_s12 }
 0x20a   :  { %p1368_p6 = por %p1367_p5, %p1366_p4 }
 0x20c   :  { %p1369_p7 = pnand %p1368_p6, %p1362_p3 }
 0x20e   :  { %1372 = shalt.err (!%p1369_p7)  }
 0x20f   :  { %426 = dma.hbm_to_vmem [thread:$0]  %s414_s16, 16, %s424_s6, [#allocation3] }
 0x210   :  { %s744_s23 = sshll.u32 %s743_s8, 4  ;;  %s1559_s19 = smov [#allocation2 + $0x1b]  }
 0x211   :  { %s455_s22 = sshll.u32 %s1559_s19, 4  ;;  %s430_s17 = scalar_lea.hbm %s2047_s1, %s744_s23  ;;  %s1966_s22 = int_to_ptr.vmem [resolvable:$true] %s455_s22 }
 0x212   :  { %s1373_s25 = scalar_lea.hbm %s430_s17, 16  ;;  %p1376_p9 = scmp.lt.s32.totalorder %s430_s17, %s2047_s1 }
 0x213   :  { %p1374_p8 = scmp.ne.s32.totalorder %s430_s17, %s1373_s25  ;;  %p1377_p10 = scmp.lt.s32.totalorder %s1604_s29, %s1373_s25 }
 0x215   :  { %p1378_p11 = por %p1377_p10, %p1376_p9 }
 0x217   :  { %p1379_p12 = pnand %p1378_p11, %p1374_p8 }
 0x219   :  { %1382 = shalt.err (!%p1379_p12)  }
 0x21a   :  { %s1383_s20 = scalar_lea.vmem %s1952_s7, 16  ;;  %p1388_p0 = scmp.lt.s32.totalorder %s1952_s7, %s1587_s14 }
 0x21b   :  { %p1384_p13 = scmp.ne.s32.totalorder %s1952_s7, %s1383_s20  ;;  %p1389_p1 = scmp.lt.s32.totalorder %s1613_s5, %s1383_s20 }
 0x21d   :  { %p1390_p2 = por %p1389_p1, %p1388_p0 }
 0x21f   :  { %p1391_p3 = pnand %p1390_p2, %p1384_p13 }
 0x221   :  { %1394 = shalt.err (!%p1391_p3)  }
 0x222   :  { %442 = dma.hbm_to_vmem [thread:$0]  %s430_s17, 16, %s1952_s7, [#allocation3] }
 0x223   :  { %s746_s4 = sshll.u32 %s1950_s9, 4  ;;  %s747_s27 = sld [smem:[#allocation5 + $0x1c]] }
 0x224   :  { %s446_s8 = scalar_lea.hbm %s2047_s1, %s746_s4 }
 0x225   :  { %s1395_s0 = scalar_lea.hbm %s446_s8, 16  ;;  %p1398_p5 = scmp.lt.s32.totalorder %s446_s8, %s2047_s1 }
 0x226   :  { %p1396_p4 = scmp.ne.s32.totalorder %s446_s8, %s1395_s0  ;;  %p1399_p6 = scmp.lt.s32.totalorder %s1604_s29, %s1395_s0 }
 0x228   :  { %p1400_p7 = por %p1399_p6, %p1398_p5 }
 0x22a   :  { %p1401_p8 = pnand %p1400_p7, %p1396_p4 }
 0x22c   :  { %1404 = shalt.err (!%p1401_p8)  }
 0x22d   :  { %s1405_s7 = scalar_lea.vmem %s1966_s22, 16  ;;  %p1410_p10 = scmp.lt.s32.totalorder %s1966_s22, %s1587_s14 }
 0x22e   :  { %p1406_p9 = scmp.ne.s32.totalorder %s1966_s22, %s1405_s7  ;;  %p1411_p11 = scmp.lt.s32.totalorder %s1613_s5, %s1405_s7 }
 0x230   :  { %p1412_p12 = por %p1411_p11, %p1410_p10 }
 0x232   :  { %p1413_p13 = pnand %p1412_p12, %p1406_p9 }
 0x234   :  { %1416 = shalt.err (!%p1413_p13)  }
 0x235   :  { %458 = dma.hbm_to_vmem [thread:$0]  %s446_s8, 16, %s1966_s22, [#allocation3] }
 0x236   :  { %s1560_s9 = smov [#allocation2 + $0x1c]   ;;  %s749_s16 = sld [smem:[#allocation5 + $0x1d]] }
 0x237   :  { %s471_s10 = sshll.u32 %s1560_s9, 4  ;;  %s1561_s11 = smov [#allocation2 + $0x1d]   ;;  %s472_s10 = int_to_ptr.vmem [resolvable:$true] %s471_s10 }
 0x238   :  { %s487_s15 = sshll.u32 %s1561_s11, 4  ;;  %s1992_s18 = sld [smem:[#allocation5 + $0x1e]]  ;;  %s1994_s15 = int_to_ptr.vmem [resolvable:$true] %s487_s15 }
 0x239   :  { %s748_s12 = sshll.u32 %s747_s27, 4 }
 0x23a   :  { %s462_s24 = scalar_lea.hbm %s2047_s1, %s748_s12 }
 0x23b   :  { %s1417_s21 = scalar_lea.hbm %s462_s24, 16  ;;  %p1420_p1 = scmp.lt.s32.totalorder %s462_s24, %s2047_s1 }
 0x23c   :  { %p1418_p0 = scmp.ne.s32.totalorder %s462_s24, %s1417_s21  ;;  %p1421_p2 = scmp.lt.s32.totalorder %s1604_s29, %s1417_s21 }
 0x23e   :  { %p1422_p3 = por %p1421_p2, %p1420_p1 }
 0x240   :  { %p1423_p4 = pnand %p1422_p3, %p1418_p0 }
 0x242   :  { %1426 = shalt.err (!%p1423_p4)  }
 0x243   :  { %s1427_s22 = scalar_lea.vmem %s472_s10, 16  ;;  %p1432_p6 = scmp.lt.s32.totalorder %s472_s10, %s1587_s14 }
 0x244   :  { %p1428_p5 = scmp.ne.s32.totalorder %s472_s10, %s1427_s22  ;;  %p1433_p7 = scmp.lt.s32.totalorder %s1613_s5, %s1427_s22 }
 0x246   :  { %p1434_p8 = por %p1433_p7, %p1432_p6 }
 0x248   :  { %p1435_p9 = pnand %p1434_p8, %p1428_p5 }
 0x24a   :  { %1438 = shalt.err (!%p1435_p9)  }
 0x24b   :  { %474 = dma.hbm_to_vmem [thread:$0]  %s462_s24, 16, %s472_s10, [#allocation3] }
 0x24c   :  { %s750_s28 = sshll.u32 %s749_s16, 4  ;;  %s1562_s26 = smov [#allocation2 + $0x1e]  }
 0x24d   :  { %s503_s20 = sshll.u32 %s1562_s26, 4  ;;  %s478_s30 = scalar_lea.hbm %s2047_s1, %s750_s28  ;;  %s2008_s20 = int_to_ptr.vmem [resolvable:$true] %s503_s20 }
 0x24e   :  { %s1439_s6 = scalar_lea.hbm %s478_s30, 16  ;;  %p1442_p11 = scmp.lt.s32.totalorder %s478_s30, %s2047_s1 }
 0x24f   :  { %p1440_p10 = scmp.ne.s32.totalorder %s478_s30, %s1439_s6  ;;  %p1443_p12 = scmp.lt.s32.totalorder %s1604_s29, %s1439_s6 }
 0x251   :  { %p1444_p13 = por %p1443_p12, %p1442_p11 }
 0x253   :  { %p1445_p0 = pnand %p1444_p13, %p1440_p10 }
 0x255   :  { %1448 = shalt.err (!%p1445_p0)  }
 0x256   :  { %s1449_s3 = scalar_lea.vmem %s1994_s15, 16  ;;  %p1454_p2 = scmp.lt.s32.totalorder %s1994_s15, %s1587_s14 }
 0x257   :  { %p1450_p1 = scmp.ne.s32.totalorder %s1994_s15, %s1449_s3  ;;  %p1455_p3 = scmp.lt.s32.totalorder %s1613_s5, %s1449_s3 }
 0x259   :  { %p1456_p4 = por %p1455_p3, %p1454_p2 }
 0x25b   :  { %p1457_p5 = pnand %p1456_p4, %p1450_p1 }
 0x25d   :  { %1460 = shalt.err (!%p1457_p5)  }
 0x25e   :  { %490 = dma.hbm_to_vmem [thread:$0]  %s478_s30, 16, %s1994_s15, [#allocation3] }
 0x25f   :  { %s752_s13 = sshll.u32 %s1992_s18, 4  ;;  %s753_s7 = sld [smem:[#allocation5 + $0x1f]] }
 0x260   :  { %s494_s16 = scalar_lea.hbm %s2047_s1, %s752_s13 }
 0x261   :  { %s1461_s11 = scalar_lea.hbm %s494_s16, 16  ;;  %p1464_p7 = scmp.lt.s32.totalorder %s494_s16, %s2047_s1 }
 0x262   :  { %p1462_p6 = scmp.ne.s32.totalorder %s494_s16, %s1461_s11  ;;  %p1465_p8 = scmp.lt.s32.totalorder %s1604_s29, %s1461_s11 }
 0x264   :  { %p1466_p9 = por %p1465_p8, %p1464_p7 }
 0x266   :  { %p1467_p10 = pnand %p1466_p9, %p1462_p6 }
 0x268   :  { %1470 = shalt.err (!%p1467_p10)  }
 0x269   :  { %s1471_s15 = scalar_lea.vmem %s2008_s20, 16  ;;  %p1476_p12 = scmp.lt.s32.totalorder %s2008_s20, %s1587_s14 }
 0x26a   :  { %p1472_p11 = scmp.ne.s32.totalorder %s2008_s20, %s1471_s15  ;;  %p1477_p13 = scmp.lt.s32.totalorder %s1613_s5, %s1471_s15 }
 0x26c   :  { %p1478_p0 = por %p1477_p13, %p1476_p12 }
 0x26e   :  { %p1479_p1 = pnand %p1478_p0, %p1472_p11 }
 0x270   :  { %1482 = shalt.err (!%p1479_p1)  }
 0x271   :  { %506 = dma.hbm_to_vmem [thread:$0]  %s494_s16, 16, %s2008_s20, [#allocation3] }
 0x272   :  { %s1563_s18 = smov [#allocation2 + $0x1f]   ;;  %s754_s24 = sshll.u32 %s753_s7, 4 }
 0x273   :  { %s519_s19 = sshll.u32 %s1563_s18, 4  ;;  %s510_s25 = scalar_lea.hbm %s2047_s1, %s754_s24  ;;  %s520_s19 = int_to_ptr.vmem [resolvable:$true] %s519_s19 }
 0x274   :  { %s1483_s22 = scalar_lea.hbm %s510_s25, 16  ;;  %p1486_p3 = scmp.lt.s32.totalorder %s510_s25, %s2047_s1 }
 0x275   :  { %p1484_p2 = scmp.ne.s32.totalorder %s510_s25, %s1483_s22  ;;  %p1487_p4 = scmp.lt.s32.totalorder %s1604_s29, %s1483_s22 }
 0x277   :  { %p1488_p5 = por %p1487_p4, %p1486_p3 }
 0x279   :  { %p1489_p6 = pnand %p1488_p5, %p1484_p2 }
 0x27b   :  { %1492 = shalt.err (!%p1489_p6)  }
 0x27c   :  { %s1493_s4 = scalar_lea.vmem %s520_s19, 16  ;;  %p1498_p8 = scmp.lt.s32.totalorder %s520_s19, %s1587_s14 }
 0x27d   :  { %p1494_p7 = scmp.ne.s32.totalorder %s520_s19, %s1493_s4  ;;  %p1499_p9 = scmp.lt.s32.totalorder %s1613_s5, %s1493_s4 }
 0x27f   :  { %p1500_p10 = por %p1499_p9, %p1498_p8 }
 0x281   :  { %p1501_p11 = pnand %p1500_p10, %p1494_p7 }
 0x283   :  { %1504 = shalt.err (!%p1501_p11)  }
 0x284   :  { %522 = dma.hbm_to_vmem [thread:$0]  %s510_s25, 16, %s520_s19, [#allocation3] }
 0x285   :  { %1527 = dma.done.wait [#allocation3], 512 }
 0x286   :  { %1528 = vsyncadd [#allocation3], 4294966784  ;;  %v587_v0 = vld [vmem:[#allocation2] sm:$0xff]  ;;  %v588_v1 = vld [vmem:[#allocation2 + $0x8] sm:$0xff]  ;;  %s1564_s1 = smov [#allocation6]  }
 0x287   :  { %v589_v2 = vld [vmem:[#allocation2 + $0x10] sm:$0xff]  ;;  %s604_s29 = sshll.u32 %s1564_s1, 4  ;;  %v591_v3 = vmul.f32 11.313708, %v587_v0  ;;  %v592_v4 = vmul.f32 11.313708, %v588_v1  ;;  %s605_s29 = int_to_ptr.vmem [resolvable:$true] %s604_s29 }
 0x288   :  { %v593_v5 = vmul.f32 11.313708, %v589_v2  ;;  %v590_v6 = vld [vmem:[#allocation2 + $0x18] sm:$0xff]  ;;  %s1505_s14 = scalar_lea.vmem %s605_s29, 512  ;;  %p1510_p13 = scmp.lt.s32.totalorder %s605_s29, %s605_s29 }
 0x289   :  { %595 = vst [vmem:[#allocation6] sm:$0xff] %v591_v3  ;;  %596 = vst [vmem:[#allocation6 + $0x8] sm:$0xff] %v592_v4  ;;  %v594_v7 = vmul.f32 11.313708, %v590_v6  ;;  %p1506_p12 = scmp.ne.s32.totalorder %s605_s29, %s1505_s14  ;;  %p1511_p0 = scmp.lt.s32.totalorder %s1505_s14, %s1505_s14 }
 0x28a   :  { %597 = vst [vmem:[#allocation6 + $0x10] sm:$0xff] %v593_v5 }
 0x28b   :  { %598 = vst [vmem:[#allocation6 + $0x18] sm:$0xff] %v594_v7  ;;  %p1512_p1 = por %p1511_p0, %p1510_p13 }
 0x28d   :  { %p1513_p2 = pnand %p1512_p1, %p1506_p12 }
 0x28f   :  { %1516 = shalt.err (!%p1513_p2)
}
 0x290   :  { %s1565_s5 = smov 128   ;;  %s1566_s20 = smov 8  }
 0x291   :  { %610 = dma.vmem_to_hbm [thread:$0]  %s605_s29, 512, %s2048_s2, [#allocation7], %s1565_s5, %s1565_s5, %s1566_s20  }
 0x292   :  { %1529 = dma.done.wait [#allocation7], 512  }
 0x293   :  { %1530 = vsyncadd [#allocation7], 4294966784 }
 0x294   :  { %614 = vsyncpa [#allocation7], 1 }
 0x295   :  { %615 = vsyncmov [#allocation3] }
 0x298   :  { %s616_s6 = vpop.sfrf %615 }
 0x299   :  { %p755_p3 = scmp.ne.s32.totalorder %s616_s6, 0 }
 0x29b   :  { %620 = shalt.err (%p755_p3)  }
 0x29c   :  { %622 = vsyncmov [#allocation3 + $0x1] }
 0x29f   :  { %s623_s8 = vpop.sfrf %622 }
 0x2a0   :  { %p756_p4 = scmp.ne.s32.totalorder %s623_s8, 0 }
 0x2a2   :  { %627 = shalt.err (%p756_p4)  }

</bundles_post_ra>
